<compile_context>
chip_gen: v7x
topology: tpu7x:2x2x1
jax: 0.10.0
libtpu: 0.0.40
codegen_flags: <defaults>
</compile_context>

<pallas_src>
import functools

import jax
import jax.numpy as jnp
from jax import lax
from jax.experimental import pallas as pl
from jax.experimental.pallas import tpu as pltpu


_TAPS = tuple((dh, dw) for dh in range(3) for dw in range(3))


# ------------------------------ Pallas kernel ------------------------------ #
def _deep_up_kernel(alpha_ref, x_ref, wd_ref, bd_ref, w1_ref, b1_ref,
                    w2_ref, b2_ref, w3_ref, b3_ref, o_ref,
                    padc_ref, pad4_ref, im1_ref, im2_ref):
    NB, HW, Cin = x_ref.shape
    C = wd_ref.shape[1]
    C4 = 4 * C
    H = padc_ref.shape[1] - 2
    W = padc_ref.shape[2] - 2
    M = NB * HW

    def prelu(y, a):
        return jnp.where(y >= 0.0, y, a * y)

    def zero_halo_ring(pad_ref):
        # Zero only the 1-pixel halo ring (O(perimeter)) — the interior is fully
        # overwritten below by every conv, so no full-buffer zero store is needed.
        c = pad_ref.shape[3]
        zrow = jnp.zeros((NB, 1, W + 2, c), pad_ref.dtype)
        pad_ref[:, 0:1, :, :] = zrow
        pad_ref[:, H + 1:H + 2, :, :] = zrow
        zcol = jnp.zeros((NB, H + 2, 1, c), pad_ref.dtype)
        pad_ref[:, :, 0:1, :] = zcol
        pad_ref[:, :, W + 1:W + 2, :] = zcol

    def store_interior(pad_ref, act):
        c = pad_ref.shape[3]
        pad_ref[:, 1:H + 1, 1:W + 1, :] = act.reshape(NB, H, W, c)

    def conv3x3(pad_ref, im_ref, w_ref, b_ref, a):
        # Phase-packed 3x3 conv as ONE deep-K MXU matmul: gather the 9 shifted
        # taps into the bf16 im2col scratch (M, 9*cin), then a single dot against
        # the pre-concatenated (9*cin, cout) weight; f32 accumulation in the MXU.
        c = pad_ref.shape[3]
        ap = pad_ref[...]                                       # (NB, H+2, W+2, c)
        for t, (dh, dw) in enumerate(_TAPS):
            tap = ap[:, dh:dh + H, dw:dw + W, :].reshape(M, c)
            im_ref[:, t * c:(t + 1) * c] = tap.astype(im_ref.dtype)
        y = jnp.dot(im_ref[...], w_ref[...], preferred_element_type=jnp.float32)
        return prelu(y + b_ref[...], a)

    zero_halo_ring(padc_ref)
    zero_halo_ring(pad4_ref)

    # ---- deep_conv: 1x1 conv + PReLU (one MXU matmul over all NB*H*W rows) ----
    x = x_ref[...].reshape(M, Cin)                               # bf16, clean merge
    deep = prelu(jnp.dot(x, wd_ref[...], preferred_element_type=jnp.float32)
                 + bd_ref[...], alpha_ref[0])                    # (M, C) f32

    # ---- conv1: ConvTranspose2d(4,2,1) + PReLU (phase-packed, low-res grid) ----
    store_interior(padc_ref, deep)
    c1 = conv3x3(padc_ref, im1_ref, w1_ref, b1_ref, alpha_ref[1])    # (M, 4C) f32

    # ---- conv2: Conv2d(4,2,1) + PReLU on phase-packed c1, minus deep (f32) -----
    store_interior(pad4_ref, c1)
    c2 = conv3x3(pad4_ref, im2_ref, w2_ref, b2_ref, alpha_ref[2]) - deep

    # ---- conv3: ConvTranspose2d(4,2,1) + PReLU, plus conv1 (f32) ---------------
    store_interior(padc_ref, c2)
    c3 = conv3x3(padc_ref, im1_ref, w3_ref, b3_ref, alpha_ref[3]) + c1

    # Phase-packed output, no in-kernel layout shuffle; lane-dense for realistic C
    # (C4 = 4*C >= 128 once C >= 32).
    o_ref[...] = c3.reshape(NB, HW, C4)


# --------------------- phase-packing of the conv weights -------------------- #
def _pack_convT_phase(wt):
    """ConvTranspose2d(C,C,4,2,1) weight (Cin, Cout, 4, 4) -> (9*Cin, 4*Cout):
    a 3x3 conv on the low-res grid with the 9 taps concatenated along K
    (tap-major, cin within — matching the im2col column order); output channels
    ordered (ph, pw, cout)."""
    cin, cout = wt.shape[0], wt.shape[1]
    khmap = {(0, 0): 3, (0, 1): 1, (1, 1): 2, (1, 2): 0}    # (phase, tap dh) -> kh
    w9 = jnp.zeros((3, 3, cin, 2, 2, cout), wt.dtype)
    for (ph, dh), kh in khmap.items():
        for (pw, dw), kw in khmap.items():
            w9 = w9.at[dh, dw, :, ph, pw, :].set(wt[:, :, kh, kw])
    return w9.reshape(9 * cin, 4 * cout)


def _pack_conv_phase(wc):
    """Conv2d(C,C,4,2,1) weight (Cout, Cin, 4, 4) -> (9*4*Cin, Cout): a 3x3 conv
    on the phase-packed low-res input, taps concatenated along K (tap-major);
    input channels ordered (ph, pw, cin)."""
    cout, cin = wc.shape[0], wc.shape[1]
    khmap = {(0, 1): 0, (1, 0): 1, (1, 1): 2, (2, 0): 3}    # (tap dh, phase) -> kh
    w9 = jnp.zeros((3, 3, 2, 2, cin, cout), wc.dtype)
    for (dh, ph), kh in khmap.items():
        for (dw, pw), kw in khmap.items():
            w9 = w9.at[dh, dw, ph, pw, :, :].set(wc[:, :, kh, kw].T)
    return w9.reshape(9 * 4 * cin, cout)


# ------------------------------ VMEM budgeting ------------------------------ #
def _vmem_limit_bytes():
    # v5e/v6e: 128 MiB physical VMEM -> ~96 MiB scoped; v7x: 64 MiB -> ~48 MiB.
    try:
        cap = int(pltpu.get_tpu_info().vmem_capacity_bytes)
    except Exception:
        return 48 * 1024 * 1024
    return int(min(100 * 1024 * 1024, (cap * 3) // 4))


# ------------------------------ forward wrapper ----------------------------- #
def deep_up_block_forward(x_nchw, params, channels, kernel_size, stride, padding):
    # Phase decomposition is specialised to the canonical DBPN 2x config.
    # TODO(synk): general (kernel_size, stride, padding) phase packing.
    assert (kernel_size, stride, padding) == (4, 2, 1)
    C = channels
    C4 = 4 * C
    N, Cin, H, W = x_nchw.shape
    HW = H * W

    # Images per grid step: fill the MXU M dimension (>= 256 rows) when images
    # are small; NB must divide N.
    NB = min(N, max(1, -(-256 // HW)))
    while N % NB:
        NB -= 1
    M = NB * HW

    # Pre-flatten in XLA so the kernel does no input reshape-copy.
    x = jnp.transpose(x_nchw, (0, 2, 3, 1)).reshape(N, HW, Cin).astype(jnp.bfloat16)

    wd = jnp.transpose(params["deep_w"][:, :, 0, 0]).astype(jnp.bfloat16)   # (Cin, C)
    bd = params["deep_b"].reshape(1, C).astype(jnp.float32)
    w1 = _pack_convT_phase(params["w1"]).astype(jnp.bfloat16)               # (9C, 4C)
    b1 = jnp.tile(params["b1"], 4).reshape(1, C4).astype(jnp.float32)
    w2 = _pack_conv_phase(params["w2"]).astype(jnp.bfloat16)                # (36C, C)
    b2 = params["b2"].reshape(1, C).astype(jnp.float32)
    w3 = _pack_convT_phase(params["w3"]).astype(jnp.bfloat16)               # (9C, 4C)
    b3 = jnp.tile(params["b3"], 4).reshape(1, C4).astype(jnp.float32)
    alphas = jnp.stack([params["deep_a"], params["a1"],
                        params["a2"], params["a3"]]).astype(jnp.float32)

    def full(shape):
        return pl.BlockSpec(shape, lambda n: (0,) * len(shape))

    # TODO(synk): add a spatial row-tile grid axis (1-row halo) for large images so
    # the per-step working set stays within v7x's 64 MiB VMEM, and switch the halo
    # scratch to bf16 once the tile width is a multiple of 16 sublanes.
    out_pp = pl.pallas_call(
        _deep_up_kernel,
        out_shape=jax.ShapeDtypeStruct((N, HW, C4), jnp.float32),
        grid=(N // NB,),
        in_specs=[
            pl.BlockSpec(memory_space=pltpu.SMEM),                 # PReLU alphas
            pl.BlockSpec((NB, HW, Cin), lambda n: (n, 0, 0)),      # x (bf16)
            full((Cin, C)), full((1, C)),                          # deep 1x1
            full((9 * C, C4)), full((1, C4)),                      # conv1 (convT)
            full((9 * C4, C)), full((1, C)),                       # conv2 (conv)
            full((9 * C, C4)), full((1, C4)),                      # conv3 (convT)
        ],
        out_specs=pl.BlockSpec((NB, HW, C4), lambda n: (n, 0, 0)),
        scratch_shapes=[
            pltpu.VMEM((NB, H + 2, W + 2, C), jnp.float32),    # haloed deep / c2
            pltpu.VMEM((NB, H + 2, W + 2, C4), jnp.float32),   # haloed c1
            pltpu.VMEM((M, 9 * C), jnp.bfloat16),              # im2col for conv1/3
            pltpu.VMEM((M, 9 * C4), jnp.bfloat16),             # im2col for conv2
        ],
        compiler_params=pltpu.CompilerParams(
            dimension_semantics=("parallel",),
            vmem_limit_bytes=_vmem_limit_bytes()),
    )(alphas, x, wd, bd, w1, b1, w2, b2, w3, b3)

    # 2x2 depth-to-space + NHWC->NCHW.  Both are pure layout transposes at the
    # module boundary (NCHW output is required anyway), so XLA fuses them into a
    # single copy pass.
    out = out_pp.reshape(N, H, W, 2, 2, C)
    out = jnp.transpose(out, (0, 1, 3, 2, 4, 5)).reshape(N, 2 * H, 2 * W, C)
    return jnp.transpose(out, (0, 3, 1, 2))


# ----------------------------- pure-JAX reference --------------------------- #
def _prelu(y, a):
    return jnp.where(y >= 0.0, y, a * y)


def _ref_conv(x_nhwc, W, b, s, p):
    w_hwio = jnp.transpose(W, (2, 3, 1, 0))
    y = lax.conv_general_dilated(x_nhwc, w_hwio, (s, s), [(p, p), (p, p)],
                                 dimension_numbers=("NHWC", "HWIO", "NHWC"))
    return y + b


def _ref_convT(x_nhwc, W, b, k, s, p):
    w_hwio = jnp.transpose(jnp.flip(W, (2, 3)), (2, 3, 0, 1))
    y = lax.conv_general_dilated(x_nhwc, w_hwio, (1, 1),
                                 [(k - 1 - p, k - 1 - p)] * 2,
                                 lhs_dilation=(s, s),
                                 dimension_numbers=("NHWC", "HWIO", "NHWC"))
    return y + b


def reference_forward(x_nchw, params, channels, k, s, p):
    x = jnp.transpose(x_nchw, (0, 2, 3, 1)).astype(jnp.float32)
    deep = _prelu(_ref_conv(x, params["deep_w"], params["deep_b"], 1, 0), params["deep_a"])
    c1 = _prelu(_ref_convT(deep, params["w1"], params["b1"], k, s, p), params["a1"])
    c2 = _prelu(_ref_conv(c1, params["w2"], params["b2"], s, p), params["a2"]) - deep
    c3 = _prelu(_ref_convT(c2, params["w3"], params["b3"], k, s, p), params["a3"]) + c1
    return jnp.transpose(c3, (0, 3, 1, 2))


# ----------------------------------- main ------------------------------------ #
if __name__ == "__main__":
    channels, kernel_size, stride, padding, num_stage = 4, 4, 2, 1, 2
    N, Hin, Win = 2, 8, 8

    key = jax.random.PRNGKey(0)
    keys = jax.random.split(key, 10)
    params = {
        "deep_w": jax.random.normal(keys[0], (channels, channels * num_stage, 1, 1), jnp.float32) * 0.1,
        "deep_b": jax.random.normal(keys[1], (channels,), jnp.float32) * 0.01,
        "deep_a": jnp.float32(0.25),  # PReLU default init
        "w1": jax.random.normal(keys[2], (channels, channels, kernel_size, kernel_size), jnp.float32) * 0.1,
        "b1": jax.random.normal(keys[3], (channels,), jnp.float32) * 0.01,
        "a1": jnp.float32(0.25),
        "w2": jax.random.normal(keys[4], (channels, channels, kernel_size, kernel_size), jnp.float32) * 0.1,
        "b2": jax.random.normal(keys[5], (channels,), jnp.float32) * 0.01,
        "a2": jnp.float32(0.25),
        "w3": jax.random.normal(keys[6], (channels, channels, kernel_size, kernel_size), jnp.float32) * 0.1,
        "b3": jax.random.normal(keys[7], (channels,), jnp.float32) * 0.01,
        "a3": jnp.float32(0.25),
    }

    # PyTorch-style NCHW input: (N, channels * num_stage, H, W)
    x = jax.random.normal(keys[8], (N, channels * num_stage, Hin, Win), jnp.float32)

    fwd = jax.jit(functools.partial(deep_up_block_forward, channels=channels,
                                    kernel_size=kernel_size, stride=stride,
                                    padding=padding))
    out = fwd(x, params)
    out = jax.block_until_ready(out)

    ref = reference_forward(x, params, channels, kernel_size, stride, padding)
    assert out.shape == (N, channels, 2 * Hin, 2 * Win), out.shape
    # bf16 MXU operands -> relaxed tolerance vs the f32 lax reference
    assert jnp.allclose(out, ref, atol=2e-2, rtol=2e-2), float(jnp.max(jnp.abs(out - ref)))

    print("KERNEL_OK")
</pallas_src>

<mosaic_0001>
module attributes {stable_mosaic.version = 11 : i64} {
  func.func @_deep_up_kernel(%arg0: i32, %arg1: memref<4xf32, #tpu.memory_space<smem>>, %arg2: memref<2x64x8xbf16, #tpu.memory_space<vmem>>, %arg3: memref<8x4xbf16, #tpu.memory_space<vmem>>, %arg4: memref<1x4xf32, #tpu.memory_space<vmem>>, %arg5: memref<36x16xbf16, #tpu.memory_space<vmem>>, %arg6: memref<1x16xf32, #tpu.memory_space<vmem>>, %arg7: memref<144x4xbf16, #tpu.memory_space<vmem>>, %arg8: memref<1x4xf32, #tpu.memory_space<vmem>>, %arg9: memref<36x16xbf16, #tpu.memory_space<vmem>>, %arg10: memref<1x16xf32, #tpu.memory_space<vmem>>, %arg11: memref<2x64x16xf32, #tpu.memory_space<vmem>>, %arg12: memref<2x10x10x4xf32, #tpu.memory_space<vmem>>, %arg13: memref<2x10x10x16xf32, #tpu.memory_space<vmem>>, %arg14: memref<128x36xbf16, #tpu.memory_space<vmem>>, %arg15: memref<128x144xbf16, #tpu.memory_space<vmem>>) attributes {dimension_semantics = [#tpu.dimension_semantics<parallel>], iteration_bounds = array<i64: 1>, scalar_prefetch = 0 : i64, scratch_operands = 4 : i64, tpu.core_type = #tpu.core_type<tc>, window_params = [{transform_indices = @transform_0, window_bounds = array<i64: 4>}, {transform_indices = @transform_1, window_bounds = array<i64: 2, 64, 8>}, {pipeline_mode = #tpu.pipeline_mode<synchronous>, transform_indices = @transform_2, window_bounds = array<i64: 8, 4>}, {pipeline_mode = #tpu.pipeline_mode<synchronous>, transform_indices = @transform_3, window_bounds = array<i64: 1, 4>}, {pipeline_mode = #tpu.pipeline_mode<synchronous>, transform_indices = @transform_4, window_bounds = array<i64: 36, 16>}, {pipeline_mode = #tpu.pipeline_mode<synchronous>, transform_indices = @transform_5, window_bounds = array<i64: 1, 16>}, {pipeline_mode = #tpu.pipeline_mode<synchronous>, transform_indices = @transform_6, window_bounds = array<i64: 144, 4>}, {pipeline_mode = #tpu.pipeline_mode<synchronous>, transform_indices = @transform_7, window_bounds = array<i64: 1, 4>}, {pipeline_mode = #tpu.pipeline_mode<synchronous>, transform_indices = @transform_8, window_bounds = array<i64: 36, 16>}, {pipeline_mode = #tpu.pipeline_mode<synchronous>, transform_indices = @transform_9, window_bounds = array<i64: 1, 16>}, {transform_indices = @transform_10, window_bounds = array<i64: 2, 64, 16>}]} {
    %cst = arith.constant 0.000000e+00 : f32
    %0 = vector.broadcast %cst : f32 to vector<2x1x10x4xf32>
    %c0 = arith.constant 0 : index
    %c0_0 = arith.constant 0 : index
    %c0_1 = arith.constant 0 : index
    %c0_2 = arith.constant 0 : index
    %1 = vector.load %arg12[%c0, %c0_0, %c0_1, %c0_2] : memref<2x10x10x4xf32, #tpu.memory_space<vmem>>, vector<2x1x10x4xf32>
    tpu.vector_store %arg12[%c0, %c0_0, %c0_1, %c0_2], %0 {strides = array<i32>} : memref<2x10x10x4xf32, #tpu.memory_space<vmem>>, vector<2x1x10x4xf32>,
    %c0_3 = arith.constant 0 : index
    %c9 = arith.constant 9 : index
    %c0_4 = arith.constant 0 : index
    %c0_5 = arith.constant 0 : index
    %2 = vector.load %arg12[%c0_3, %c9, %c0_4, %c0_5] : memref<2x10x10x4xf32, #tpu.memory_space<vmem>>, vector<2x1x10x4xf32>
    tpu.vector_store %arg12[%c0_3, %c9, %c0_4, %c0_5], %0 {strides = array<i32>} : memref<2x10x10x4xf32, #tpu.memory_space<vmem>>, vector<2x1x10x4xf32>,
    %cst_6 = arith.constant 0.000000e+00 : f32
    %3 = vector.broadcast %cst_6 : f32 to vector<2x10x1x4xf32>
    %c0_7 = arith.constant 0 : index
    %c0_8 = arith.constant 0 : index
    %c0_9 = arith.constant 0 : index
    %c0_10 = arith.constant 0 : index
    %4 = vector.load %arg12[%c0_7, %c0_8, %c0_9, %c0_10] : memref<2x10x10x4xf32, #tpu.memory_space<vmem>>, vector<2x10x1x4xf32>
    tpu.vector_store %arg12[%c0_7, %c0_8, %c0_9, %c0_10], %3 {strides = array<i32>} : memref<2x10x10x4xf32, #tpu.memory_space<vmem>>, vector<2x10x1x4xf32>,
    %c0_11 = arith.constant 0 : index
    %c0_12 = arith.constant 0 : index
    %c9_13 = arith.constant 9 : index
    %c0_14 = arith.constant 0 : index
    %5 = vector.load %arg12[%c0_11, %c0_12, %c9_13, %c0_14] : memref<2x10x10x4xf32, #tpu.memory_space<vmem>>, vector<2x10x1x4xf32>
    tpu.vector_store %arg12[%c0_11, %c0_12, %c9_13, %c0_14], %3 {strides = array<i32>} : memref<2x10x10x4xf32, #tpu.memory_space<vmem>>, vector<2x10x1x4xf32>,
    %cst_15 = arith.constant 0.000000e+00 : f32
    %6 = vector.broadcast %cst_15 : f32 to vector<2x1x10x16xf32>
    %c0_16 = arith.constant 0 : index
    %c0_17 = arith.constant 0 : index
    %c0_18 = arith.constant 0 : index
    %c0_19 = arith.constant 0 : index
    %7 = vector.load %arg13[%c0_16, %c0_17, %c0_18, %c0_19] : memref<2x10x10x16xf32, #tpu.memory_space<vmem>>, vector<2x1x10x16xf32>
    tpu.vector_store %arg13[%c0_16, %c0_17, %c0_18, %c0_19], %6 {strides = array<i32>} : memref<2x10x10x16xf32, #tpu.memory_space<vmem>>, vector<2x1x10x16xf32>,
    %c0_20 = arith.constant 0 : index
    %c9_21 = arith.constant 9 : index
    %c0_22 = arith.constant 0 : index
    %c0_23 = arith.constant 0 : index
    %8 = vector.load %arg13[%c0_20, %c9_21, %c0_22, %c0_23] : memref<2x10x10x16xf32, #tpu.memory_space<vmem>>, vector<2x1x10x16xf32>
    tpu.vector_store %arg13[%c0_20, %c9_21, %c0_22, %c0_23], %6 {strides = array<i32>} : memref<2x10x10x16xf32, #tpu.memory_space<vmem>>, vector<2x1x10x16xf32>,
    %cst_24 = arith.constant 0.000000e+00 : f32
    %9 = vector.broadcast %cst_24 : f32 to vector<2x10x1x16xf32>
    %c0_25 = arith.constant 0 : index
    %c0_26 = arith.constant 0 : index
    %c0_27 = arith.constant 0 : index
    %c0_28 = arith.constant 0 : index
    %10 = vector.load %arg13[%c0_25, %c0_26, %c0_27, %c0_28] : memref<2x10x10x16xf32, #tpu.memory_space<vmem>>, vector<2x10x1x16xf32>
    tpu.vector_store %arg13[%c0_25, %c0_26, %c0_27, %c0_28], %9 {strides = array<i32>} : memref<2x10x10x16xf32, #tpu.memory_space<vmem>>, vector<2x10x1x16xf32>,
    %c0_29 = arith.constant 0 : index
    %c0_30 = arith.constant 0 : index
    %c9_31 = arith.constant 9 : index
    %c0_32 = arith.constant 0 : index
    %11 = vector.load %arg13[%c0_29, %c0_30, %c9_31, %c0_32] : memref<2x10x10x16xf32, #tpu.memory_space<vmem>>, vector<2x10x1x16xf32>
    tpu.vector_store %arg13[%c0_29, %c0_30, %c9_31, %c0_32], %9 {strides = array<i32>} : memref<2x10x10x16xf32, #tpu.memory_space<vmem>>, vector<2x10x1x16xf32>,
    %c0_33 = arith.constant 0 : index
    %c0_34 = arith.constant 0 : index
    %c0_35 = arith.constant 0 : index
    %12 = vector.load %arg2[%c0_33, %c0_34, %c0_35] : memref<2x64x8xbf16, #tpu.memory_space<vmem>>, vector<2x64x8xbf16>
    %13 = vector.shape_cast %12 : vector<2x64x8xbf16> to vector<128x8xbf16>
    %c0_36 = arith.constant 0 : index
    %c0_37 = arith.constant 0 : index
    %14 = vector.load %arg3[%c0_36, %c0_37] : memref<8x4xbf16, #tpu.memory_space<vmem>>, vector<8x4xbf16>
    %cst_38 = arith.constant dense<0.000000e+00> : vector<128x4xf32>
    %15 = tpu.matmul %13, %14, %cst_38 {dimension_numbers = #tpu.dot_dimension_numbers<[1], [0], [0], [1], [0, 0, 1, 1], [], []>} : vector<128x8xbf16>, vector<8x4xbf16>, vector<128x4xf32> -> vector<128x4xf32>
    %c0_39 = arith.constant 0 : index
    %c0_40 = arith.constant 0 : index
    %16 = vector.load %arg4[%c0_39, %c0_40] : memref<1x4xf32, #tpu.memory_space<vmem>>, vector<1x4xf32>
    %17 = vector.broadcast %16 : vector<1x4xf32> to vector<128x4xf32>
    %18 = arith.addf %15, %17 : vector<128x4xf32>
    %c0_41 = arith.constant 0 : index
    %19 = memref.load %arg1[%c0_41] : memref<4xf32, #tpu.memory_space<smem>>
    %cst_42 = arith.constant 0.000000e+00 : f32
    %20 = vector.broadcast %cst_42 : f32 to vector<128x4xf32>
    %21 = arith.cmpf oge, %18, %20 : vector<128x4xf32>
    %22 = vector.broadcast %19 : f32 to vector<128x4xf32>
    %23 = arith.mulf %22, %18 : vector<128x4xf32>
    %24 = arith.select %21, %18, %23 : vector<128x4xi1>, vector<128x4xf32>
    %25 = vector.shape_cast %24 : vector<128x4xf32> to vector<2x8x8x4xf32>
    %c0_43 = arith.constant 0 : index
    %c1 = arith.constant 1 : index
    %c1_44 = arith.constant 1 : index
    %c0_45 = arith.constant 0 : index
    %26 = vector.load %arg12[%c0_43, %c1, %c1_44, %c0_45] : memref<2x10x10x4xf32, #tpu.memory_space<vmem>>, vector<2x8x8x4xf32>
    tpu.vector_store %arg12[%c0_43, %c1, %c1_44, %c0_45], %25 {strides = array<i32>} : memref<2x10x10x4xf32, #tpu.memory_space<vmem>>, vector<2x8x8x4xf32>,
    %c1_46 = arith.constant 1 : index
    %27 = memref.load %arg1[%c1_46] : memref<4xf32, #tpu.memory_space<smem>>
    %c0_47 = arith.constant 0 : index
    %c0_48 = arith.constant 0 : index
    %c0_49 = arith.constant 0 : index
    %c0_50 = arith.constant 0 : index
    %28 = vector.load %arg12[%c0_47, %c0_48, %c0_49, %c0_50] : memref<2x10x10x4xf32, #tpu.memory_space<vmem>>, vector<2x10x10x4xf32>
    %29 = vector.extract_strided_slice %28 {offsets = [0, 0, 0, 0], sizes = [2, 8, 8, 4], strides = [1, 1, 1, 1]} : vector<2x10x10x4xf32> to vector<2x8x8x4xf32>
    %30 = vector.shape_cast %29 : vector<2x8x8x4xf32> to vector<128x4xf32>
    %31 = arith.truncf %30 : vector<128x4xf32> to vector<128x4xbf16>
    %c0_51 = arith.constant 0 : index
    %c0_52 = arith.constant 0 : index
    %32 = vector.load %arg14[%c0_51, %c0_52] : memref<128x36xbf16, #tpu.memory_space<vmem>>, vector<128x4xbf16>
    tpu.vector_store %arg14[%c0_51, %c0_52], %31 {strides = array<i32>} : memref<128x36xbf16, #tpu.memory_space<vmem>>, vector<128x4xbf16>,
    %33 = vector.extract_strided_slice %28 {offsets = [0, 0, 1, 0], sizes = [2, 8, 8, 4], strides = [1, 1, 1, 1]} : vector<2x10x10x4xf32> to vector<2x8x8x4xf32>
    %34 = vector.shape_cast %33 : vector<2x8x8x4xf32> to vector<128x4xf32>
    %35 = arith.truncf %34 : vector<128x4xf32> to vector<128x4xbf16>
    %c0_53 = arith.constant 0 : index
    %c4 = arith.constant 4 : index
    %36 = vector.load %arg14[%c0_53, %c4] : memref<128x36xbf16, #tpu.memory_space<vmem>>, vector<128x4xbf16>
    tpu.vector_store %arg14[%c0_53, %c4], %35 {strides = array<i32>} : memref<128x36xbf16, #tpu.memory_space<vmem>>, vector<128x4xbf16>,
    %37 = vector.extract_strided_slice %28 {offsets = [0, 0, 2, 0], sizes = [2, 8, 8, 4], strides = [1, 1, 1, 1]} : vector<2x10x10x4xf32> to vector<2x8x8x4xf32>
    %38 = vector.shape_cast %37 : vector<2x8x8x4xf32> to vector<128x4xf32>
    %39 = arith.truncf %38 : vector<128x4xf32> to vector<128x4xbf16>
    %c0_54 = arith.constant 0 : index
    %c8 = arith.constant 8 : index
    %40 = vector.load %arg14[%c0_54, %c8] : memref<128x36xbf16, #tpu.memory_space<vmem>>, vector<128x4xbf16>
    tpu.vector_store %arg14[%c0_54, %c8], %39 {strides = array<i32>} : memref<128x36xbf16, #tpu.memory_space<vmem>>, vector<128x4xbf16>,
    %41 = vector.extract_strided_slice %28 {offsets = [0, 1, 0, 0], sizes = [2, 8, 8, 4], strides = [1, 1, 1, 1]} : vector<2x10x10x4xf32> to vector<2x8x8x4xf32>
    %42 = vector.shape_cast %41 : vector<2x8x8x4xf32> to vector<128x4xf32>
    %43 = arith.truncf %42 : vector<128x4xf32> to vector<128x4xbf16>
    %c0_55 = arith.constant 0 : index
    %c12 = arith.constant 12 : index
    %44 = vector.load %arg14[%c0_55, %c12] : memref<128x36xbf16, #tpu.memory_space<vmem>>, vector<128x4xbf16>
    tpu.vector_store %arg14[%c0_55, %c12], %43 {strides = array<i32>} : memref<128x36xbf16, #tpu.memory_space<vmem>>, vector<128x4xbf16>,
    %45 = vector.extract_strided_slice %28 {offsets = [0, 1, 1, 0], sizes = [2, 8, 8, 4], strides = [1, 1, 1, 1]} : vector<2x10x10x4xf32> to vector<2x8x8x4xf32>
    %46 = vector.shape_cast %45 : vector<2x8x8x4xf32> to vector<128x4xf32>
    %47 = arith.truncf %46 : vector<128x4xf32> to vector<128x4xbf16>
    %c0_56 = arith.constant 0 : index
    %c16 = arith.constant 16 : index
    %48 = vector.load %arg14[%c0_56, %c16] : memref<128x36xbf16, #tpu.memory_space<vmem>>, vector<128x4xbf16>
    tpu.vector_store %arg14[%c0_56, %c16], %47 {strides = array<i32>} : memref<128x36xbf16, #tpu.memory_space<vmem>>, vector<128x4xbf16>,
    %49 = vector.extract_strided_slice %28 {offsets = [0, 1, 2, 0], sizes = [2, 8, 8, 4], strides = [1, 1, 1, 1]} : vector<2x10x10x4xf32> to vector<2x8x8x4xf32>
    %50 = vector.shape_cast %49 : vector<2x8x8x4xf32> to vector<128x4xf32>
    %51 = arith.truncf %50 : vector<128x4xf32> to vector<128x4xbf16>
    %c0_57 = arith.constant 0 : index
    %c20 = arith.constant 20 : index
    %52 = vector.load %arg14[%c0_57, %c20] : memref<128x36xbf16, #tpu.memory_space<vmem>>, vector<128x4xbf16>
    tpu.vector_store %arg14[%c0_57, %c20], %51 {strides = array<i32>} : memref<128x36xbf16, #tpu.memory_space<vmem>>, vector<128x4xbf16>,
    %53 = vector.extract_strided_slice %28 {offsets = [0, 2, 0, 0], sizes = [2, 8, 8, 4], strides = [1, 1, 1, 1]} : vector<2x10x10x4xf32> to vector<2x8x8x4xf32>
    %54 = vector.shape_cast %53 : vector<2x8x8x4xf32> to vector<128x4xf32>
    %55 = arith.truncf %54 : vector<128x4xf32> to vector<128x4xbf16>
    %c0_58 = arith.constant 0 : index
    %c24 = arith.constant 24 : index
    %56 = vector.load %arg14[%c0_58, %c24] : memref<128x36xbf16, #tpu.memory_space<vmem>>, vector<128x4xbf16>
    tpu.vector_store %arg14[%c0_58, %c24], %55 {strides = array<i32>} : memref<128x36xbf16, #tpu.memory_space<vmem>>, vector<128x4xbf16>,
    %57 = vector.extract_strided_slice %28 {offsets = [0, 2, 1, 0], sizes = [2, 8, 8, 4], strides = [1, 1, 1, 1]} : vector<2x10x10x4xf32> to vector<2x8x8x4xf32>
    %58 = vector.shape_cast %57 : vector<2x8x8x4xf32> to vector<128x4xf32>
    %59 = arith.truncf %58 : vector<128x4xf32> to vector<128x4xbf16>
    %c0_59 = arith.constant 0 : index
    %c28 = arith.constant 28 : index
    %60 = vector.load %arg14[%c0_59, %c28] : memref<128x36xbf16, #tpu.memory_space<vmem>>, vector<128x4xbf16>
    tpu.vector_store %arg14[%c0_59, %c28], %59 {strides = array<i32>} : memref<128x36xbf16, #tpu.memory_space<vmem>>, vector<128x4xbf16>,
    %61 = vector.extract_strided_slice %28 {offsets = [0, 2, 2, 0], sizes = [2, 8, 8, 4], strides = [1, 1, 1, 1]} : vector<2x10x10x4xf32> to vector<2x8x8x4xf32>
    %62 = vector.shape_cast %61 : vector<2x8x8x4xf32> to vector<128x4xf32>
    %63 = arith.truncf %62 : vector<128x4xf32> to vector<128x4xbf16>
    %c0_60 = arith.constant 0 : index
    %c32 = arith.constant 32 : index
    %64 = vector.load %arg14[%c0_60, %c32] : memref<128x36xbf16, #tpu.memory_space<vmem>>, vector<128x4xbf16>
    tpu.vector_store %arg14[%c0_60, %c32], %63 {strides = array<i32>} : memref<128x36xbf16, #tpu.memory_space<vmem>>, vector<128x4xbf16>,
    %c0_61 = arith.constant 0 : index
    %c0_62 = arith.constant 0 : index
    %65 = vector.load %arg14[%c0_61, %c0_62] : memref<128x36xbf16, #tpu.memory_space<vmem>>, vector<128x36xbf16>
    %c0_63 = arith.constant 0 : index
    %c0_64 = arith.constant 0 : index
    %66 = vector.load %arg5[%c0_63, %c0_64] : memref<36x16xbf16, #tpu.memory_space<vmem>>, vector<36x16xbf16>
    %cst_65 = arith.constant dense<0.000000e+00> : vector<128x16xf32>
    %67 = tpu.matmul %65, %66, %cst_65 {dimension_numbers = #tpu.dot_dimension_numbers<[1], [0], [0], [1], [0, 0, 1, 1], [], []>} : vector<128x36xbf16>, vector<36x16xbf16>, vector<128x16xf32> -> vector<128x16xf32>
    %c0_66 = arith.constant 0 : index
    %c0_67 = arith.constant 0 : index
    %68 = vector.load %arg6[%c0_66, %c0_67] : memref<1x16xf32, #tpu.memory_space<vmem>>, vector<1x16xf32>
    %69 = vector.broadcast %68 : vector<1x16xf32> to vector<128x16xf32>
    %70 = arith.addf %67, %69 : vector<128x16xf32>
    %cst_68 = arith.constant 0.000000e+00 : f32
    %71 = vector.broadcast %cst_68 : f32 to vector<128x16xf32>
    %72 = arith.cmpf oge, %70, %71 : vector<128x16xf32>
    %73 = vector.broadcast %27 : f32 to vector<128x16xf32>
    %74 = arith.mulf %73, %70 : vector<128x16xf32>
    %75 = arith.select %72, %70, %74 : vector<128x16xi1>, vector<128x16xf32>
    %76 = vector.shape_cast %75 : vector<128x16xf32> to vector<2x8x8x16xf32>
    %c0_69 = arith.constant 0 : index
    %c1_70 = arith.constant 1 : index
    %c1_71 = arith.constant 1 : index
    %c0_72 = arith.constant 0 : index
    %77 = vector.load %arg13[%c0_69, %c1_70, %c1_71, %c0_72] : memref<2x10x10x16xf32, #tpu.memory_space<vmem>>, vector<2x8x8x16xf32>
    tpu.vector_store %arg13[%c0_69, %c1_70, %c1_71, %c0_72], %76 {strides = array<i32>} : memref<2x10x10x16xf32, #tpu.memory_space<vmem>>, vector<2x8x8x16xf32>,
    %c2 = arith.constant 2 : index
    %78 = memref.load %arg1[%c2] : memref<4xf32, #tpu.memory_space<smem>>
    %c0_73 = arith.constant 0 : index
    %c0_74 = arith.constant 0 : index
    %c0_75 = arith.constant 0 : index
    %c0_76 = arith.constant 0 : index
    %79 = vector.load %arg13[%c0_73, %c0_74, %c0_75, %c0_76] : memref<2x10x10x16xf32, #tpu.memory_space<vmem>>, vector<2x10x10x16xf32>
    %80 = vector.extract_strided_slice %79 {offsets = [0, 0, 0, 0], sizes = [2, 8, 8, 16], strides = [1, 1, 1, 1]} : vector<2x10x10x16xf32> to vector<2x8x8x16xf32>
    %81 = vector.shape_cast %80 : vector<2x8x8x16xf32> to vector<128x16xf32>
    %82 = arith.truncf %81 : vector<128x16xf32> to vector<128x16xbf16>
    %c0_77 = arith.constant 0 : index
    %c0_78 = arith.constant 0 : index
    %83 = vector.load %arg15[%c0_77, %c0_78] : memref<128x144xbf16, #tpu.memory_space<vmem>>, vector<128x16xbf16>
    tpu.vector_store %arg15[%c0_77, %c0_78], %82 {strides = array<i32>} : memref<128x144xbf16, #tpu.memory_space<vmem>>, vector<128x16xbf16>,
    %84 = vector.extract_strided_slice %79 {offsets = [0, 0, 1, 0], sizes = [2, 8, 8, 16], strides = [1, 1, 1, 1]} : vector<2x10x10x16xf32> to vector<2x8x8x16xf32>
    %85 = vector.shape_cast %84 : vector<2x8x8x16xf32> to vector<128x16xf32>
    %86 = arith.truncf %85 : vector<128x16xf32> to vector<128x16xbf16>
    %c0_79 = arith.constant 0 : index
    %c16_80 = arith.constant 16 : index
    %87 = vector.load %arg15[%c0_79, %c16_80] : memref<128x144xbf16, #tpu.memory_space<vmem>>, vector<128x16xbf16>
    tpu.vector_store %arg15[%c0_79, %c16_80], %86 {strides = array<i32>} : memref<128x144xbf16, #tpu.memory_space<vmem>>, vector<128x16xbf16>,
    %88 = vector.extract_strided_slice %79 {offsets = [0, 0, 2, 0], sizes = [2, 8, 8, 16], strides = [1, 1, 1, 1]} : vector<2x10x10x16xf32> to vector<2x8x8x16xf32>
    %89 = vector.shape_cast %88 : vector<2x8x8x16xf32> to vector<128x16xf32>
    %90 = arith.truncf %89 : vector<128x16xf32> to vector<128x16xbf16>
    %c0_81 = arith.constant 0 : index
    %c32_82 = arith.constant 32 : index
    %91 = vector.load %arg15[%c0_81, %c32_82] : memref<128x144xbf16, #tpu.memory_space<vmem>>, vector<128x16xbf16>
    tpu.vector_store %arg15[%c0_81, %c32_82], %90 {strides = array<i32>} : memref<128x144xbf16, #tpu.memory_space<vmem>>, vector<128x16xbf16>,
    %92 = vector.extract_strided_slice %79 {offsets = [0, 1, 0, 0], sizes = [2, 8, 8, 16], strides = [1, 1, 1, 1]} : vector<2x10x10x16xf32> to vector<2x8x8x16xf32>
    %93 = vector.shape_cast %92 : vector<2x8x8x16xf32> to vector<128x16xf32>
    %94 = arith.truncf %93 : vector<128x16xf32> to vector<128x16xbf16>
    %c0_83 = arith.constant 0 : index
    %c48 = arith.constant 48 : index
    %95 = vector.load %arg15[%c0_83, %c48] : memref<128x144xbf16, #tpu.memory_space<vmem>>, vector<128x16xbf16>
    tpu.vector_store %arg15[%c0_83, %c48], %94 {strides = array<i32>} : memref<128x144xbf16, #tpu.memory_space<vmem>>, vector<128x16xbf16>,
    %96 = vector.extract_strided_slice %79 {offsets = [0, 1, 1, 0], sizes = [2, 8, 8, 16], strides = [1, 1, 1, 1]} : vector<2x10x10x16xf32> to vector<2x8x8x16xf32>
    %97 = vector.shape_cast %96 : vector<2x8x8x16xf32> to vector<128x16xf32>
    %98 = arith.truncf %97 : vector<128x16xf32> to vector<128x16xbf16>
    %c0_84 = arith.constant 0 : index
    %c64 = arith.constant 64 : index
    %99 = vector.load %arg15[%c0_84, %c64] : memref<128x144xbf16, #tpu.memory_space<vmem>>, vector<128x16xbf16>
    tpu.vector_store %arg15[%c0_84, %c64], %98 {strides = array<i32>} : memref<128x144xbf16, #tpu.memory_space<vmem>>, vector<128x16xbf16>,
    %100 = vector.extract_strided_slice %79 {offsets = [0, 1, 2, 0], sizes = [2, 8, 8, 16], strides = [1, 1, 1, 1]} : vector<2x10x10x16xf32> to vector<2x8x8x16xf32>
    %101 = vector.shape_cast %100 : vector<2x8x8x16xf32> to vector<128x16xf32>
    %102 = arith.truncf %101 : vector<128x16xf32> to vector<128x16xbf16>
    %c0_85 = arith.constant 0 : index
    %c80 = arith.constant 80 : index
    %103 = vector.load %arg15[%c0_85, %c80] : memref<128x144xbf16, #tpu.memory_space<vmem>>, vector<128x16xbf16>
    tpu.vector_store %arg15[%c0_85, %c80], %102 {strides = array<i32>} : memref<128x144xbf16, #tpu.memory_space<vmem>>, vector<128x16xbf16>,
    %104 = vector.extract_strided_slice %79 {offsets = [0, 2, 0, 0], sizes = [2, 8, 8, 16], strides = [1, 1, 1, 1]} : vector<2x10x10x16xf32> to vector<2x8x8x16xf32>
    %105 = vector.shape_cast %104 : vector<2x8x8x16xf32> to vector<128x16xf32>
    %106 = arith.truncf %105 : vector<128x16xf32> to vector<128x16xbf16>
    %c0_86 = arith.constant 0 : index
    %c96 = arith.constant 96 : index
    %107 = vector.load %arg15[%c0_86, %c96] : memref<128x144xbf16, #tpu.memory_space<vmem>>, vector<128x16xbf16>
    tpu.vector_store %arg15[%c0_86, %c96], %106 {strides = array<i32>} : memref<128x144xbf16, #tpu.memory_space<vmem>>, vector<128x16xbf16>,
    %108 = vector.extract_strided_slice %79 {offsets = [0, 2, 1, 0], sizes = [2, 8, 8, 16], strides = [1, 1, 1, 1]} : vector<2x10x10x16xf32> to vector<2x8x8x16xf32>
    %109 = vector.shape_cast %108 : vector<2x8x8x16xf32> to vector<128x16xf32>
    %110 = arith.truncf %109 : vector<128x16xf32> to vector<128x16xbf16>
    %c0_87 = arith.constant 0 : index
    %c112 = arith.constant 112 : index
    %111 = vector.load %arg15[%c0_87, %c112] : memref<128x144xbf16, #tpu.memory_space<vmem>>, vector<128x16xbf16>
    tpu.vector_store %arg15[%c0_87, %c112], %110 {strides = array<i32>} : memref<128x144xbf16, #tpu.memory_space<vmem>>, vector<128x16xbf16>,
    %112 = vector.extract_strided_slice %79 {offsets = [0, 2, 2, 0], sizes = [2, 8, 8, 16], strides = [1, 1, 1, 1]} : vector<2x10x10x16xf32> to vector<2x8x8x16xf32>
    %113 = vector.shape_cast %112 : vector<2x8x8x16xf32> to vector<128x16xf32>
    %114 = arith.truncf %113 : vector<128x16xf32> to vector<128x16xbf16>
    %c0_88 = arith.constant 0 : index
    %c128 = arith.constant 128 : index
    %115 = vector.load %arg15[%c0_88, %c128] : memref<128x144xbf16, #tpu.memory_space<vmem>>, vector<128x16xbf16>
    tpu.vector_store %arg15[%c0_88, %c128], %114 {strides = array<i32>} : memref<128x144xbf16, #tpu.memory_space<vmem>>, vector<128x16xbf16>,
    %c0_89 = arith.constant 0 : index
    %c0_90 = arith.constant 0 : index
    %116 = vector.load %arg15[%c0_89, %c0_90] : memref<128x144xbf16, #tpu.memory_space<vmem>>, vector<128x144xbf16>
    %c0_91 = arith.constant 0 : index
    %c0_92 = arith.constant 0 : index
    %117 = vector.load %arg7[%c0_91, %c0_92] : memref<144x4xbf16, #tpu.memory_space<vmem>>, vector<144x4xbf16>
    %cst_93 = arith.constant dense<0.000000e+00> : vector<128x4xf32>
    %118 = tpu.matmul %116, %117, %cst_93 {dimension_numbers = #tpu.dot_dimension_numbers<[1], [0], [0], [1], [0, 0, 1, 1], [], []>} : vector<128x144xbf16>, vector<144x4xbf16>, vector<128x4xf32> -> vector<128x4xf32>
    %c0_94 = arith.constant 0 : index
    %c0_95 = arith.constant 0 : index
    %119 = vector.load %arg8[%c0_94, %c0_95] : memref<1x4xf32, #tpu.memory_space<vmem>>, vector<1x4xf32>
    %120 = vector.broadcast %119 : vector<1x4xf32> to vector<128x4xf32>
    %121 = arith.addf %118, %120 : vector<128x4xf32>
    %cst_96 = arith.constant 0.000000e+00 : f32
    %122 = vector.broadcast %cst_96 : f32 to vector<128x4xf32>
    %123 = arith.cmpf oge, %121, %122 : vector<128x4xf32>
    %124 = vector.broadcast %78 : f32 to vector<128x4xf32>
    %125 = arith.mulf %124, %121 : vector<128x4xf32>
    %126 = arith.select %123, %121, %125 : vector<128x4xi1>, vector<128x4xf32>
    %127 = arith.subf %126, %24 : vector<128x4xf32>
    %128 = vector.shape_cast %127 : vector<128x4xf32> to vector<2x8x8x4xf32>
    %c0_97 = arith.constant 0 : index
    %c1_98 = arith.constant 1 : index
    %c1_99 = arith.constant 1 : index
    %c0_100 = arith.constant 0 : index
    %129 = vector.load %arg12[%c0_97, %c1_98, %c1_99, %c0_100] : memref<2x10x10x4xf32, #tpu.memory_space<vmem>>, vector<2x8x8x4xf32>
    tpu.vector_store %arg12[%c0_97, %c1_98, %c1_99, %c0_100], %128 {strides = array<i32>} : memref<2x10x10x4xf32, #tpu.memory_space<vmem>>, vector<2x8x8x4xf32>,
    %c3 = arith.constant 3 : index
    %130 = memref.load %arg1[%c3] : memref<4xf32, #tpu.memory_space<smem>>
    %c0_101 = arith.constant 0 : index
    %c0_102 = arith.constant 0 : index
    %c0_103 = arith.constant 0 : index
    %c0_104 = arith.constant 0 : index
    %131 = vector.load %arg12[%c0_101, %c0_102, %c0_103, %c0_104] : memref<2x10x10x4xf32, #tpu.memory_space<vmem>>, vector<2x10x10x4xf32>
    %132 = vector.extract_strided_slice %131 {offsets = [0, 0, 0, 0], sizes = [2, 8, 8, 4], strides = [1, 1, 1, 1]} : vector<2x10x10x4xf32> to vector<2x8x8x4xf32>
    %133 = vector.shape_cast %132 : vector<2x8x8x4xf32> to vector<128x4xf32>
    %134 = arith.truncf %133 : vector<128x4xf32> to vector<128x4xbf16>
    %c0_105 = arith.constant 0 : index
    %c0_106 = arith.constant 0 : index
    %135 = vector.load %arg14[%c0_105, %c0_106] : memref<128x36xbf16, #tpu.memory_space<vmem>>, vector<128x4xbf16>
    tpu.vector_store %arg14[%c0_105, %c0_106], %134 {strides = array<i32>} : memref<128x36xbf16, #tpu.memory_space<vmem>>, vector<128x4xbf16>,
    %136 = vector.extract_strided_slice %131 {offsets = [0, 0, 1, 0], sizes = [2, 8, 8, 4], strides = [1, 1, 1, 1]} : vector<2x10x10x4xf32> to vector<2x8x8x4xf32>
    %137 = vector.shape_cast %136 : vector<2x8x8x4xf32> to vector<128x4xf32>
    %138 = arith.truncf %137 : vector<128x4xf32> to vector<128x4xbf16>
    %c0_107 = arith.constant 0 : index
    %c4_108 = arith.constant 4 : index
    %139 = vector.load %arg14[%c0_107, %c4_108] : memref<128x36xbf16, #tpu.memory_space<vmem>>, vector<128x4xbf16>
    tpu.vector_store %arg14[%c0_107, %c4_108], %138 {strides = array<i32>} : memref<128x36xbf16, #tpu.memory_space<vmem>>, vector<128x4xbf16>,
    %140 = vector.extract_strided_slice %131 {offsets = [0, 0, 2, 0], sizes = [2, 8, 8, 4], strides = [1, 1, 1, 1]} : vector<2x10x10x4xf32> to vector<2x8x8x4xf32>
    %141 = vector.shape_cast %140 : vector<2x8x8x4xf32> to vector<128x4xf32>
    %142 = arith.truncf %141 : vector<128x4xf32> to vector<128x4xbf16>
    %c0_109 = arith.constant 0 : index
    %c8_110 = arith.constant 8 : index
    %143 = vector.load %arg14[%c0_109, %c8_110] : memref<128x36xbf16, #tpu.memory_space<vmem>>, vector<128x4xbf16>
    tpu.vector_store %arg14[%c0_109, %c8_110], %142 {strides = array<i32>} : memref<128x36xbf16, #tpu.memory_space<vmem>>, vector<128x4xbf16>,
    %144 = vector.extract_strided_slice %131 {offsets = [0, 1, 0, 0], sizes = [2, 8, 8, 4], strides = [1, 1, 1, 1]} : vector<2x10x10x4xf32> to vector<2x8x8x4xf32>
    %145 = vector.shape_cast %144 : vector<2x8x8x4xf32> to vector<128x4xf32>
    %146 = arith.truncf %145 : vector<128x4xf32> to vector<128x4xbf16>
    %c0_111 = arith.constant 0 : index
    %c12_112 = arith.constant 12 : index
    %147 = vector.load %arg14[%c0_111, %c12_112] : memref<128x36xbf16, #tpu.memory_space<vmem>>, vector<128x4xbf16>
    tpu.vector_store %arg14[%c0_111, %c12_112], %146 {strides = array<i32>} : memref<128x36xbf16, #tpu.memory_space<vmem>>, vector<128x4xbf16>,
    %148 = vector.extract_strided_slice %131 {offsets = [0, 1, 1, 0], sizes = [2, 8, 8, 4], strides = [1, 1, 1, 1]} : vector<2x10x10x4xf32> to vector<2x8x8x4xf32>
    %149 = vector.shape_cast %148 : vector<2x8x8x4xf32> to vector<128x4xf32>
    %150 = arith.truncf %149 : vector<128x4xf32> to vector<128x4xbf16>
    %c0_113 = arith.constant 0 : index
    %c16_114 = arith.constant 16 : index
    %151 = vector.load %arg14[%c0_113, %c16_114] : memref<128x36xbf16, #tpu.memory_space<vmem>>, vector<128x4xbf16>
    tpu.vector_store %arg14[%c0_113, %c16_114], %150 {strides = array<i32>} : memref<128x36xbf16, #tpu.memory_space<vmem>>, vector<128x4xbf16>,
    %152 = vector.extract_strided_slice %131 {offsets = [0, 1, 2, 0], sizes = [2, 8, 8, 4], strides = [1, 1, 1, 1]} : vector<2x10x10x4xf32> to vector<2x8x8x4xf32>
    %153 = vector.shape_cast %152 : vector<2x8x8x4xf32> to vector<128x4xf32>
    %154 = arith.truncf %153 : vector<128x4xf32> to vector<128x4xbf16>
    %c0_115 = arith.constant 0 : index
    %c20_116 = arith.constant 20 : index
    %155 = vector.load %arg14[%c0_115, %c20_116] : memref<128x36xbf16, #tpu.memory_space<vmem>>, vector<128x4xbf16>
    tpu.vector_store %arg14[%c0_115, %c20_116], %154 {strides = array<i32>} : memref<128x36xbf16, #tpu.memory_space<vmem>>, vector<128x4xbf16>,
    %156 = vector.extract_strided_slice %131 {offsets = [0, 2, 0, 0], sizes = [2, 8, 8, 4], strides = [1, 1, 1, 1]} : vector<2x10x10x4xf32> to vector<2x8x8x4xf32>
    %157 = vector.shape_cast %156 : vector<2x8x8x4xf32> to vector<128x4xf32>
    %158 = arith.truncf %157 : vector<128x4xf32> to vector<128x4xbf16>
    %c0_117 = arith.constant 0 : index
    %c24_118 = arith.constant 24 : index
    %159 = vector.load %arg14[%c0_117, %c24_118] : memref<128x36xbf16, #tpu.memory_space<vmem>>, vector<128x4xbf16>
    tpu.vector_store %arg14[%c0_117, %c24_118], %158 {strides = array<i32>} : memref<128x36xbf16, #tpu.memory_space<vmem>>, vector<128x4xbf16>,
    %160 = vector.extract_strided_slice %131 {offsets = [0, 2, 1, 0], sizes = [2, 8, 8, 4], strides = [1, 1, 1, 1]} : vector<2x10x10x4xf32> to vector<2x8x8x4xf32>
    %161 = vector.shape_cast %160 : vector<2x8x8x4xf32> to vector<128x4xf32>
    %162 = arith.truncf %161 : vector<128x4xf32> to vector<128x4xbf16>
    %c0_119 = arith.constant 0 : index
    %c28_120 = arith.constant 28 : index
    %163 = vector.load %arg14[%c0_119, %c28_120] : memref<128x36xbf16, #tpu.memory_space<vmem>>, vector<128x4xbf16>
    tpu.vector_store %arg14[%c0_119, %c28_120], %162 {strides = array<i32>} : memref<128x36xbf16, #tpu.memory_space<vmem>>, vector<128x4xbf16>,
    %164 = vector.extract_strided_slice %131 {offsets = [0, 2, 2, 0], sizes = [2, 8, 8, 4], strides = [1, 1, 1, 1]} : vector<2x10x10x4xf32> to vector<2x8x8x4xf32>
    %165 = vector.shape_cast %164 : vector<2x8x8x4xf32> to vector<128x4xf32>
    %166 = arith.truncf %165 : vector<128x4xf32> to vector<128x4xbf16>
    %c0_121 = arith.constant 0 : index
    %c32_122 = arith.constant 32 : index
    %167 = vector.load %arg14[%c0_121, %c32_122] : memref<128x36xbf16, #tpu.memory_space<vmem>>, vector<128x4xbf16>
    tpu.vector_store %arg14[%c0_121, %c32_122], %166 {strides = array<i32>} : memref<128x36xbf16, #tpu.memory_space<vmem>>, vector<128x4xbf16>,
    %c0_123 = arith.constant 0 : index
    %c0_124 = arith.constant 0 : index
    %168 = vector.load %arg14[%c0_123, %c0_124] : memref<128x36xbf16, #tpu.memory_space<vmem>>, vector<128x36xbf16>
    %c0_125 = arith.constant 0 : index
    %c0_126 = arith.constant 0 : index
    %169 = vector.load %arg9[%c0_125, %c0_126] : memref<36x16xbf16, #tpu.memory_space<vmem>>, vector<36x16xbf16>
    %cst_127 = arith.constant dense<0.000000e+00> : vector<128x16xf32>
    %170 = tpu.matmul %168, %169, %cst_127 {dimension_numbers = #tpu.dot_dimension_numbers<[1], [0], [0], [1], [0, 0, 1, 1], [], []>} : vector<128x36xbf16>, vector<36x16xbf16>, vector<128x16xf32> -> vector<128x16xf32>
    %c0_128 = arith.constant 0 : index
    %c0_129 = arith.constant 0 : index
    %171 = vector.load %arg10[%c0_128, %c0_129] : memref<1x16xf32, #tpu.memory_space<vmem>>, vector<1x16xf32>
    %172 = vector.broadcast %171 : vector<1x16xf32> to vector<128x16xf32>
    %173 = arith.addf %170, %172 : vector<128x16xf32>
    %cst_130 = arith.constant 0.000000e+00 : f32
    %174 = vector.broadcast %cst_130 : f32 to vector<128x16xf32>
    %175 = arith.cmpf oge, %173, %174 : vector<128x16xf32>
    %176 = vector.broadcast %130 : f32 to vector<128x16xf32>
    %177 = arith.mulf %176, %173 : vector<128x16xf32>
    %178 = arith.select %175, %173, %177 : vector<128x16xi1>, vector<128x16xf32>
    %179 = arith.addf %178, %75 : vector<128x16xf32>
    %180 = vector.shape_cast %179 : vector<128x16xf32> to vector<2x64x16xf32>
    %c0_131 = arith.constant 0 : index
    %c0_132 = arith.constant 0 : index
    %c0_133 = arith.constant 0 : index
    %181 = vector.load %arg11[%c0_131, %c0_132, %c0_133] : memref<2x64x16xf32, #tpu.memory_space<vmem>>, vector<2x64x16xf32>
    tpu.vector_store %arg11[%c0_131, %c0_132, %c0_133], %180 {strides = array<i32>} : memref<2x64x16xf32, #tpu.memory_space<vmem>>, vector<2x64x16xf32>,
    return
  }
  func.func @transform_0(%arg0: i32) -> i32 {
    %c0_i32 = arith.constant 0 : i32
    %c0_i32_0 = arith.constant 0 : i32
    return %c0_i32 : i32
  }
  func.func @transform_1(%arg0: i32) -> (i32, i32, i32) {
    %c0_i32 = arith.constant 0 : i32
    %c0_i32_0 = arith.constant 0 : i32
    %c0_i32_1 = arith.constant 0 : i32
    return %arg0, %c0_i32, %c0_i32_0 : i32, i32, i32
  }
  func.func @transform_2(%arg0: i32) -> (i32, i32) {
    %c0_i32 = arith.constant 0 : i32
    %c0_i32_0 = arith.constant 0 : i32
    %c0_i32_1 = arith.constant 0 : i32
    return %c0_i32, %c0_i32_0 : i32, i32
  }
  func.func @transform_3(%arg0: i32) -> (i32, i32) {
    %c0_i32 = arith.constant 0 : i32
    %c0_i32_0 = arith.constant 0 : i32
    %c0_i32_1 = arith.constant 0 : i32
    return %c0_i32, %c0_i32_0 : i32, i32
  }
  func.func @transform_4(%arg0: i32) -> (i32, i32) {
    %c0_i32 = arith.constant 0 : i32
    %c0_i32_0 = arith.constant 0 : i32
    %c0_i32_1 = arith.constant 0 : i32
    return %c0_i32, %c0_i32_0 : i32, i32
  }
  func.func @transform_5(%arg0: i32) -> (i32, i32) {
    %c0_i32 = arith.constant 0 : i32
    %c0_i32_0 = arith.constant 0 : i32
    %c0_i32_1 = arith.constant 0 : i32
    return %c0_i32, %c0_i32_0 : i32, i32
  }
  func.func @transform_6(%arg0: i32) -> (i32, i32) {
    %c0_i32 = arith.constant 0 : i32
    %c0_i32_0 = arith.constant 0 : i32
    %c0_i32_1 = arith.constant 0 : i32
    return %c0_i32, %c0_i32_0 : i32, i32
  }
  func.func @transform_7(%arg0: i32) -> (i32, i32) {
    %c0_i32 = arith.constant 0 : i32
    %c0_i32_0 = arith.constant 0 : i32
    %c0_i32_1 = arith.constant 0 : i32
    return %c0_i32, %c0_i32_0 : i32, i32
  }
  func.func @transform_8(%arg0: i32) -> (i32, i32) {
    %c0_i32 = arith.constant 0 : i32
    %c0_i32_0 = arith.constant 0 : i32
    %c0_i32_1 = arith.constant 0 : i32
    return %c0_i32, %c0_i32_0 : i32, i32
  }
  func.func @transform_9(%arg0: i32) -> (i32, i32) {
    %c0_i32 = arith.constant 0 : i32
    %c0_i32_0 = arith.constant 0 : i32
    %c0_i32_1 = arith.constant 0 : i32
    return %c0_i32, %c0_i32_0 : i32, i32
  }
  func.func @transform_10(%arg0: i32) -> (i32, i32, i32) {
    %c0_i32 = arith.constant 0 : i32
    %c0_i32_0 = arith.constant 0 : i32
    %c0_i32_1 = arith.constant 0 : i32
    return %arg0, %c0_i32, %c0_i32_0 : i32, i32, i32
  }
}

</mosaic_0001>

<bundles_post_ra>
// kernel: tile.13
= control target key start
LH: loop header
LB: loop body
LE: loop exit
PB: predicated region body
PF: predicated region fallthrough
CT: control target
= control target key end

     0   :  { %s22_s0 = inlined_call_operand.vmem [shape: f32[4], index: 0, kind: input, shape index: {}]   ;;  %s23_s1 = inlined_call_operand.vmem [shape: f32[4,4], index: 1, kind: output, shape index: {}]  }
   0x1   :  { %v4_v0 = vld [vmem:[%s22_s0] ss:$0 sm:$0xff] }
   0x2   :  { %5 = vst [vmem:[%s23_s1] sm:$0xf] %v4_v0 }

// kernel: tile.14
= control target key start
LH: loop header
LB: loop body
LE: loop exit
PB: predicated region body
PF: predicated region fallthrough
CT: control target
= control target key end

     0   :  { %vm7_vm0 = vcmask 31744   ;;  %s37_s8 = smov 4   ;;  %s38_s9 = smov 8   ;;  %vm13_vm1 = vcmask 130144   ;;  %vm19_vm2 = vcmask 97344   ;;  %vm25_vm3 = vcmask 64544   ;;  %s55_s0 = inlined_call_operand.vmem [shape: f32[4,4], index: 0, kind: input, shape index: {}]   ;;  %s56_s1 = inlined_call_operand.vmem [shape: f32[1,16], index: 1, kind: output, shape index: {}]  }
   0x1   :  { %v4_v0 = vld [vmem:[%s55_s0] sm:$0xf]  ;;  %s36_s0 = smov 12  }
   0x2   :  { %5 = vst [vmem:[#allocation1] sm:$0xf] %v4_v0 }
   0x9   :  { %v10_v1 = vld [vmem:[#allocation1 + $0x3] sm:$0x1]   ;;  %v22_v2 = vld [vmem:[#allocation1 + $0x1] sm:$0x1]   ;;  %v6_v3 = vld [vmem:[#allocation1] sm:$0x1]  }
   0xa   :  { %11 = vrot.lane.b32.xlu0 %v10_v1, %s36_s0  ;;  %23 = vrot.lane.b32.xlu1 %v22_v2, %s37_s8  ;;  %v16_v4 = vld [vmem:[#allocation1 + $0x2] sm:$0x1]   ;;  %8 = vst.msk [vmem:[#allocation0] sm:$0x1] %vm7_vm0, %v6_v3  }
   0xe   :  { %17 = vrot.lane.b32.xlu0 %v16_v4, %s38_s9 }
  0x7c   :  { %v12_v5 = vpop.permute.xlu0 %11   ;;  %v24_v6 = vpop.permute.xlu1 %23  }
  0x7d   :  { %14 = vst.msk [vmem:[#allocation0] sm:$0x1] %vm13_vm1, %v12_v5  }
  0x80   :  { %v18_v7 = vpop.permute.xlu0 %17  }
  0x81   :  { %20 = vst.msk [vmem:[#allocation0] sm:$0x1] %vm19_vm2, %v18_v7  }
  0x82   :  { %26 = vst.msk [vmem:[#allocation0] sm:$0x1] %vm25_vm3, %v24_v6  }
  0x89   :  { %v30_v8 = vld [vmem:[#allocation0] sm:$0x1] }
  0x8a   :  { %32 = vst [vmem:[%s56_s1] sm:$0x1] %v30_v8 }

// kernel: deep_up_block_forward.1
= control target key start
LH: loop header
LB: loop body
LE: loop exit
PB: predicated region body
PF: predicated region fallthrough
CT: control target
= control target key end

     0   :  { %15 = vsyncpa [#allocation7], 0  ;;  %s4867_s0 = inlined_call_operand.vmem [shape: f32[4], index: 0, kind: input, shape index: {}]   ;;  %s4868_s1 = inlined_call_operand.vmem [shape: bf16[2,64,8], index: 1, kind: input, shape index: {}]   ;;  %s4869_s2 = inlined_call_operand.vmem [shape: bf16[8,4], index: 2, kind: input, shape index: {}]   ;;  %s4870_s3 = inlined_call_operand.vmem [shape: f32[1,4], index: 3, kind: input, shape index: {}]   ;;  %s4871_s4 = inlined_call_operand.vmem [shape: bf16[36,16], index: 4, kind: input, shape index: {}]   ;;  %s4872_s5 = inlined_call_operand.vmem [shape: f32[1,16], index: 5, kind: input, shape index: {}]   ;;  %s4873_s6 = inlined_call_operand.vmem [shape: bf16[144,4], index: 6, kind: input, shape index: {}]   ;;  %s4874_s7 = inlined_call_operand.vmem [shape: f32[1,4], index: 7, kind: input, shape index: {}]   ;;  %s4875_s8 = inlined_call_operand.vmem [shape: bf16[36,16], index: 8, kind: input, shape index: {}]   ;;  %s4876_s9 = inlined_call_operand.vmem [shape: f32[1,16], index: 9, kind: input, shape index: {}]   ;;  %s4877_s10 = inlined_call_operand.vmem [shape: f32[2,64,16], index: 10, kind: output, shape index: {}]  }
   0x1   :  { %s22_s15 = sshll.u32 %s4867_s0, 4  ;;  %s23_s15 = int_to_ptr.vmem [resolvable:$true] %s22_s15 }
   0x2   :  { %s3218_s16 = scalar_lea.vmem %s23_s15, 16  ;;  %p3223_p1 = scmp.lt.s32.totalorder %s23_s15, %s23_s15 }
   0x3   :  { %p3219_p0 = scmp.ne.s32.totalorder %s23_s15, %s3218_s16  ;;  %p3224_p2 = scmp.lt.s32.totalorder %s3218_s16, %s3218_s16 }
   0x5   :  { %p3225_p3 = por %p3224_p2, %p3223_p1 }
   0x7   :  { %p3226_p4 = pnand %p3225_p3, %p3219_p0 }
   0x9   :  { %3229 = shalt.err (!%p3226_p4)
}
   0xa   :  { %s3232_s17 = smov [#allocation6]  }
   0xb   :  { %25 = dma.vmem_to_smem %s23_s15, 16, %s3232_s17, [#allocation7]  }
   0xc   :  { %3230 = dma.done.wait [#allocation7], 16  }
   0xd   :  { %3231 = vsyncadd [#allocation7], 4294967280 }
   0xe   :  { %47 = sfence }
   0xf   :  { %v169_v0 = vld [vmem:[%s4869_s2] sm:$0xf]  ;;  %vm242_vm0 = vcmask 1043456   ;;  %vm217_vm1 = vcmask 64512   ;;  %v3196_v3 = vld [vmem:[%s4868_s1 + $0x8] sm:$0xff]   ;;  %v3197_v4 = vld [vmem:[%s4868_s1 + $0x10] sm:$0xff]  }
  0x10   :  { %v3195_v1 = vld [vmem:[%s4868_s1] sm:$0xff]   ;;  %3176 = vmatprep.subr.msk.bf16.mxu0 %vm242_vm0, %v169_v0  ;;  %v244_v2 = vsel %vm242_vm0, %v169_v0, 0  ;;  %v3198_v5 = vld [vmem:[%s4868_s1 + $0x18] sm:$0xff]   ;;  %v3200_v7 = vld [vmem:[%s4868_s1 + $0x28] sm:$0xff]   ;;  %vm49_vm2 = vcmask 31744   ;;  %vm60_vm3 = vcmask 24576  }
  0x11   :  { %3097 = vmatpush3.bf16.msra.mxu0 %v244_v2  ;;  %3098 = vmatprep.mubr.msk.bf16.mxu0 %vm217_vm1, %v3195_v1  ;;  %v3199_v6 = vld [vmem:[%s4868_s1 + $0x20] sm:$0xff]   ;;  %v3201_v8 = vld [vmem:[%s4868_s1 + $0x30] sm:$0xff]   ;;  %v3202_v9 = vld [vmem:[%s4868_s1 + $0x38] sm:$0xff]   ;;  %vm51_vm4 = vcmask 25600   ;;  %v3233_v10 = vmov 0.0   ;;  %s343_s1 = sld [smem:[#allocation6]] }
  0x12   :  { %64 = vst.msk [vmem:[#allocation2 + $0x30] sm:$0x1] %vm60_vm3, %v3233_v10  ;;  %65 = vst.msk [vmem:[#allocation2 + $0x40] sm:$0x1] %vm60_vm3, %v3233_v10  ;;  %v3440_v11 = vld [vmem:[%s4870_s3] ss:$0 sm:$0xff] }
  0x13   :  { %50 = vst.msk [vmem:[#allocation2] sm:$0xff] %vm49_vm2, %v3233_v10  ;;  %53 = vst.msk [vmem:[#allocation2 + $0xa0] sm:$0xff] %vm49_vm2, %v3233_v10  ;;  %vm613_vm9 = vcmask 1045504   ;;  %s3234_s3 = smov 12   ;;  %vm499_vm14 = vcmask 1046528   ;;  %s3235_s16 = smov 8  }
  0x14   :  { %3099 = vmatmul.mubr.msk.bf16.vlgmr.msra.gmra.mrb[0].mxu0 %vm217_vm1, %v3196_v3  ;;  %56 = vst.msk [vmem:[#allocation2 + $0x90] sm:$0xff] %vm49_vm2, %v3233_v10  ;;  %58 = vst.msk [vmem:[#allocation2 + $0x130] sm:$0xff] %vm49_vm2, %v3233_v10  ;;  %s3236_s17 = smov 24   ;;  %s3237_s18 = smov 16  }
  0x15   :  { %3102 = vmatprep.mubr.msk.bf16.mxu0 %vm217_vm1, %v3197_v4  ;;  %62 = vst.msk [vmem:[#allocation2 + $0x10] sm:$0x1] %vm60_vm3, %v3233_v10  ;;  %63 = vst.msk [vmem:[#allocation2 + $0x20] sm:$0x1] %vm60_vm3, %v3233_v10  ;;  %s3238_s19 = smov 4   ;;  %s3239_s20 = smov 20  }
  0x16   :  { %66 = vst.msk [vmem:[#allocation2 + $0x50] sm:$0x1] %vm60_vm3, %v3233_v10  ;;  %67 = vst.msk [vmem:[#allocation2 + $0x60] sm:$0x1] %vm60_vm3, %v3233_v10  ;;  %s3240_s24 = smov 28   ;;  %s3241_s2 = smov 32  }
  0x17   :  { %68 = vst.msk [vmem:[#allocation2 + $0x70] sm:$0x1] %vm60_vm3, %v3233_v10  ;;  %69 = vst.msk [vmem:[#allocation2 + $0x80] sm:$0x1] %vm60_vm3, %v3233_v10  ;;  %v3442_v13 = vstv %s343_s1  ;;  %s3243_s23 = smov 48   ;;  %s3244_s25 = smov 96  }
  0x18   :  { %72 = vst.msk [vmem:[#allocation2 + $0xb0] sm:$0x1] %vm60_vm3, %v3233_v10  ;;  %73 = vst.msk [vmem:[#allocation2 + $0xc0] sm:$0x1] %vm60_vm3, %v3233_v10  ;;  %s3245_s29 = smov 64   ;;  %s3246_s12 = smov 80  }
  0x19   :  { %74 = vst.msk [vmem:[#allocation2 + $0xd0] sm:$0x1] %vm60_vm3, %v3233_v10  ;;  %75 = vst.msk [vmem:[#allocation2 + $0xe0] sm:$0x1] %vm60_vm3, %v3233_v10 }
  0x1a   :  { %76 = vst.msk [vmem:[#allocation2 + $0xf0] sm:$0x1] %vm60_vm3, %v3233_v10  ;;  %77 = vst.msk [vmem:[#allocation2 + $0x100] sm:$0x1] %vm60_vm3, %v3233_v10 }
  0x1b   :  { %78 = vst.msk [vmem:[#allocation2 + $0x110] sm:$0x1] %vm60_vm3, %v3233_v10  ;;  %79 = vst.msk [vmem:[#allocation2 + $0x120] sm:$0x1] %vm60_vm3, %v3233_v10 }
  0x1c   :  { %3103 = vmatmul.mubr.msk.bf16.gmra.mrb[4].mxu0 %vm217_vm1, %v3198_v5  ;;  %82 = vst.msk [vmem:[#allocation2 + $0x19] sm:$0x1] %vm60_vm3, %v3233_v10  ;;  %83 = vst.msk [vmem:[#allocation2 + $0x29] sm:$0x1] %vm60_vm3, %v3233_v10 }
  0x1d   :  { %3106 = vmatprep.mubr.msk.bf16.mxu0 %vm217_vm1, %v3199_v6  ;;  %84 = vst.msk [vmem:[#allocation2 + $0x39] sm:$0x1] %vm60_vm3, %v3233_v10  ;;  %85 = vst.msk [vmem:[#allocation2 + $0x49] sm:$0x1] %vm60_vm3, %v3233_v10 }
  0x1e   :  { %86 = vst.msk [vmem:[#allocation2 + $0x59] sm:$0x1] %vm60_vm3, %v3233_v10  ;;  %87 = vst.msk [vmem:[#allocation2 + $0x69] sm:$0x1] %vm60_vm3, %v3233_v10 }
  0x1f   :  { %88 = vst.msk [vmem:[#allocation2 + $0x79] sm:$0x1] %vm60_vm3, %v3233_v10  ;;  %89 = vst.msk [vmem:[#allocation2 + $0x89] sm:$0x1] %vm60_vm3, %v3233_v10 }
  0x20   :  { %92 = vst.msk [vmem:[#allocation2 + $0xb9] sm:$0x1] %vm60_vm3, %v3233_v10  ;;  %93 = vst.msk [vmem:[#allocation2 + $0xc9] sm:$0x1] %vm60_vm3, %v3233_v10 }
  0x21   :  { %94 = vst.msk [vmem:[#allocation2 + $0xd9] sm:$0x1] %vm60_vm3, %v3233_v10  ;;  %95 = vst.msk [vmem:[#allocation2 + $0xe9] sm:$0x1] %vm60_vm3, %v3233_v10 }
  0x22   :  { %96 = vst.msk [vmem:[#allocation2 + $0xf9] sm:$0x1] %vm60_vm3, %v3233_v10  ;;  %97 = vst.msk [vmem:[#allocation2 + $0x109] sm:$0x1] %vm60_vm3, %v3233_v10 }
  0x23   :  { %98 = vst.msk [vmem:[#allocation2 + $0x119] sm:$0x1] %vm60_vm3, %v3233_v10  ;;  %99 = vst.msk [vmem:[#allocation2 + $0x129] sm:$0x1] %vm60_vm3, %v3233_v10 }
  0x24   :  { %3107 = vmatmul.mubr.msk.bf16.gmra.mrb[8].mxu0 %vm217_vm1, %v3200_v7  ;;  %52 = vst.msk [vmem:[#allocation2 + $0x8] sm:$0x3] %vm51_vm4, %v3233_v10  ;;  %54 = vst.msk [vmem:[#allocation2 + $0xa8] sm:$0x3] %vm51_vm4, %v3233_v10 }
  0x25   :  { %3110 = vmatprep.mubr.msk.bf16.mxu0 %vm217_vm1, %v3201_v8  ;;  %57 = vst.msk [vmem:[#allocation2 + $0x98] sm:$0x3] %vm51_vm4, %v3233_v10  ;;  %59 = vst.msk [vmem:[#allocation2 + $0x138] sm:$0x3] %vm51_vm4, %v3233_v10 }
  0x26   :  { %61 = vst.msk [vmem:[#allocation2] sm:$0x1] %vm60_vm3, %v3233_v10  ;;  %70 = vst.msk [vmem:[#allocation2 + $0x90] sm:$0x1] %vm60_vm3, %v3233_v10 }
  0x27   :  { %71 = vst.msk [vmem:[#allocation2 + $0xa0] sm:$0x1] %vm60_vm3, %v3233_v10  ;;  %80 = vst.msk [vmem:[#allocation2 + $0x130] sm:$0x1] %vm60_vm3, %v3233_v10 }
  0x28   :  { %81 = vst.msk [vmem:[#allocation2 + $0x9] sm:$0x1] %vm60_vm3, %v3233_v10  ;;  %90 = vst.msk [vmem:[#allocation2 + $0x99] sm:$0x1] %vm60_vm3, %v3233_v10 }
  0x29   :  { %91 = vst.msk [vmem:[#allocation2 + $0xa9] sm:$0x1] %vm60_vm3, %v3233_v10  ;;  %100 = vst.msk [vmem:[#allocation2 + $0x139] sm:$0x1] %vm60_vm3, %v3233_v10 }
  0x2c   :  { %3111 = vmatmul.mubr.msk.bf16.gmra.mrb[12].mxu0 %vm217_vm1, %v3202_v9 }
  0x2d   :  { %v3466_v30 = vld [vmem:[#allocation2] sm:$0xff] }
  0x2e   :  { %v614_v39 = vrot.slane %v3466_v30, 2  ;;  %v500_v45 = vrot.slane %v3466_v30, 1 }
  0x2f   :  { %v412_v33 = vld [vmem:[#allocation2 + $0x8] sm:$0x3] }
  0x30   :  { %v615_v42 = vrot.slane %v412_v33, 2  ;;  %v501_v50 = vrot.slane %v412_v33, 1 }
  0x32   :  { %v616_v60 = vsel %vm613_vm9, %v614_v39, %v615_v42 }
  0xe7   :  { %v3100_v12 = vpop.f32.mrb[0].mxu0 }
  0xe8   :  { %v289_v14 = vadd.f32 %v3100_v12, %v3440_v11  ;;  %v280_v15 = vpop.f32.mrb[1].mxu0 }
  0xe9   :  { %v281_v16 = vadd.f32 %v3440_v11, %v280_v15  ;;  %v3101_v17 = vpop.f32.mrb[2].mxu0 }
  0xea   :  { %vm346_vm5 = vcmp.ge.f32.partialorder %v289_v14, 0.0  ;;  %v363_v18 = vmul.f32 %v3442_v13, %v289_v14  ;;  %v292_v19 = vadd.f32 %v3101_v17, %v3440_v11  ;;  %v283_v20 = vpop.f32.mrb[3].mxu0  ;;  %v502_v17 = vsel %vm499_vm14, %v500_v45, %v501_v50 }
  0xeb   :  { %vm344_vm6 = vcmp.ge.f32.partialorder %v281_v16, 0.0  ;;  %v361_v21 = vmul.f32 %v3442_v13, %v281_v16  ;;  %v284_v22 = vadd.f32 %v3440_v11, %v283_v20 }
  0xec   :  { %v3450_v23 = vsel %vm346_vm5, %v289_v14, %v363_v18  ;;  %vm347_vm7 = vcmp.ge.f32.partialorder %v292_v19, 0.0  ;;  %v364_v24 = vmul.f32 %v3442_v13, %v292_v19 }
  0xed   :  { %396 = vst.msk [vmem:[#allocation2 + $0x31] sm:$0xff] %vm49_vm2, %v3450_v23  ;;  %v3455_v25 = vsel %vm344_vm6, %v281_v16, %v361_v21  ;;  %vm345_vm8 = vcmp.ge.f32.partialorder %v284_v22, 0.0  ;;  %v362_v26 = vmul.f32 %v3442_v13, %v284_v22 }
  0xee   :  { %394 = vst.msk [vmem:[#allocation2 + $0x11] sm:$0xff] %vm49_vm2, %v3455_v25  ;;  %v3460_v27 = vsel %vm347_vm7, %v292_v19, %v364_v24 }
  0xef   :  { %397 = vst.msk [vmem:[#allocation2 + $0x41] sm:$0xff] %vm49_vm2, %v3460_v27  ;;  %v3464_v28 = vsel %vm345_vm8, %v284_v22, %v362_v26  ;;  %v3104_v29 = vpop.f32.mrb[4].mxu0  ;;  %vm1091_vm8 = vcmask 1041408  }
  0xf0   :  { %395 = vst.msk [vmem:[#allocation2 + $0x21] sm:$0xff] %vm49_vm2, %v3464_v28  ;;  %v305_v31 = vadd.f32 %v3104_v29, %v3440_v11  ;;  %v296_v32 = vpop.f32.mrb[5].mxu0 }
  0xf1   :  { %v297_v34 = vadd.f32 %v3440_v11, %v296_v32  ;;  %v3105_v35 = vpop.f32.mrb[6].mxu0 }
  0xf2   :  { %vm350_vm10 = vcmp.ge.f32.partialorder %v305_v31, 0.0  ;;  %v367_v36 = vmul.f32 %v3442_v13, %v305_v31  ;;  %v308_v37 = vadd.f32 %v3105_v35, %v3440_v11  ;;  %v299_v38 = vpop.f32.mrb[7].mxu0 }
  0xf3   :  { %vm348_vm11 = vcmp.ge.f32.partialorder %v297_v34, 0.0  ;;  %v365_v40 = vmul.f32 %v3442_v13, %v297_v34  ;;  %v300_v41 = vadd.f32 %v3440_v11, %v299_v38 }
  0xf4   :  { %v3477_v43 = vsel %vm350_vm10, %v305_v31, %v367_v36  ;;  %vm351_vm12 = vcmp.ge.f32.partialorder %v308_v37, 0.0  ;;  %v368_v44 = vmul.f32 %v3442_v13, %v308_v37  ;;  %v3490_v51 = vld [vmem:[#allocation2 + $0x30] sm:$0xff]  ;;  %v418_v61 = vld [vmem:[#allocation2 + $0x38] sm:$0x3]  ;;  %vm604_vm10 = vcmask 64544  }
  0xf5   :  { %400 = vst.msk [vmem:[#allocation2 + $0x71] sm:$0xff] %vm49_vm2, %v3477_v43  ;;  %v3483_v46 = vsel %vm348_vm11, %v297_v34, %v365_v40  ;;  %v3485_v47 = vld [vmem:[#allocation2 + $0x10] sm:$0xff]  ;;  %vm349_vm13 = vcmp.ge.f32.partialorder %v300_v41, 0.0  ;;  %v366_v48 = vmul.f32 %v3442_v13, %v300_v41  ;;  %v414_v49 = vld [vmem:[#allocation2 + $0x18] sm:$0x3]  ;;  %v509_v8 = vrot.slane %v3490_v51, 1 }
  0xf6   :  { %398 = vst.msk [vmem:[#allocation2 + $0x51] sm:$0xff] %vm49_vm2, %v3483_v46  ;;  %v419_v52 = vld [vmem:[#allocation2 + $0x40] sm:$0xff]  ;;  %v3492_v53 = vsel %vm351_vm12, %v308_v37, %v368_v44  ;;  %v617_v54 = vrot.slane %v3485_v47, 2  ;;  %v618_v55 = vrot.slane %v414_v49, 2  ;;  %v420_v56 = vld [vmem:[#allocation2 + $0x48] sm:$0x3] }
  0xf7   :  { %v728_v57 = vpack.c.bf16 %v419_v52, %v3490_v51  ;;  %401 = vst.msk [vmem:[#allocation2 + $0x81] sm:$0xff] %vm49_vm2, %v3492_v53  ;;  %v3498_v58 = vld [vmem:[#allocation2 + $0x20] sm:$0xff]  ;;  %v3500_v59 = vsel %vm349_vm13, %v300_v41, %v366_v48  ;;  %v512_v62 = vrot.slane %v419_v52, 1  ;;  %v3108_v63 = vpop.f32.mrb[8].mxu0  ;;  %v513_v3 = vrot.slane %v420_v56, 1 }
  0xf8   :  { %v727_v0 = vpack.c.bf16 %v3498_v58, %v3485_v47  ;;  %399 = vst.msk [vmem:[#allocation2 + $0x61] sm:$0xff] %vm49_vm2, %v3500_v59  ;;  %v3508_v1 = vsel %vm613_vm9, %v617_v54, %v618_v55  ;;  %v452_v2 = vpack.c.bf16 %v3490_v51, %v3498_v58  ;;  %v312_v4 = vpop.f32.mrb[9].mxu0  ;;  %v503_v5 = vrot.slane %v3485_v47, 1  ;;  %v416_v12 = vld [vmem:[#allocation2 + $0x28] sm:$0x3] }
  0xf9   :  { %745 = vrot.lane.b32.xlu1 %v728_v57, %s3234_s3  ;;  %v504_v6 = vrot.slane %v414_v49, 1  ;;  %v3109_v7 = vpop.f32.mrb[10].mxu0  ;;  %v510_v9 = vrot.slane %v418_v61, 1  ;;  %v678_v15 = vpack.c.bf16 %v3508_v1, %v616_v60  ;;  %v3519_v16 = vsel %vm499_vm14, %v512_v62, %v513_v3 }
  0xfa   :  { %743 = vrot.lane.b32.xlu0 %v727_v0, %s3234_s3  ;;  %460 = vst.msk [vmem:[#allocation4 + $0x8] sm:$0xff] %vm49_vm2, %v452_v2  ;;  %v315_v14 = vpop.f32.mrb[11].mxu0  ;;  %v626_v18 = vrot.slane %v419_v52, 2  ;;  %v627_v19 = vrot.slane %v420_v56, 2  ;;  %v506_v21 = vrot.slane %v3498_v58, 1  ;;  %v507_v22 = vrot.slane %v416_v12, 1 }
  0xfb   :  { %v505_v20 = vsel %vm499_vm14, %v503_v5, %v504_v6  ;;  %v321_v26 = vadd.f32 %v3108_v63, %v3440_v11  ;;  %v511_v29 = vsel %vm499_vm14, %v509_v8, %v510_v9  ;;  %v623_v31 = vrot.slane %v3490_v51, 2 }
  0xfc   :  { %v624_v32 = vrot.slane %v418_v61, 2  ;;  %v3531_v33 = vld [vmem:[#allocation2 + $0x70] sm:$0xff]  ;;  %v313_v34 = vadd.f32 %v3440_v11, %v312_v4  ;;  %v789_v35 = vpack.c.bf16 %v3519_v16, %v511_v29  ;;  %v564_v39 = vpack.c.bf16 %v505_v20, %v502_v17 }
  0xfd   :  { %694 = vrot.lane.b32.xlu1 %v678_v15, %s3235_s16  ;;  %v3525_v24 = vld [vmem:[#allocation2 + $0x50] sm:$0xff]  ;;  %v3539_v40 = vsel %vm613_vm9, %v626_v18, %v627_v19  ;;  %v620_v41 = vrot.slane %v3498_v58, 2  ;;  %v621_v42 = vrot.slane %v416_v12, 2  ;;  %v508_v45 = vsel %vm499_vm14, %v506_v21, %v507_v22  ;;  %v422_v19 = vld [vmem:[#allocation2 + $0x58] sm:$0x3]  ;;  %v3203_v21 = vld [vmem:[%s4871_s4] sm:$0xff]  }
  0xfe   :  { %904 = vrot.lane.b32.xlu0 %v452_v2, %s3236_s17  ;;  %v453_v36 = vpack.c.bf16 %v3525_v24, %v419_v52  ;;  %vm354_vm15 = vcmp.ge.f32.partialorder %v321_v26, 0.0  ;;  %v625_v50 = vsel %vm613_vm9, %v623_v31, %v624_v32  ;;  %v371_v51 = vmul.f32 %v3442_v13, %v321_v26  ;;  %v3592_v17 = vld [vmem:[#allocation2 + $0x80] sm:$0xff]  ;;  %3114 = vmatprep.subr.bf16.mxu1 %v3203_v21 }
  0xff   :  { %v3536_v37 = vld [vmem:[#allocation2 + $0x60] sm:$0xff]  ;;  %v3112_v38 = vpop.f32.mrb[12].mxu0  ;;  %vm352_vm0 = vcmp.ge.f32.partialorder %v313_v34, 0.0  ;;  %v369_v52 = vmul.f32 %v3442_v13, %v313_v34  ;;  %v846_v55 = vpack.c.bf16 %v3539_v40, %v625_v50  ;;  %v565_v56 = vpack.c.bf16 %v511_v29, %v508_v45  ;;  %3115 = vmatpush3.bf16.msra.mxu1 %v3203_v21 }
 0x100   :  { %v328_v44 = vpop.f32.mrb[13].mxu0  ;;  %461 = vst.msk [vmem:[#allocation4 + $0x10] sm:$0xff] %vm49_vm2, %v453_v36  ;;  %v3547_v48 = vpack.c.bf16 %v3531_v33, %v3536_v37  ;;  %v622_v57 = vsel %vm613_vm9, %v620_v41, %v621_v42  ;;  %v3557_v58 = vsel %vm354_vm15, %v321_v26, %v371_v51  ;;  %v324_v61 = vadd.f32 %v3109_v7, %v3440_v11  ;;  %v3606_v26 = vld [vmem:[#allocation2 + $0x90] sm:$0xff]  ;;  %v428_v51 = vld [vmem:[#allocation2 + $0x88] sm:$0x3] }
 0x101   :  { %806 = vrot.lane.b32.xlu1 %v789_v35, %s3237_s18  ;;  %v3113_v49 = vpop.f32.mrb[14].mxu0  ;;  %v3559_v60 = vsel %vm352_vm0, %v313_v34, %v369_v52  ;;  %404 = vst.msk [vmem:[#allocation2 + $0xd1] sm:$0xff] %vm49_vm2, %v3557_v58  ;;  %v316_v62 = vadd.f32 %v3440_v11, %v315_v14  ;;  %v337_v63 = vadd.f32 %v3112_v38, %v3440_v11  ;;  %v515_v29 = vrot.slane %v3525_v24, 1  ;;  %v3204_v34 = vld [vmem:[%s4871_s4 + $0x8] sm:$0xff]  }
 0x102   :  { %580 = vrot.lane.b32.xlu0 %v564_v39, %s3238_s19  ;;  %v331_v54 = vpop.f32.mrb[15].mxu0  ;;  %462 = vst.msk [vmem:[#allocation4 + $0x18] sm:$0xff] %vm49_vm2, %v3547_v48  ;;  %402 = vst.msk [vmem:[#allocation2 + $0xb1] sm:$0xff] %vm49_vm2, %v3559_v60  ;;  %v329_v0 = vadd.f32 %v3440_v11, %v328_v44  ;;  %v679_v2 = vpack.c.bf16 %v625_v50, %v622_v57  ;;  %vm355_vm1 = vcmp.ge.f32.partialorder %v324_v61, 0.0  ;;  %v516_v31 = vrot.slane %v422_v19, 1 }
 0x103   :  { %v372_v3 = vmul.f32 %v3442_v13, %v324_v61  ;;  %vm353_vm3 = vcmp.ge.f32.partialorder %v316_v62, 0.0  ;;  %v788_v4 = vpack.c.bf16 %v508_v45, %v505_v20  ;;  %v370_v5 = vmul.f32 %v3442_v13, %v316_v62  ;;  %3116 = vmatprep.subr.bf16.mxu1 %v3204_v34  ;;  %v426_v45 = vld [vmem:[#allocation2 + $0x78] sm:$0x3] }
 0x104   :  { %vm358_vm4 = vcmp.ge.f32.partialorder %v337_v63, 0.0  ;;  %v375_v6 = vmul.f32 %v3442_v13, %v337_v63  ;;  %vm356_vm5 = vcmp.ge.f32.partialorder %v329_v0, 0.0  ;;  %v373_v8 = vmul.f32 %v3442_v13, %v329_v0  ;;  %3117 = vmatpush3.bf16.msra.mxu1 %v3204_v34  ;;  %v3691_v34 = vld [vmem:[#allocation2 + $0xa0] sm:$0xff] }
 0x105   :  { %863 = vrot.lane.b32.xlu1 %v846_v55, %s3239_s20  ;;  %v3575_v7 = vsel %vm355_vm1, %v324_v61, %v372_v3  ;;  %v3581_v9 = vsel %vm353_vm3, %v316_v62, %v370_v5  ;;  %v845_v15 = vpack.c.bf16 %v622_v57, %v3508_v1  ;;  %v340_v18 = vadd.f32 %v3113_v49, %v3440_v11 }
 0x106   :  { %582 = vrot.lane.b32.xlu0 %v565_v56, %s3238_s19  ;;  %405 = vst.msk [vmem:[#allocation2 + $0xe1] sm:$0xff] %vm49_vm2, %v3575_v7  ;;  %v3583_v12 = vsel %vm358_vm4, %v337_v63, %v375_v6  ;;  %403 = vst.msk [vmem:[#allocation2 + $0xc1] sm:$0xff] %vm49_vm2, %v3581_v9  ;;  %v3589_v14 = vsel %vm356_vm5, %v329_v0, %v373_v8  ;;  %v332_v20 = vadd.f32 %v3440_v11, %v331_v54  ;;  %vm101_vm11 = vcmask 130048  }
 0x107   :  { %408 = vst.msk [vmem:[#allocation2 + $0x111] sm:$0xff] %vm49_vm2, %v3583_v12  ;;  %406 = vst.msk [vmem:[#allocation2 + $0xf1] sm:$0xff] %vm49_vm2, %v3589_v14  ;;  %vm359_vm6 = vcmp.ge.f32.partialorder %v340_v18, 0.0  ;;  %v730_v1 = vpack.c.bf16 %v3592_v17, %v3531_v33  ;;  %v376_v22 = vmul.f32 %v3442_v13, %v340_v18  ;;  %v3634_v41 = vsel %vm499_vm14, %v515_v29, %v516_v31 }
 0x108   :  { %vm357_vm7 = vcmp.ge.f32.partialorder %v332_v20, 0.0  ;;  %v3609_v11 = vld [vmem:[#allocation2 + $0xd0] sm:$0xff]  ;;  %v374_v32 = vmul.f32 %v3442_v13, %v332_v20  ;;  %v894_v13 = vpack.c.bf16 %v3606_v26, %v3592_v17  ;;  %v629_v42 = vrot.slane %v3525_v24, 2  ;;  %102 = vst.msk [vmem:[#allocation3] sm:$0xff] %vm101_vm11, %v3233_v10  ;;  %105 = vst.msk [vmem:[#allocation3 + $0xa0] sm:$0xff] %vm101_vm11, %v3233_v10 }
 0x109   :  { %696 = vrot.lane.b32.xlu1 %v679_v2, %s3235_s16  ;;  %v3616_v35 = vsel %vm359_vm6, %v340_v18, %v376_v22  ;;  %v630_v44 = vrot.slane %v422_v19, 2  ;;  %v566_v52 = vpack.c.bf16 %v3634_v41, %v3519_v16  ;;  %v521_v54 = vrot.slane %v3531_v33, 1  ;;  %v430_v18 = vld [vmem:[#allocation2 + $0x98] sm:$0x3]  ;;  %108 = vst.msk [vmem:[#allocation3 + $0x90] sm:$0xff] %vm101_vm11, %v3233_v10  ;;  %110 = vst.msk [vmem:[#allocation3 + $0x130] sm:$0xff] %vm101_vm11, %v3233_v10 }
 0x10a   :  { %804 = vrot.lane.b32.xlu0 %v788_v4, %s3237_s18  ;;  %409 = vst.msk [vmem:[#allocation2 + $0x121] sm:$0xff] %vm49_vm2, %v3616_v35  ;;  %v3623_v38 = vsel %vm357_vm7, %v332_v20, %v374_v32  ;;  %v522_v55 = vrot.slane %v426_v45, 1  ;;  %v729_v57 = vpack.c.bf16 %v3536_v37, %v3525_v24  ;;  %v780_v62 = vrot.slane %v3592_v17, 1  ;;  %v3689_v32 = vld [vmem:[#allocation2 + $0xb0] sm:$0xff] }
 0x10b   :  { %407 = vst.msk [vmem:[#allocation2 + $0x101] sm:$0xff] %vm49_vm2, %v3623_v38  ;;  %v631_v61 = vsel %vm613_vm9, %v629_v42, %v630_v44  ;;  %v781_v63 = vrot.slane %v428_v51, 1  ;;  %v635_v3 = vrot.slane %v3531_v33, 2  ;;  %v636_v6 = vrot.slane %v426_v45, 2  ;;  %v424_v33 = vld [vmem:[#allocation2 + $0x68] sm:$0x3] }
 0x10c   :  { %v523_v24 = vsel %vm499_vm14, %v521_v54, %v522_v55  ;;  %v837_v8 = vrot.slane %v3592_v17, 2  ;;  %v941_v19 = vrot.slane %v3606_v26, 1  ;;  %v518_v17 = vrot.slane %v3536_v37, 1 }
 0x10d   :  { %906 = vrot.lane.b32.xlu1 %v453_v36, %s3236_s17  ;;  %v3621_v36 = vld [vmem:[#allocation2 + $0xc0] sm:$0xff]  ;;  %v782_v5 = vsel %vm499_vm14, %v780_v62, %v781_v63  ;;  %v637_v20 = vsel %vm613_vm9, %v635_v3, %v636_v6  ;;  %v519_v22 = vrot.slane %v424_v33, 1  ;;  %v451_v29 = vpack.c.bf16 %v3485_v47, %v3466_v30 }
 0x10e   :  { %861 = vrot.lane.b32.xlu0 %v845_v15, %s3239_s20  ;;  %v3631_v39 = vpack.c.bf16 %v3609_v11, %v3621_v36  ;;  %v3637_v49 = vld [vmem:[#allocation2 + $0xe0] sm:$0xff]  ;;  %v3639_v50 = vld [vmem:[#allocation2 + $0xf0] sm:$0xff]  ;;  %v838_v15 = vrot.slane %v428_v51, 2  ;;  %v987_v44 = vrot.slane %v430_v18, 2  ;;  %v632_v47 = vrot.slane %v3536_v37, 2 }
 0x10f   :  { %v3656_v0 = vld [vmem:[#allocation2 + $0x110] sm:$0xff]  ;;  %459 = vst.msk [vmem:[#allocation4] sm:$0xff] %vm49_vm2, %v451_v29  ;;  %v520_v30 = vsel %vm499_vm14, %v518_v17, %v519_v22  ;;  %v633_v45 = vrot.slane %v424_v33, 2  ;;  %v524_v22 = vrot.slane %v3691_v34, 1  ;;  %vm718_vm12 = vcmask 97344  }
 0x110   :  { %464 = vst.msk [vmem:[#allocation4 + $0x28] sm:$0xff] %vm49_vm2, %v3631_v39  ;;  %v839_v21 = vsel %vm613_vm9, %v837_v8, %v838_v15  ;;  %v790_v54 = vpack.c.bf16 %v520_v30, %v3634_v41  ;;  %v567_v63 = vpack.c.bf16 %v523_v24, %v520_v30  ;;  %v440_v41 = vld [vmem:[#allocation2 + $0xe8] sm:$0x3]  ;;  %v536_v8 = vrot.slane %v3637_v49, 1 }
 0x111   :  { %749 = vrot.lane.b32.xlu1 %v730_v1, %s3234_s3  ;;  %v942_v1 = vrot.slane %v430_v18, 1  ;;  %v848_v31 = vpack.c.bf16 %v839_v21, %v637_v20  ;;  %v634_v37 = vsel %vm613_vm9, %v632_v47, %v633_v45  ;;  %v537_v15 = vrot.slane %v440_v41, 1  ;;  %v434_v18 = vld [vmem:[#allocation2 + $0xb8] sm:$0x3] }
 0x112   :  { %953 = vrot.lane.b32.xlu0 %v565_v56, %s3240_s24  ;;  %v3650_v56 = vpack.c.bf16 %v3639_v50, %v3637_v49  ;;  %v3662_v16 = vld [vmem:[#allocation2 + $0x100] sm:$0xff]  ;;  %v847_v62 = vpack.c.bf16 %v634_v37, %v631_v61  ;;  %v681_v3 = vpack.c.bf16 %v637_v20, %v634_v37  ;;  %v731_v20 = vpack.c.bf16 %v3621_v36, %v3689_v32 }
 0x113   :  { %v3669_v4 = vpack.c.bf16 %v3656_v0, %v3662_v16  ;;  %v943_v42 = vsel %vm499_vm14, %v941_v19, %v942_v1  ;;  %v650_v1 = vrot.slane %v3637_v49, 2  ;;  %v651_v17 = vrot.slane %v440_v41, 2 }
 0x114   :  { %465 = vst.msk [vmem:[#allocation4 + $0x30] sm:$0xff] %vm49_vm2, %v3650_v56  ;;  %v530_v47 = vrot.slane %v3621_v36, 1  ;;  %vm767_vm13 = vcmask 130144   ;;  %vm828_vm15 = vcmask 162944   ;;  %vm4882_vm0 = vcmask 195744  }
 0x115   :  { %910 = vrot.lane.b32.xlu1 %v894_v13, %s3236_s17  ;;  %466 = vst.msk [vmem:[#allocation4 + $0x38] sm:$0xff] %vm49_vm2, %v3669_v4  ;;  %v986_v13 = vrot.slane %v3606_v26, 2  ;;  %v455_v26 = vpack.c.bf16 %v3689_v32, %v3691_v34  ;;  %vm4881_vm1 = vcmask 228544   ;;  %vm4880_vm3 = vcmask 261344  }
 0x116   :  { %998 = vrot.lane.b32.xlu0 %v679_v2, %s3241_s2  ;;  %v680_v2 = vpack.c.bf16 %v631_v61, %v3539_v40  ;;  %v791_v40 = vpack.c.bf16 %v782_v5, %v523_v24  ;;  %v432_v61 = vld [vmem:[#allocation2 + $0xa8] sm:$0x3]  ;;  %v732_v24 = vpack.c.bf16 %v3637_v49, %v3609_v11  ;;  %v652_v49 = vsel %vm613_vm9, %v650_v1, %v651_v17 }
 0x117   :  { %v988_v55 = vsel %vm613_vm9, %v986_v13, %v987_v44  ;;  %463 = vst.msk [vmem:[#allocation4 + $0x20] sm:$0xff] %vm49_vm2, %v455_v26  ;;  %v525_v29 = vrot.slane %v432_v61, 1  ;;  %v436_v13 = vld [vmem:[#allocation2 + $0xc8] sm:$0x3]  ;;  %v639_v44 = vrot.slane %v432_v61, 2  ;;  %v3755_v61 = vld [vmem:[#allocation2 + $0x130] sm:$0xff] }
 0x118   :  { %v531_v45 = vrot.slane %v436_v13, 1  ;;  %v448_v1 = vld [vmem:[#allocation2 + $0x128] sm:$0x3]  ;;  %vm4879_vm4 = vcmask 294144   ;;  %vm4878_vm5 = vcmask 293888   ;;  %vm112_vm6 = vcmask 122880  }
 0x119   :  { %955 = vrot.lane.b32.xlu1 %v566_v52, %s3240_s24  ;;  %116 = vst.msk [vmem:[#allocation3 + $0x30] sm:$0x1] %vm112_vm6, %v3233_v10  ;;  %117 = vst.msk [vmem:[#allocation3 + $0x40] sm:$0x1] %vm112_vm6, %v3233_v10  ;;  %vm103_vm7 = vcmask 123904  }
 0x11a   :  { %747 = vrot.lane.b32.xlu0 %v729_v57, %s3234_s3  ;;  %v994_v57 = vpack.c.bf16 %v988_v55, %v839_v21  ;;  %v538_v21 = vsel %vm499_vm14, %v536_v8, %v537_v15  ;;  %v532_v37 = vsel %vm499_vm14, %v530_v47, %v531_v45  ;;  %v442_v8 = vld [vmem:[#allocation2 + $0xf8] sm:$0x3]  ;;  %v841_v45 = vrot.slane %v448_v1, 2  ;;  %113 = vst.msk [vmem:[#allocation3] sm:$0x1] %vm112_vm6, %v3233_v10 }
 0x11b   :  { %114 = vst.msk [vmem:[#allocation3 + $0x10] sm:$0x1] %vm112_vm6, %v3233_v10  ;;  %115 = vst.msk [vmem:[#allocation3 + $0x20] sm:$0x1] %vm112_vm6, %v3233_v10 }
 0x11c   :  { %118 = vst.msk [vmem:[#allocation3 + $0x50] sm:$0x1] %vm112_vm6, %v3233_v10  ;;  %119 = vst.msk [vmem:[#allocation3 + $0x60] sm:$0x1] %vm112_vm6, %v3233_v10 }
 0x11d   :  { %1000 = vrot.lane.b32.xlu1 %v680_v2, %s3241_s2  ;;  %120 = vst.msk [vmem:[#allocation3 + $0x70] sm:$0x1] %vm112_vm6, %v3233_v10  ;;  %121 = vst.msk [vmem:[#allocation3 + $0x80] sm:$0x1] %vm112_vm6, %v3233_v10 }
 0x11e   :  { %908 = vrot.lane.b32.xlu0 %v3547_v48, %s3236_s17  ;;  %v3205_v48 = vld [vmem:[%s4871_s4 + $0x10] ss:$0 sps:$4 sm:$0x33]   ;;  %122 = vst.msk [vmem:[#allocation3 + $0x90] sm:$0x1] %vm112_vm6, %v3233_v10  ;;  %s3020_s4 = sld [smem:[#allocation6 + $0x1]] }
 0x11f   :  { %3177 = vmatprep.subr.msk.bf16.mxu1 %vm1091_vm8, %v3205_v48  ;;  %v1093_v51 = vsel %vm1091_vm8, %v3205_v48, 0  ;;  %v527_v48 = vrot.slane %v3689_v32, 1  ;;  %123 = vst.msk [vmem:[#allocation3 + $0xa0] sm:$0x1] %vm112_vm6, %v3233_v10  ;;  %124 = vst.msk [vmem:[#allocation3 + $0xb0] sm:$0x1] %vm112_vm6, %v3233_v10 }
 0x120   :  { %3119 = vmatpush3.bf16.msra.mxu1 %v1093_v51  ;;  %v526_v51 = vsel %vm499_vm14, %v524_v22, %v525_v29  ;;  %v733_v22 = vpack.c.bf16 %v3662_v16, %v3639_v50  ;;  %v545_v29 = vrot.slane %v3656_v0, 1  ;;  %125 = vst.msk [vmem:[#allocation3 + $0xc0] sm:$0x1] %vm112_vm6, %v3233_v10  ;;  %126 = vst.msk [vmem:[#allocation3 + $0xd0] sm:$0x1] %vm112_vm6, %v3233_v10 }
 0x121   :  { %810 = vrot.lane.b32.xlu1 %v791_v40, %s3237_s18  ;;  %v647_v40 = vrot.slane %v3609_v11, 2  ;;  %127 = vst.msk [vmem:[#allocation3 + $0xe0] sm:$0x1] %vm112_vm6, %v3233_v10  ;;  %128 = vst.msk [vmem:[#allocation3 + $0xf0] sm:$0x1] %vm112_vm6, %v3233_v10 }
 0x122   :  { %584 = vrot.lane.b32.xlu0 %v566_v52, %s3238_s19  ;;  %v949_v52 = vpack.c.bf16 %v943_v42, %v782_v5  ;;  %v533_v5 = vrot.slane %v3609_v11, 1  ;;  %v638_v42 = vrot.slane %v3691_v34, 2  ;;  %129 = vst.msk [vmem:[#allocation3 + $0x100] sm:$0x1] %vm112_vm6, %v3233_v10  ;;  %130 = vst.msk [vmem:[#allocation3 + $0x110] sm:$0x1] %vm112_vm6, %v3233_v10 }
 0x123   :  { %131 = vst.msk [vmem:[#allocation3 + $0x120] sm:$0x1] %vm112_vm6, %v3233_v10  ;;  %132 = vst.msk [vmem:[#allocation3 + $0x130] sm:$0x1] %vm112_vm6, %v3233_v10 }
 0x124   :  { %134 = vst.msk [vmem:[#allocation3 + $0x19] sm:$0x1] %vm112_vm6, %v3233_v10  ;;  %135 = vst.msk [vmem:[#allocation3 + $0x29] sm:$0x1] %vm112_vm6, %v3233_v10 }
 0x125   :  { %867 = vrot.lane.b32.xlu1 %v848_v31, %s3239_s20  ;;  %v528_v31 = vrot.slane %v434_v18, 1  ;;  %136 = vst.msk [vmem:[#allocation3 + $0x39] sm:$0x1] %vm112_vm6, %v3233_v10  ;;  %137 = vst.msk [vmem:[#allocation3 + $0x49] sm:$0x1] %vm112_vm6, %v3233_v10 }
 0x126   :  { %698 = vrot.lane.b32.xlu0 %v680_v2, %s3235_s16  ;;  %v438_v2 = vld [vmem:[#allocation2 + $0xd8] sm:$0x3]  ;;  %138 = vst.msk [vmem:[#allocation3 + $0x59] sm:$0x1] %vm112_vm6, %v3233_v10  ;;  %139 = vst.msk [vmem:[#allocation3 + $0x69] sm:$0x1] %vm112_vm6, %v3233_v10 }
 0x127   :  { %v534_v6 = vrot.slane %v438_v2, 1  ;;  %v648_v19 = vrot.slane %v438_v2, 2  ;;  %v529_v26 = vsel %vm499_vm14, %v527_v48, %v528_v31  ;;  %140 = vst.msk [vmem:[#allocation3 + $0x79] sm:$0x1] %vm112_vm6, %v3233_v10  ;;  %141 = vst.msk [vmem:[#allocation3 + $0x89] sm:$0x1] %vm112_vm6, %v3233_v10 }
 0x128   :  { %v568_v55 = vpack.c.bf16 %v529_v26, %v526_v51  ;;  %v444_v51 = vld [vmem:[#allocation2 + $0x108] sm:$0x3]  ;;  %144 = vst.msk [vmem:[#allocation3 + $0xb9] sm:$0x1] %vm112_vm6, %v3233_v10  ;;  %145 = vst.msk [vmem:[#allocation3 + $0xc9] sm:$0x1] %vm112_vm6, %v3233_v10 }
 0x129   :  { %959 = vrot.lane.b32.xlu1 %v949_v52, %s3240_s24  ;;  %v535_v33 = vsel %vm499_vm14, %v533_v5, %v534_v6  ;;  %v649_v30 = vsel %vm613_vm9, %v647_v40, %v648_v19  ;;  %v641_v52 = vrot.slane %v3689_v32, 2  ;;  %v792_v5 = vpack.c.bf16 %v532_v37, %v529_v26  ;;  %v447_v6 = vld [vmem:[#allocation2 + $0x120] sm:$0xff]  ;;  %146 = vst.msk [vmem:[#allocation3 + $0xd9] sm:$0x1] %vm112_vm6, %v3233_v10 }
 0x12a   :  { %808 = vrot.lane.b32.xlu0 %v790_v54, %s3237_s18  ;;  %v793_v11 = vpack.c.bf16 %v538_v21, %v535_v33  ;;  %v642_v54 = vrot.slane %v434_v18, 2  ;;  %v850_v34 = vpack.c.bf16 %v652_v49, %v649_v30  ;;  %v569_v32 = vpack.c.bf16 %v535_v33, %v532_v37  ;;  %147 = vst.msk [vmem:[#allocation3 + $0xe9] sm:$0x1] %vm112_vm6, %v3233_v10 }
 0x12b   :  { %v734_v15 = vpack.c.bf16 %v447_v6, %v3656_v0  ;;  %v539_v18 = vrot.slane %v3639_v50, 1  ;;  %v895_v33 = vpack.c.bf16 %v3755_v61, %v447_v6  ;;  %v654_v19 = vrot.slane %v442_v8, 2  ;;  %148 = vst.msk [vmem:[#allocation3 + $0xf9] sm:$0x1] %vm112_vm6, %v3233_v10  ;;  %149 = vst.msk [vmem:[#allocation3 + $0x109] sm:$0x1] %vm112_vm6, %v3233_v10 }
 0x12c   :  { %v643_v2 = vsel %vm613_vm9, %v641_v52, %v642_v54  ;;  %v543_v54 = vrot.slane %v444_v51, 1  ;;  %v656_v37 = vrot.slane %v3662_v16, 2  ;;  %150 = vst.msk [vmem:[#allocation3 + $0x119] sm:$0x1] %vm112_vm6, %v3233_v10  ;;  %151 = vst.msk [vmem:[#allocation3 + $0x129] sm:$0x1] %vm112_vm6, %v3233_v10 }
 0x12d   :  { %1004 = vrot.lane.b32.xlu1 %v994_v57, %s3241_s2  ;;  %v644_v57 = vrot.slane %v3621_v36, 2  ;;  %104 = vst.msk [vmem:[#allocation3 + $0x8] sm:$0x3] %vm103_vm7, %v3233_v10  ;;  %111 = vst.msk [vmem:[#allocation3 + $0x138] sm:$0x3] %vm103_vm7, %v3233_v10 }
 0x12e   :  { %865 = vrot.lane.b32.xlu0 %v847_v62, %s3239_s20  ;;  %v645_v62 = vrot.slane %v436_v13, 2  ;;  %v783_v13 = vrot.slane %v447_v6, 1  ;;  %106 = vst.msk [vmem:[#allocation3 + $0xa8] sm:$0x3] %vm103_vm7, %v3233_v10  ;;  %109 = vst.msk [vmem:[#allocation3 + $0x98] sm:$0x3] %vm103_vm7, %v3233_v10 }
 0x12f   :  { %133 = vst.msk [vmem:[#allocation3 + $0x9] sm:$0x1] %vm112_vm6, %v3233_v10  ;;  %152 = vst.msk [vmem:[#allocation3 + $0x139] sm:$0x1] %vm112_vm6, %v3233_v10 }
 0x130   :  { %142 = vst.msk [vmem:[#allocation3 + $0x99] sm:$0x1] %vm112_vm6, %v3233_v10  ;;  %143 = vst.msk [vmem:[#allocation3 + $0xa9] sm:$0x1] %vm112_vm6, %v3233_v10  ;;  %v3207_v10 = vld [vmem:[%s4873_s6 + $0x8] sm:$0xff]  }
 0x131   :  { %586 = vrot.lane.b32.xlu1 %v567_v63, %s3238_s19 }
 0x132   :  { %957 = vrot.lane.b32.xlu0 %v567_v63, %s3240_s24  ;;  %v640_v63 = vsel %vm613_vm9, %v638_v42, %v639_v44  ;;  %v659_v44 = vrot.slane %v3656_v0, 2  ;;  %v542_v0 = vrot.slane %v3662_v16, 1  ;;  %v989_v16 = vrot.slane %v3755_v61, 2 }
 0x133   :  { %v682_v41 = vpack.c.bf16 %v643_v2, %v640_v63  ;;  %v944_v63 = vrot.slane %v3755_v61, 1 }
 0x135   :  { %700 = vrot.lane.b32.xlu1 %v681_v3, %s3235_s16 }
 0x136   :  { %1002 = vrot.lane.b32.xlu0 %v681_v3, %s3241_s2  ;;  %v646_v3 = vsel %vm613_vm9, %v644_v57, %v645_v62  ;;  %v657_v57 = vrot.slane %v444_v51, 2 }
 0x137   :  { %v849_v36 = vpack.c.bf16 %v646_v3, %v643_v2 }
 0x139   :  { %753 = vrot.lane.b32.xlu1 %v732_v24, %s3234_s3  ;;  %v540_v24 = vrot.slane %v442_v8, 1 }
 0x13a   :  { %751 = vrot.lane.b32.xlu0 %v731_v20, %s3234_s3  ;;  %v446_v20 = vld [vmem:[#allocation2 + $0x118] sm:$0x3] }
 0x13b   :  { %v541_v40 = vsel %vm499_vm14, %v539_v18, %v540_v24  ;;  %v546_v31 = vrot.slane %v446_v20, 1 }
 0x13c   :  { %v570_v17 = vpack.c.bf16 %v541_v40, %v538_v21 }
 0x13d   :  { %814 = vrot.lane.b32.xlu1 %v793_v11, %s3237_s18  ;;  %v784_v11 = vrot.slane %v448_v1, 1  ;;  %v547_v21 = vsel %vm499_vm14, %v545_v29, %v546_v31 }
 0x13e   :  { %912 = vrot.lane.b32.xlu0 %v3631_v39, %s3236_s17  ;;  %v683_v39 = vpack.c.bf16 %v649_v30, %v646_v3  ;;  %v660_v30 = vrot.slane %v446_v20, 2 }
 0x13f   :  { %v785_v47 = vsel %vm499_vm14, %v783_v13, %v784_v11 }
 0x140   :  { %v795_v26 = vpack.c.bf16 %v785_v47, %v547_v21  ;;  %v661_v52 = vsel %vm613_vm9, %v659_v44, %v660_v30 }
 0x141   :  { %871 = vrot.lane.b32.xlu1 %v850_v34, %s3239_s20 }
 0x142   :  { %588 = vrot.lane.b32.xlu0 %v568_v55, %s3238_s19  ;;  %v544_v55 = vsel %vm499_vm14, %v542_v0, %v543_v54 }
 0x143   :  { %v571_v62 = vpack.c.bf16 %v547_v21, %v544_v55  ;;  %v794_v2 = vpack.c.bf16 %v544_v55, %v541_v40 }
 0x145   :  { %590 = vrot.lane.b32.xlu1 %v569_v32, %s3238_s19 }
 0x146   :  { %702 = vrot.lane.b32.xlu0 %v682_v41, %s3235_s16 }
 0x149   :  { %704 = vrot.lane.b32.xlu1 %v683_v39, %s3235_s16 }
 0x14a   :  { %812 = vrot.lane.b32.xlu0 %v792_v5, %s3237_s18 }
 0x14d   :  { %914 = vrot.lane.b32.xlu1 %v3650_v56, %s3236_s17  ;;  %v653_v56 = vrot.slane %v3639_v50, 2  ;;  %v840_v50 = vrot.slane %v447_v6, 2 }
 0x14e   :  { %869 = vrot.lane.b32.xlu0 %v849_v36, %s3239_s20 }
 0x14f   :  { %v655_v48 = vsel %vm613_vm9, %v653_v56, %v654_v19 }
 0x150   :  { %v684_v42 = vpack.c.bf16 %v655_v48, %v652_v49  ;;  %v842_v49 = vsel %vm613_vm9, %v840_v50, %v841_v45 }
 0x151   :  { %757 = vrot.lane.b32.xlu1 %v734_v15, %s3234_s3  ;;  %v852_v34 = vpack.c.bf16 %v842_v49, %v661_v52 }
 0x152   :  { %961 = vrot.lane.b32.xlu0 %v569_v32, %s3240_s24  ;;  %v658_v32 = vsel %vm613_vm9, %v656_v37, %v657_v57 }
 0x153   :  { %v851_v36 = vpack.c.bf16 %v658_v32, %v655_v48 }
 0x155   :  { %918 = vrot.lane.b32.xlu1 %v895_v33, %s3236_s17 }
 0x156   :  { %1006 = vrot.lane.b32.xlu0 %v683_v39, %s3241_s2  ;;  %v685_v39 = vpack.c.bf16 %v661_v52, %v658_v32 }
 0x159   :  { %963 = vrot.lane.b32.xlu1 %v570_v17, %s3240_s24 }
 0x15a   :  { %755 = vrot.lane.b32.xlu0 %v733_v22, %s3234_s3 }
 0x15d   :  { %1008 = vrot.lane.b32.xlu1 %v684_v42, %s3241_s2 }
 0x15e   :  { %916 = vrot.lane.b32.xlu0 %v3669_v4, %s3236_s17  ;;  %v450_v4 = vld [vmem:[#allocation2 + $0x138] sm:$0x3] }
 0x15f   :  { %v945_v41 = vrot.slane %v450_v4, 1  ;;  %v990_v8 = vrot.slane %v450_v4, 2 }
 0x161   :  { %818 = vrot.lane.b32.xlu1 %v795_v26, %s3237_s18  ;;  %v946_v6 = vsel %vm499_vm14, %v944_v63, %v945_v41  ;;  %v991_v33 = vsel %vm613_vm9, %v989_v16, %v990_v8 }
 0x162   :  { %592 = vrot.lane.b32.xlu0 %v570_v17, %s3238_s19  ;;  %v950_v18 = vpack.c.bf16 %v946_v6, %v785_v47  ;;  %v995_v40 = vpack.c.bf16 %v991_v33, %v842_v49 }
 0x165   :  { %875 = vrot.lane.b32.xlu1 %v852_v34, %s3239_s20 }
 0x166   :  { %706 = vrot.lane.b32.xlu0 %v684_v42, %s3235_s16 }
 0x169   :  { %594 = vrot.lane.b32.xlu1 %v571_v62, %s3238_s19 }
 0x16a   :  { %816 = vrot.lane.b32.xlu0 %v794_v2, %s3237_s18 }
 0x16b   :  { %v746_v3 = vpop.permute.xlu1 %745 }
 0x16c   :  { %v744_v5 = vpop.permute.xlu0 %743 }
 0x16d   :  { %708 = vrot.lane.b32.xlu1 %v685_v39, %s3235_s16 }
 0x16e   :  { %873 = vrot.lane.b32.xlu0 %v851_v36, %s3239_s20 }
 0x16f   :  { %v695_v15 = vpop.permute.xlu1 %694 }
 0x170   :  { %v905_v24 = vpop.permute.xlu0 %904 }
 0x171   :  { %967 = vrot.lane.b32.xlu1 %v950_v18, %s3240_s24 }
 0x172   :  { %965 = vrot.lane.b32.xlu0 %v571_v62, %s3240_s24 }
 0x173   :  { %v807_v61 = vpop.permute.xlu1 %806 }
 0x174   :  { %v581_v56 = vpop.permute.xlu0 %580 }
 0x175   :  { %605 = vst.msk [vmem:[#allocation4] sm:$0xff] %vm604_vm10, %v581_v56  ;;  %1012 = vrot.lane.b32.xlu1 %v995_v40, %s3241_s2 }
 0x176   :  { %719 = vst.msk [vmem:[#allocation4] sm:$0xff] %vm718_vm12, %v695_v15  ;;  %1010 = vrot.lane.b32.xlu0 %v685_v39, %s3241_s2 }
 0x177   :  { %v864_v19 = vpop.permute.xlu1 %863  ;;  %768 = vst.msk [vmem:[#allocation4] sm:$0xff] %vm767_vm13, %v744_v5 }
 0x178   :  { %v583_v20 = vpop.permute.xlu0 %582 }
 0x179   :  { %606 = vst.msk [vmem:[#allocation4 + $0x8] sm:$0xff] %vm604_vm10, %v583_v20 }
 0x17b   :  { %v697_v1 = vpop.permute.xlu1 %696 }
 0x17c   :  { %720 = vst.msk [vmem:[#allocation4 + $0x8] sm:$0xff] %vm718_vm12, %v697_v1  ;;  %v805_v17 = vpop.permute.xlu0 %804 }
 0x17d   :  { %769 = vst.msk [vmem:[#allocation4 + $0x8] sm:$0xff] %vm767_vm13, %v746_v3 }
 0x17e   :  { %829 = vst.msk [vmem:[#allocation4] sm:$0xff] %vm828_vm15, %v805_v17  ;;  %830 = vst.msk [vmem:[#allocation4 + $0x8] sm:$0xff] %vm828_vm15, %v807_v61 }
 0x17f   :  { %v907_v22 = vpop.permute.xlu1 %906  ;;  %887 = vst.msk [vmem:[#allocation4 + $0x8] sm:$0xff] %vm4882_vm0, %v864_v19 }
 0x180   :  { %930 = vst.msk [vmem:[#allocation4 + $0x8] sm:$0xff] %vm4881_vm1, %v907_v22  ;;  %v862_v29 = vpop.permute.xlu0 %861 }
 0x181   :  { %886 = vst.msk [vmem:[#allocation4] sm:$0xff] %vm4882_vm0, %v862_v29 }
 0x182   :  { %929 = vst.msk [vmem:[#allocation4] sm:$0xff] %vm4881_vm1, %v905_v24 }
 0x183   :  { %v750_v48 = vpop.permute.xlu1 %749 }
 0x184   :  { %v954_v31 = vpop.permute.xlu0 %953 }
 0x185   :  { %978 = vst.msk [vmem:[#allocation4] sm:$0xff] %vm4880_vm3, %v954_v31 }
 0x187   :  { %v911_v13 = vpop.permute.xlu1 %910 }
 0x188   :  { %v999_v11 = vpop.permute.xlu0 %998 }
 0x189   :  { %1023 = vst.msk [vmem:[#allocation4] sm:$0xff] %vm4879_vm4, %v999_v11 }
 0x18b   :  { %v956_v42 = vpop.permute.xlu1 %955 }
 0x18c   :  { %979 = vst.msk [vmem:[#allocation4 + $0x8] sm:$0xff] %vm4880_vm3, %v956_v42  ;;  %v748_v44 = vpop.permute.xlu0 %747 }
 0x18f   :  { %v1001_v30 = vpop.permute.xlu1 %1000 }
 0x190   :  { %1024 = vst.msk [vmem:[#allocation4 + $0x8] sm:$0xff] %vm4879_vm4, %v1001_v30  ;;  %v909_v21 = vpop.permute.xlu0 %908  ;;  %v1031_v47 = vld [vmem:[#allocation4] sm:$0xff] }
 0x191   :  { %3120 = vmatprep.mubr.msk.bf16.mxu1 %vm4878_vm5, %v1031_v47 }
 0x193   :  { %v811_v50 = vpop.permute.xlu1 %810 }
 0x194   :  { %v585_v45 = vpop.permute.xlu0 %584 }
 0x195   :  { %607 = vst.msk [vmem:[#allocation4 + $0x10] sm:$0xff] %vm604_vm10, %v585_v45 }
 0x197   :  { %v868_v51 = vpop.permute.xlu1 %867  ;;  %v1032_v26 = vld [vmem:[#allocation4 + $0x8] sm:$0xff] }
 0x198   :  { %v699_v52 = vpop.permute.xlu0 %698  ;;  %3121 = vmatmul.mubr.msk.bf16.vlgmr.msra.gmra.mrb[0].mxu1 %vm4878_vm5, %v1032_v26 }
 0x199   :  { %721 = vst.msk [vmem:[#allocation4 + $0x10] sm:$0xff] %vm718_vm12, %v699_v52  ;;  %v3206_v52 = vld [vmem:[%s4873_s6] sm:$0xff]  }
 0x19a   :  { %770 = vst.msk [vmem:[#allocation4 + $0x10] sm:$0xff] %vm767_vm13, %v748_v44 }
 0x19b   :  { %v960_v49 = vpop.permute.xlu1 %959 }
 0x19c   :  { %v809_v0 = vpop.permute.xlu0 %808 }
 0x19d   :  { %831 = vst.msk [vmem:[#allocation4 + $0x10] sm:$0xff] %vm828_vm15, %v809_v0  ;;  %v3971_v0 = vld [vmem:[%s4872_s5] ss:$0 sm:$0xff]  ;;  %s3033_s5 = sld [smem:[#allocation6 + $0x2]] }
 0x19f   :  { %v1005_v54 = vpop.permute.xlu1 %1004 }
 0x1a0   :  { %v866_v34 = vpop.permute.xlu0 %865 }
 0x1a1   :  { %888 = vst.msk [vmem:[#allocation4 + $0x10] sm:$0xff] %vm4882_vm0, %v866_v34  ;;  %v3978_v34 = vstv %s3020_s4 }
 0x1a2   :  { %931 = vst.msk [vmem:[#allocation4 + $0x10] sm:$0xff] %vm4881_vm1, %v909_v21 }
 0x1a3   :  { %v587_v55 = vpop.permute.xlu1 %586 }
 0x1a4   :  { %608 = vst.msk [vmem:[#allocation4 + $0x18] sm:$0xff] %vm604_vm10, %v587_v55  ;;  %v958_v37 = vpop.permute.xlu0 %957 }
 0x1a5   :  { %980 = vst.msk [vmem:[#allocation4 + $0x10] sm:$0xff] %vm4880_vm3, %v958_v37 }
 0x1a7   :  { %v701_v57 = vpop.permute.xlu1 %700 }
 0x1a8   :  { %722 = vst.msk [vmem:[#allocation4 + $0x18] sm:$0xff] %vm718_vm12, %v701_v57  ;;  %v1003_v4 = vpop.permute.xlu0 %1002 }
 0x1a9   :  { %771 = vst.msk [vmem:[#allocation4 + $0x18] sm:$0xff] %vm767_vm13, %v750_v48 }
 0x1aa   :  { %1025 = vst.msk [vmem:[#allocation4 + $0x10] sm:$0xff] %vm4879_vm4, %v1003_v4 }
 0x1ab   :  { %832 = vst.msk [vmem:[#allocation4 + $0x18] sm:$0xff] %vm828_vm15, %v811_v50  ;;  %v754_v62 = vpop.permute.xlu1 %753 }
 0x1ac   :  { %889 = vst.msk [vmem:[#allocation4 + $0x18] sm:$0xff] %vm4882_vm0, %v868_v51  ;;  %v752_v63 = vpop.permute.xlu0 %751 }
 0x1ad   :  { %932 = vst.msk [vmem:[#allocation4 + $0x18] sm:$0xff] %vm4881_vm1, %v911_v13 }
 0x1ae   :  { %981 = vst.msk [vmem:[#allocation4 + $0x18] sm:$0xff] %vm4880_vm3, %v960_v49  ;;  %v3242_v49 = vmov 0  }
 0x1af   :  { %1026 = vst.msk [vmem:[#allocation4 + $0x18] sm:$0xff] %vm4879_vm4, %v1005_v54  ;;  %v815_v2 = vpop.permute.xlu1 %814  ;;  %1969 = vmatprep.subr.bf16.mxu0 %v3242_v49  ;;  %3158 = vmatprep.subr.bf16.mxu1 %v3242_v49 }
 0x1b0   :  { %v913_v32 = vpop.permute.xlu0 %912  ;;  %1970 = vmatpush1.bf16.msra.mxu0 %v3206_v52  ;;  %3167 = vmatpush1.bf16.msra.mxu1 %v3206_v52 }
 0x1b1   :  { %v1033_v41 = vld [vmem:[#allocation4 + $0x10] sm:$0xff]  ;;  %1971 = vmatprep.subr.bf16.mxu0 %v3242_v49  ;;  %3159 = vmatprep.subr.bf16.mxu1 %v3242_v49 }
 0x1b2   :  { %3124 = vmatprep.mubr.msk.bf16.mxu1 %vm4878_vm5, %v1033_v41 }
 0x1b3   :  { %v872_v3 = vpop.permute.xlu1 %871 }
 0x1b4   :  { %v589_v39 = vpop.permute.xlu0 %588  ;;  %1972 = vmatpush1.bf16.msra.mxu0 %v3207_v10  ;;  %3168 = vmatpush1.bf16.msra.mxu1 %v3207_v10 }
 0x1b5   :  { %609 = vst.msk [vmem:[#allocation4 + $0x20] sm:$0xff] %vm604_vm10, %v589_v39  ;;  %1973 = vmatprep.subr.bf16.mxu0 %v3242_v49  ;;  %3160 = vmatprep.subr.bf16.mxu1 %v3242_v49 }
 0x1b6   :  { %v1034_v16 = vld [vmem:[#allocation4 + $0x18] sm:$0xff] }
 0x1b7   :  { %3125 = vmatmul.mubr.msk.bf16.gmra.mrb[4].mxu1 %vm4878_vm5, %v1034_v16  ;;  %v591_v5 = vpop.permute.xlu1 %590 }
 0x1b8   :  { %610 = vst.msk [vmem:[#allocation4 + $0x28] sm:$0xff] %vm604_vm10, %v591_v5  ;;  %v703_v36 = vpop.permute.xlu0 %702 }
 0x1b9   :  { %723 = vst.msk [vmem:[#allocation4 + $0x20] sm:$0xff] %vm718_vm12, %v703_v36 }
 0x1ba   :  { %772 = vst.msk [vmem:[#allocation4 + $0x20] sm:$0xff] %vm767_vm13, %v752_v63 }
 0x1bb   :  { %v705_v6 = vpop.permute.xlu1 %704 }
 0x1bc   :  { %724 = vst.msk [vmem:[#allocation4 + $0x28] sm:$0xff] %vm718_vm12, %v705_v6  ;;  %v813_v8 = vpop.permute.xlu0 %812 }
 0x1bd   :  { %773 = vst.msk [vmem:[#allocation4 + $0x28] sm:$0xff] %vm767_vm13, %v754_v62 }
 0x1be   :  { %833 = vst.msk [vmem:[#allocation4 + $0x20] sm:$0xff] %vm828_vm15, %v813_v8  ;;  %834 = vst.msk [vmem:[#allocation4 + $0x28] sm:$0xff] %vm828_vm15, %v815_v2 }
 0x1bf   :  { %891 = vst.msk [vmem:[#allocation4 + $0x28] sm:$0xff] %vm4882_vm0, %v872_v3  ;;  %v915_v15 = vpop.permute.xlu1 %914  ;;  %v3208_v3 = vld [vmem:[%s4873_s6 + $0x10] sm:$0xff]  }
 0x1c0   :  { %934 = vst.msk [vmem:[#allocation4 + $0x28] sm:$0xff] %vm4881_vm1, %v915_v15  ;;  %v870_v18 = vpop.permute.xlu0 %869  ;;  %1974 = vmatpush1.bf16.msra.mxu0 %v3208_v3  ;;  %3169 = vmatpush1.bf16.msra.mxu1 %v3208_v3  ;;  %v3209_v15 = vld [vmem:[%s4873_s6 + $0x18] sm:$0xff]  }
 0x1c1   :  { %890 = vst.msk [vmem:[#allocation4 + $0x20] sm:$0xff] %vm4882_vm0, %v870_v18  ;;  %1975 = vmatprep.subr.bf16.mxu0 %v3242_v49  ;;  %3161 = vmatprep.subr.bf16.mxu1 %v3242_v49  ;;  %v1259_v18 = vld [vmem:[#allocation3] sm:$0xff] }
 0x1c2   :  { %933 = vst.msk [vmem:[#allocation4 + $0x20] sm:$0xff] %vm4881_vm1, %v913_v32 }
 0x1c3   :  { %v758_v24 = vpop.permute.xlu1 %757 }
 0x1c4   :  { %v962_v33 = vpop.permute.xlu0 %961  ;;  %1976 = vmatpush1.bf16.msra.mxu0 %v3209_v15  ;;  %3170 = vmatpush1.bf16.msra.mxu1 %v3209_v15 }
 0x1c5   :  { %982 = vst.msk [vmem:[#allocation4 + $0x20] sm:$0xff] %vm4880_vm3, %v962_v33  ;;  %1977 = vmatprep.subr.bf16.mxu0 %v3242_v49  ;;  %3162 = vmatprep.subr.bf16.mxu1 %v3242_v49  ;;  %v1347_v33 = vrot.slane %v1259_v18, 1 }
 0x1c7   :  { %v919_v61 = vpop.permute.xlu1 %918 }
 0x1c8   :  { %v1007_v40 = vpop.permute.xlu0 %1006 }
 0x1c9   :  { %1027 = vst.msk [vmem:[#allocation4 + $0x20] sm:$0xff] %vm4879_vm4, %v1007_v40 }
 0x1cb   :  { %v964_v56 = vpop.permute.xlu1 %963 }
 0x1cc   :  { %983 = vst.msk [vmem:[#allocation4 + $0x28] sm:$0xff] %vm4880_vm3, %v964_v56  ;;  %v756_v19 = vpop.permute.xlu0 %755  ;;  %v1460_v56 = vrot.slane %v1259_v18, 2 }
 0x1cf   :  { %v1009_v20 = vpop.permute.xlu1 %1008 }
 0x1d0   :  { %1028 = vst.msk [vmem:[#allocation4 + $0x28] sm:$0xff] %vm4879_vm4, %v1009_v20  ;;  %v917_v1 = vpop.permute.xlu0 %916  ;;  %v1035_v17 = vld [vmem:[#allocation4 + $0x20] sm:$0xff] }
 0x1d1   :  { %3128 = vmatprep.mubr.msk.bf16.mxu1 %vm4878_vm5, %v1035_v17 }
 0x1d3   :  { %v819_v22 = vpop.permute.xlu1 %818 }
 0x1d4   :  { %v593_v29 = vpop.permute.xlu0 %592 }
 0x1d5   :  { %611 = vst.msk [vmem:[#allocation4 + $0x30] sm:$0xff] %vm604_vm10, %v593_v29 }
 0x1d7   :  { %v876_v48 = vpop.permute.xlu1 %875  ;;  %v1036_v31 = vld [vmem:[#allocation4 + $0x28] sm:$0xff] }
 0x1d8   :  { %v707_v13 = vpop.permute.xlu0 %706  ;;  %3129 = vmatmul.mubr.msk.bf16.gmra.mrb[8].mxu1 %vm4878_vm5, %v1036_v31 }
 0x1d9   :  { %725 = vst.msk [vmem:[#allocation4 + $0x30] sm:$0xff] %vm718_vm12, %v707_v13 }
 0x1da   :  { %774 = vst.msk [vmem:[#allocation4 + $0x30] sm:$0xff] %vm767_vm13, %v756_v19  ;;  %v3210_v19 = vld [vmem:[%s4873_s6 + $0x20] sm:$0xff]  }
 0x1db   :  { %v595_v11 = vpop.permute.xlu1 %594  ;;  %1978 = vmatpush1.bf16.msra.mxu0 %v3210_v19  ;;  %3171 = vmatpush1.bf16.msra.mxu1 %v3210_v19 }
 0x1dc   :  { %612 = vst.msk [vmem:[#allocation4 + $0x38] sm:$0xff] %vm604_vm10, %v595_v11  ;;  %v817_v42 = vpop.permute.xlu0 %816  ;;  %1979 = vmatprep.subr.bf16.mxu0 %v3242_v49  ;;  %3163 = vmatprep.subr.bf16.mxu1 %v3242_v49 }
 0x1dd   :  { %835 = vst.msk [vmem:[#allocation4 + $0x30] sm:$0xff] %vm828_vm15, %v817_v42 }
 0x1df   :  { %v709_v44 = vpop.permute.xlu1 %708 }
 0x1e0   :  { %726 = vst.msk [vmem:[#allocation4 + $0x38] sm:$0xff] %vm718_vm12, %v709_v44  ;;  %v874_v30 = vpop.permute.xlu0 %873 }
 0x1e1   :  { %775 = vst.msk [vmem:[#allocation4 + $0x38] sm:$0xff] %vm767_vm13, %v758_v24  ;;  %v1260_v24 = vld [vmem:[#allocation3 + $0x8] sm:$0x3] }
 0x1e2   :  { %892 = vst.msk [vmem:[#allocation4 + $0x30] sm:$0xff] %vm4882_vm0, %v874_v30  ;;  %v1461_v17 = vrot.slane %v1260_v24, 2 }
 0x1e3   :  { %836 = vst.msk [vmem:[#allocation4 + $0x38] sm:$0xff] %vm828_vm15, %v819_v22  ;;  %v968_v21 = vpop.permute.xlu1 %967 }
 0x1e4   :  { %935 = vst.msk [vmem:[#allocation4 + $0x30] sm:$0xff] %vm4881_vm1, %v917_v1  ;;  %v966_v47 = vpop.permute.xlu0 %965 }
 0x1e5   :  { %893 = vst.msk [vmem:[#allocation4 + $0x38] sm:$0xff] %vm4882_vm0, %v876_v48  ;;  %vm1823_vm0 = vcmask 1048448  }
 0x1e6   :  { %936 = vst.msk [vmem:[#allocation4 + $0x38] sm:$0xff] %vm4881_vm1, %v919_v61  ;;  %v1348_v61 = vrot.slane %v1260_v24, 1  ;;  %vm1774_vm1 = vcmask 917248  }
 0x1e7   :  { %985 = vst.msk [vmem:[#allocation4 + $0x38] sm:$0xff] %vm4880_vm3, %v968_v21  ;;  %984 = vst.msk [vmem:[#allocation4 + $0x30] sm:$0xff] %vm4880_vm3, %v966_v47  ;;  %v1013_v50 = vpop.permute.xlu1 %1012  ;;  %vm1731_vm3 = vcmask 786048  }
 0x1e8   :  { %1030 = vst.msk [vmem:[#allocation4 + $0x38] sm:$0xff] %vm4879_vm4, %v1013_v50  ;;  %v1011_v45 = vpop.permute.xlu0 %1010  ;;  %v1349_v21 = vsel %vm499_vm14, %v1347_v33, %v1348_v61  ;;  %v3212_v33 = vld [vmem:[%s4873_s6 + $0x30] sm:$0xff]  }
 0x1e9   :  { %1029 = vst.msk [vmem:[#allocation4 + $0x30] sm:$0xff] %vm4879_vm4, %v1011_v45 }
 0x1ef   :  { %v1038_v26 = vld [vmem:[#allocation4 + $0x38] sm:$0xff] }
 0x1f0   :  { %v1037_v51 = vld [vmem:[#allocation4 + $0x30] sm:$0xff] }
 0x1f1   :  { %3132 = vmatprep.mubr.msk.bf16.mxu1 %vm4878_vm5, %v1037_v51 }
 0x1f2   :  { %3133 = vmatmul.mubr.msk.bf16.gmra.mrb[12].mxu1 %vm4878_vm5, %v1038_v26 }
 0x26b   :  { %v3122_v54 = vpop.f32.mrb[0].mxu1 }
 0x26c   :  { %v1138_v55 = vadd.f32 %v3122_v54, %v3971_v0  ;;  %v1129_v37 = vpop.f32.mrb[1].mxu1  ;;  %v3211_v54 = vld [vmem:[%s4873_s6 + $0x28] sm:$0xff]  }
 0x26d   :  { %v1130_v57 = vadd.f32 %v3971_v0, %v1129_v37  ;;  %v3123_v4 = vpop.f32.mrb[2].mxu1  ;;  %1980 = vmatpush1.bf16.msra.mxu0 %v3211_v54  ;;  %3172 = vmatpush1.bf16.msra.mxu1 %v3211_v54 }
 0x26e   :  { %vm1194_vm6 = vcmp.ge.f32.partialorder %v1138_v55, 0.0  ;;  %v1211_v62 = vmul.f32 %v3978_v34, %v1138_v55  ;;  %v1141_v63 = vadd.f32 %v3123_v4, %v3971_v0  ;;  %v1132_v2 = vpop.f32.mrb[3].mxu1  ;;  %1981 = vmatprep.subr.bf16.mxu0 %v3242_v49  ;;  %3164 = vmatprep.subr.bf16.mxu1 %v3242_v49 }
 0x26f   :  { %vm1192_vm7 = vcmp.ge.f32.partialorder %v1130_v57, 0.0  ;;  %v1209_v32 = vmul.f32 %v3978_v34, %v1130_v57  ;;  %v1133_v41 = vadd.f32 %v3971_v0, %v1132_v2 }
 0x270   :  { %v3991_v39 = vsel %vm1194_vm6, %v1138_v55, %v1211_v62  ;;  %vm1195_vm5 = vcmp.ge.f32.partialorder %v1141_v63, 0.0  ;;  %v1212_v16 = vmul.f32 %v3978_v34, %v1141_v63 }
 0x271   :  { %1244 = vst.msk [vmem:[#allocation3 + $0x31] sm:$0xff] %vm101_vm11, %v3991_v39  ;;  %v3996_v5 = vsel %vm1192_vm7, %v1130_v57, %v1209_v32  ;;  %vm1193_vm4 = vcmp.ge.f32.partialorder %v1133_v41, 0.0  ;;  %v1210_v36 = vmul.f32 %v3978_v34, %v1133_v41  ;;  %1982 = vmatpush1.bf16.msra.mxu0 %v3212_v33  ;;  %3173 = vmatpush1.bf16.msra.mxu1 %v3212_v33 }
 0x272   :  { %1242 = vst.msk [vmem:[#allocation3 + $0x11] sm:$0xff] %vm101_vm11, %v3996_v5  ;;  %v4001_v6 = vsel %vm1195_vm5, %v1141_v63, %v1212_v16  ;;  %v1462_v63 = vsel %vm613_vm9, %v1460_v56, %v1461_v17  ;;  %1983 = vmatprep.subr.bf16.mxu0 %v3242_v49  ;;  %v3213_v17 = vld [vmem:[%s4873_s6 + $0x38] sm:$0xff]   ;;  %3165 = vmatprep.subr.bf16.mxu1 %v3242_v49 }
 0x273   :  { %1245 = vst.msk [vmem:[#allocation3 + $0x41] sm:$0xff] %vm101_vm11, %v4001_v6  ;;  %v4007_v8 = vsel %vm1193_vm4, %v1133_v41, %v1210_v36 }
 0x274   :  { %1243 = vst.msk [vmem:[#allocation3 + $0x21] sm:$0xff] %vm101_vm11, %v4007_v8 }
 0x275   :  { %1984 = vmatpush1.bf16.msra.mxu0 %v3213_v17  ;;  %3174 = vmatpush1.bf16.msra.mxu1 %v3213_v17 }
 0x276   :  { %1985 = vmatprep.subr.bf16.mxu0 %v3242_v49  ;;  %3166 = vmatprep.subr.bf16.mxu1 %v3242_v49 }
 0x278   :  { %v1265_v40 = vld [vmem:[#allocation3 + $0x30] sm:$0xff]  ;;  %v1266_v22 = vld [vmem:[#allocation3 + $0x38] sm:$0x3] }
 0x279   :  { %v1261_v20 = vld [vmem:[#allocation3 + $0x10] sm:$0xff]  ;;  %v1262_v1 = vld [vmem:[#allocation3 + $0x18] sm:$0x3]  ;;  %v1469_v48 = vrot.slane %v1265_v40, 2  ;;  %v1470_v4 = vrot.slane %v1266_v22, 2  ;;  %v1356_v32 = vrot.slane %v1265_v40, 1 }
 0x27a   :  { %v4019_v29 = vld [vmem:[#allocation3 + $0x40] sm:$0xff]  ;;  %v1350_v31 = vrot.slane %v1261_v20, 1  ;;  %v1351_v13 = vrot.slane %v1262_v1, 1  ;;  %v1463_v11 = vrot.slane %v1261_v20, 2  ;;  %v1464_v47 = vrot.slane %v1262_v1, 2 }
 0x27b   :  { %v1574_v42 = vpack.c.bf16 %v4019_v29, %v1265_v40  ;;  %v1263_v44 = vld [vmem:[#allocation3 + $0x20] sm:$0xff]  ;;  %v1264_v30 = vld [vmem:[#allocation3 + $0x28] sm:$0x3]  ;;  %v1299_v45 = vpack.c.bf16 %v1261_v20, %v1259_v18  ;;  %v1359_v37 = vrot.slane %v4019_v29, 1  ;;  %v1357_v41 = vrot.slane %v1266_v22, 1 }
 0x27c   :  { %v1268_v50 = vld [vmem:[#allocation3 + $0x48] sm:$0x3]  ;;  %v1466_v51 = vrot.slane %v1263_v44, 2  ;;  %v1467_v26 = vrot.slane %v1264_v30, 2  ;;  %v1573_v52 = vpack.c.bf16 %v1263_v44, %v1261_v20  ;;  %v1300_v10 = vpack.c.bf16 %v1265_v40, %v1263_v44 }
 0x27d   :  { %1591 = vrot.lane.b32.xlu1 %v1574_v42, %s3243_s23  ;;  %v4030_v55 = vsel %vm499_vm14, %v1350_v31, %v1351_v13  ;;  %v1360_v57 = vrot.slane %v1268_v50, 1  ;;  %1307 = vst.msk [vmem:[#allocation5] sm:$0xff] %vm101_vm11, %v1299_v45  ;;  %v1465_v2 = vsel %vm613_vm9, %v1463_v11, %v1464_v47  ;;  %v1471_v3 = vsel %vm613_vm9, %v1469_v48, %v1470_v4  ;;  %v3214_v13 = vld [vmem:[%s4873_s6 + $0x40] sm:$0xff]   ;;  %s3247_s6 = smov 112  }
 0x27e   :  { %v1468_v62 = vsel %vm613_vm9, %v1466_v51, %v1467_v26  ;;  %1589 = vrot.lane.b32.xlu0 %v1573_v52, %s3243_s23  ;;  %1308 = vst.msk [vmem:[#allocation5 + $0x10] sm:$0xff] %vm101_vm11, %v1300_v10  ;;  %v1411_v16 = vpack.c.bf16 %v4030_v55, %v1349_v21  ;;  %v1472_v15 = vrot.slane %v4019_v29, 2  ;;  %v1473_v18 = vrot.slane %v1268_v50, 2  ;;  %1986 = vmatpush1.bf16.msra.mxu0 %v3214_v13 }
 0x27f   :  { %v4042_v36 = vpack.c.bf16 %v1471_v3, %v1468_v62  ;;  %v4048_v24 = vsel %vm499_vm14, %v1359_v37, %v1360_v57  ;;  %v1524_v61 = vpack.c.bf16 %v1465_v2, %v1462_v63  ;;  %v1358_v40 = vsel %vm499_vm14, %v1356_v32, %v1357_v41  ;;  %3175 = vmatpush1.bf16.msra.mxu1 %v3214_v13  ;;  %v4108_v63 = vld [vmem:[#allocation3 + $0x90] sm:$0xff] }
 0x280   :  { %v1635_v56 = vpack.c.bf16 %v4048_v24, %v1358_v40  ;;  %v4059_v19 = vsel %vm613_vm9, %v1472_v15, %v1473_v18  ;;  %v1353_v20 = vrot.slane %v1263_v44, 1  ;;  %v1354_v1 = vrot.slane %v1264_v30, 1 }
 0x281   :  { %1750 = vrot.lane.b32.xlu1 %v1300_v10, %s3244_s25  ;;  %1842 = vst.msk [vmem:[#allocation5 + $0x8] sm:$0xff] %vm101_vm11, %v4042_v36  ;;  %v1692_v22 = vpack.c.bf16 %v4059_v19, %v1471_v3  ;;  %v1691_v48 = vpack.c.bf16 %v1468_v62, %v1465_v2  ;;  %v4110_v2 = vld [vmem:[#allocation3 + $0x98] sm:$0x3]  ;;  %v1832_v32 = vrot.slane %v4108_v63, 2 }
 0x282   :  { %1427 = vrot.lane.b32.xlu0 %v1411_v16, %s3237_s18  ;;  %v1355_v31 = vsel %vm499_vm14, %v1353_v20, %v1354_v1  ;;  %v1833_v41 = vrot.slane %v4110_v2, 2 }
 0x283   :  { %v1634_v50 = vpack.c.bf16 %v1355_v31, %v4030_v55  ;;  %v1412_v26 = vpack.c.bf16 %v1358_v40, %v1355_v31 }
 0x284   :  { %v1834_v31 = vsel %vm613_vm9, %v1832_v32, %v1833_v41 }
 0x285   :  { %1540 = vrot.lane.b32.xlu1 %v1524_v61, %s3241_s2 }
 0x286   :  { %1652 = vrot.lane.b32.xlu0 %v1635_v56, %s3245_s29 }
 0x288   :  { %v1851_v42 = vld [vmem:[#allocation5 + $0x8] sm:$0xff] }
 0x289   :  { %1709 = vrot.lane.b32.xlu1 %v1692_v22, %s3246_s12  ;;  %3044 = vmatprep.mubr.msk.bf16.mxu0 %vm101_vm11, %v1851_v42 }
 0x28a   :  { %v3126_v11 = vpop.f32.mrb[4].mxu1  ;;  %1707 = vrot.lane.b32.xlu0 %v1691_v48, %s3246_s12 }
 0x28b   :  { %v1154_v44 = vadd.f32 %v3126_v11, %v3971_v0  ;;  %v1145_v30 = vpop.f32.mrb[5].mxu1 }
 0x28c   :  { %v1146_v21 = vadd.f32 %v3971_v0, %v1145_v30  ;;  %v3127_v47 = vpop.f32.mrb[6].mxu1 }
 0x28d   :  { %vm1198_vm4 = vcmp.ge.f32.partialorder %v1154_v44, 0.0  ;;  %v1215_v49 = vmul.f32 %v3978_v34, %v1154_v44  ;;  %v1157_v45 = vadd.f32 %v3127_v47, %v3971_v0  ;;  %v1148_v51 = vpop.f32.mrb[7].mxu1  ;;  %1650 = vrot.lane.b32.xlu1 %v1634_v50, %s3245_s29 }
 0x28e   :  { %vm1196_vm5 = vcmp.ge.f32.partialorder %v1146_v21, 0.0  ;;  %v1213_v52 = vmul.f32 %v3978_v34, %v1146_v21  ;;  %v1149_v10 = vadd.f32 %v3971_v0, %v1148_v51  ;;  %1799 = vrot.lane.b32.xlu0 %v1412_v26, %s3247_s6 }
 0x28f   :  { %v4086_v54 = vsel %vm1198_vm4, %v1154_v44, %v1215_v49  ;;  %vm1199_vm6 = vcmp.ge.f32.partialorder %v1157_v45, 0.0  ;;  %v1216_v55 = vmul.f32 %v3978_v34, %v1157_v45 }
 0x290   :  { %1248 = vst.msk [vmem:[#allocation3 + $0x71] sm:$0xff] %vm101_vm11, %v4086_v54  ;;  %v4092_v37 = vsel %vm1196_vm5, %v1146_v21, %v1213_v52  ;;  %vm1197_vm7 = vcmp.ge.f32.partialorder %v1149_v10, 0.0  ;;  %v1214_v57 = vmul.f32 %v3978_v34, %v1149_v10 }
 0x291   :  { %1246 = vst.msk [vmem:[#allocation3 + $0x51] sm:$0xff] %vm101_vm11, %v4092_v37  ;;  %v4097_v4 = vsel %vm1199_vm6, %v1157_v45, %v1216_v55  ;;  %1429 = vrot.lane.b32.xlu1 %v1412_v26, %s3237_s18 }
 0x292   :  { %1249 = vst.msk [vmem:[#allocation3 + $0x81] sm:$0xff] %vm101_vm11, %v4097_v4  ;;  %v4101_v62 = vsel %vm1197_vm7, %v1149_v10, %v1214_v57  ;;  %1542 = vrot.lane.b32.xlu0 %v4042_v36, %s3241_s2 }
 0x293   :  { %1247 = vst.msk [vmem:[#allocation3 + $0x61] sm:$0xff] %vm101_vm11, %v4101_v62 }
 0x297   :  { %v1273_v18 = vld [vmem:[#allocation3 + $0x70] sm:$0xff]  ;;  %v1274_v40 = vld [vmem:[#allocation3 + $0x78] sm:$0x3] }
 0x298   :  { %v1269_v3 = vld [vmem:[#allocation3 + $0x50] sm:$0xff]  ;;  %v1270_v16 = vld [vmem:[#allocation3 + $0x58] sm:$0x3]  ;;  %v1481_v42 = vrot.slane %v1273_v18, 2  ;;  %v1482_v44 = vrot.slane %v1274_v40, 2 }
 0x299   :  { %v1301_v15 = vpack.c.bf16 %v1269_v3, %v4019_v29  ;;  %v1275_v33 = vld [vmem:[#allocation3 + $0x80] sm:$0xff]  ;;  %v1475_v61 = vrot.slane %v1269_v3, 2  ;;  %v1476_v1 = vrot.slane %v1270_v16, 2  ;;  %v1276_v36 = vld [vmem:[#allocation3 + $0x88] sm:$0x3]  ;;  %v1362_v22 = vrot.slane %v1269_v3, 1 }
 0x29a   :  { %v1576_v56 = vpack.c.bf16 %v1275_v33, %v1273_v18  ;;  %v1271_v20 = vld [vmem:[#allocation3 + $0x60] sm:$0xff]  ;;  %v1363_v48 = vrot.slane %v1270_v16, 1  ;;  %v1272_v13 = vld [vmem:[#allocation3 + $0x68] sm:$0x3]  ;;  %v1740_v29 = vpack.c.bf16 %v4108_v63, %v1275_v33  ;;  %v1683_v21 = vrot.slane %v1275_v33, 2 }
 0x29b   :  { %1752 = vrot.lane.b32.xlu0 %v1301_v15, %s3244_s25  ;;  %1309 = vst.msk [vmem:[#allocation5 + $0x20] sm:$0xff] %vm101_vm11, %v1301_v15  ;;  %v1302_v17 = vpack.c.bf16 %v1273_v18, %v1271_v20  ;;  %v1477_v11 = vsel %vm613_vm9, %v1475_v61, %v1476_v1  ;;  %v1684_v47 = vrot.slane %v1276_v36, 2  ;;  %v1478_v50 = vrot.slane %v1271_v20, 2 }
 0x29c   :  { %1595 = vrot.lane.b32.xlu1 %v1576_v56, %s3243_s23  ;;  %v1526_v30 = vpack.c.bf16 %v1477_v11, %v4059_v19  ;;  %v1479_v49 = vrot.slane %v1272_v13, 2  ;;  %v4125_v45 = vsel %vm499_vm14, %v1362_v22, %v1363_v48  ;;  %v1483_v26 = vsel %vm613_vm9, %v1481_v42, %v1482_v44 }
 0x29d   :  { %1310 = vst.msk [vmem:[#allocation5 + $0x30] sm:$0xff] %vm101_vm11, %v1302_v17  ;;  %v1685_v51 = vsel %vm613_vm9, %v1683_v21, %v1684_v47  ;;  %v1575_v10 = vpack.c.bf16 %v1271_v20, %v1269_v3  ;;  %v1413_v57 = vpack.c.bf16 %v4125_v45, %v4048_v24  ;;  %v1626_v32 = vrot.slane %v1275_v33, 1 }
 0x29e   :  { %1843 = vst.msk [vmem:[#allocation5 + $0x18] sm:$0xff] %vm101_vm11, %v1526_v30  ;;  %v1840_v52 = vpack.c.bf16 %v1834_v31, %v1685_v51  ;;  %v1480_v19 = vsel %vm613_vm9, %v1478_v50, %v1479_v49  ;;  %v1627_v41 = vrot.slane %v1276_v36, 1  ;;  %v1368_v16 = vrot.slane %v1273_v18, 1 }
 0x29f   :  { %1756 = vrot.lane.b32.xlu0 %v1740_v29, %s3244_s25  ;;  %v1527_v55 = vpack.c.bf16 %v1483_v26, %v1480_v19  ;;  %v1369_v15 = vrot.slane %v1274_v40, 1  ;;  %v1787_v3 = vrot.slane %v4108_v63, 1  ;;  %v1788_v24 = vrot.slane %v4110_v2, 1 }
 0x2a0   :  { %1754 = vrot.lane.b32.xlu1 %v1302_v17, %s3244_s25  ;;  %1845 = vst.msk [vmem:[#allocation5 + $0x38] sm:$0xff] %vm101_vm11, %v1840_v52  ;;  %v1628_v61 = vsel %vm499_vm14, %v1626_v32, %v1627_v41  ;;  %v1694_v1 = vpack.c.bf16 %v1685_v51, %v1483_v26  ;;  %v1365_v36 = vrot.slane %v1271_v20, 1  ;;  %v1366_v17 = vrot.slane %v1272_v13, 1 }
 0x2a1   :  { %1844 = vst.msk [vmem:[#allocation5 + $0x28] sm:$0xff] %vm101_vm11, %v1527_v55  ;;  %v1370_v33 = vsel %vm499_vm14, %v1368_v16, %v1369_v15  ;;  %v1789_v18 = vsel %vm499_vm14, %v1787_v3, %v1788_v24  ;;  %v1693_v48 = vpack.c.bf16 %v1480_v19, %v1477_v11 }
 0x2a2   :  { %v1637_v56 = vpack.c.bf16 %v1628_v61, %v1370_v33  ;;  %v1795_v29 = vpack.c.bf16 %v1789_v18, %v1628_v61  ;;  %v1367_v42 = vsel %vm499_vm14, %v1365_v36, %v1366_v17 }
 0x2a3   :  { %1593 = vrot.lane.b32.xlu0 %v1575_v10, %s3243_s23  ;;  %v1414_v50 = vpack.c.bf16 %v1370_v33, %v1367_v42  ;;  %v1636_v26 = vpack.c.bf16 %v1367_v42, %v4125_v45  ;;  %v1279_v45 = vld [vmem:[#allocation3 + $0xa0] sm:$0xff]  ;;  %v1280_v10 = vld [vmem:[#allocation3 + $0xa8] sm:$0x3] }
 0x2a4   :  { %1801 = vrot.lane.b32.xlu1 %v1413_v57, %s3247_s6  ;;  %v1371_v41 = vrot.slane %v1279_v45, 1  ;;  %v1372_v16 = vrot.slane %v1280_v10, 1  ;;  %v1484_v33 = vrot.slane %v1279_v45, 2 }
 0x2a7   :  { %1431 = vrot.lane.b32.xlu0 %v1413_v57, %s3237_s18 }
 0x2a8   :  { %1544 = vrot.lane.b32.xlu1 %v1526_v30, %s3241_s2 }
 0x2ab   :  { %1656 = vrot.lane.b32.xlu0 %v1637_v56, %s3245_s29  ;;  %v3130_v40 = vpop.f32.mrb[8].mxu1  ;;  %v1485_v56 = vrot.slane %v1280_v10, 2 }
 0x2ac   :  { %1713 = vrot.lane.b32.xlu1 %v1694_v1, %s3246_s12  ;;  %v1170_v63 = vadd.f32 %v3130_v40, %v3971_v0  ;;  %v1161_v22 = vpop.f32.mrb[9].mxu1 }
 0x2ad   :  { %v1162_v2 = vadd.f32 %v3971_v0, %v1161_v22  ;;  %v3131_v31 = vpop.f32.mrb[10].mxu1 }
 0x2ae   :  { %vm1202_vm4 = vcmp.ge.f32.partialorder %v1170_v63, 0.0  ;;  %v1219_v20 = vmul.f32 %v3978_v34, %v1170_v63  ;;  %v1173_v13 = vadd.f32 %v3131_v31, %v3971_v0  ;;  %v1164_v44 = vpop.f32.mrb[11].mxu1 }
 0x2af   :  { %1711 = vrot.lane.b32.xlu0 %v1693_v48, %s3246_s12  ;;  %vm1200_vm5 = vcmp.ge.f32.partialorder %v1162_v2, 0.0  ;;  %v1217_v30 = vmul.f32 %v3978_v34, %v1162_v2  ;;  %v1165_v21 = vadd.f32 %v3971_v0, %v1164_v44 }
 0x2b0   :  { %1805 = vrot.lane.b32.xlu1 %v1795_v29, %s3247_s6  ;;  %v4156_v11 = vsel %vm1202_vm4, %v1170_v63, %v1219_v20  ;;  %vm1203_vm6 = vcmp.ge.f32.partialorder %v1173_v13, 0.0  ;;  %v1220_v47 = vmul.f32 %v3978_v34, %v1173_v13  ;;  %v1373_v29 = vsel %vm499_vm14, %v1371_v41, %v1372_v16 }
 0x2b1   :  { %1252 = vst.msk [vmem:[#allocation3 + $0xd1] sm:$0xff] %vm101_vm11, %v4156_v11  ;;  %v4161_v49 = vsel %vm1200_vm5, %v1162_v2, %v1217_v30  ;;  %vm1201_vm7 = vcmp.ge.f32.partialorder %v1165_v21, 0.0  ;;  %v1218_v51 = vmul.f32 %v3978_v34, %v1165_v21 }
 0x2b2   :  { %1250 = vst.msk [vmem:[#allocation3 + $0xb1] sm:$0xff] %vm101_vm11, %v4161_v49  ;;  %v4167_v52 = vsel %vm1203_vm6, %v1173_v13, %v1220_v47  ;;  %v1486_v13 = vsel %vm613_vm9, %v1484_v33, %v1485_v56 }
 0x2b3   :  { %1803 = vrot.lane.b32.xlu0 %v1414_v50, %s3247_s6  ;;  %1253 = vst.msk [vmem:[#allocation3 + $0xe1] sm:$0xff] %vm101_vm11, %v4167_v52  ;;  %v4172_v19 = vsel %vm1201_vm7, %v1165_v21, %v1218_v51 }
 0x2b4   :  { %1654 = vrot.lane.b32.xlu1 %v1636_v26, %s3245_s29  ;;  %1251 = vst.msk [vmem:[#allocation3 + $0xc1] sm:$0xff] %vm101_vm11, %v4172_v19 }
 0x2b7   :  { %1546 = vrot.lane.b32.xlu0 %v1527_v55, %s3241_s2 }
 0x2b8   :  { %1433 = vrot.lane.b32.xlu1 %v1414_v50, %s3237_s18  ;;  %v1285_v15 = vld [vmem:[#allocation3 + $0xd0] sm:$0xff]  ;;  %v1286_v2 = vld [vmem:[#allocation3 + $0xd8] sm:$0x3] }
 0x2b9   :  { %v1281_v57 = vld [vmem:[#allocation3 + $0xb0] sm:$0xff]  ;;  %v1282_v32 = vld [vmem:[#allocation3 + $0xb8] sm:$0x3]  ;;  %v1493_v31 = vrot.slane %v1285_v15, 2  ;;  %v1380_v50 = vrot.slane %v1285_v15, 1  ;;  %v1381_v51 = vrot.slane %v1286_v2, 1 }
 0x2ba   :  { %v4179_v61 = vld [vmem:[#allocation3 + $0xe0] sm:$0xff]  ;;  %v1374_v3 = vrot.slane %v1281_v57, 1  ;;  %v1375_v24 = vrot.slane %v1282_v32, 1  ;;  %v1288_v55 = vld [vmem:[#allocation3 + $0xe8] sm:$0x3]  ;;  %v1303_v18 = vpack.c.bf16 %v1281_v57, %v1279_v45  ;;  %v1487_v22 = vrot.slane %v1281_v57, 2 }
 0x2bb   :  { %v1578_v1 = vpack.c.bf16 %v4179_v61, %v1285_v15  ;;  %v1283_v36 = vld [vmem:[#allocation3 + $0xc0] sm:$0xff]  ;;  %v1284_v17 = vld [vmem:[#allocation3 + $0xc8] sm:$0x3]  ;;  %v1488_v48 = vrot.slane %v1282_v32, 2  ;;  %v1383_v30 = vrot.slane %v4179_v61, 1  ;;  %v1384_v21 = vrot.slane %v1288_v55, 1 }
 0x2bc   :  { %v1577_v40 = vpack.c.bf16 %v1283_v36, %v1281_v57  ;;  %v1304_v63 = vpack.c.bf16 %v1285_v15, %v1283_v36  ;;  %v1376_v42 = vsel %vm499_vm14, %v1374_v3, %v1375_v24  ;;  %v1490_v20 = vrot.slane %v1283_v36, 2  ;;  %1311 = vst.msk [vmem:[#allocation5 + $0x40] sm:$0xff] %vm101_vm11, %v1303_v18 }
 0x2bd   :  { %1599 = vrot.lane.b32.xlu1 %v1578_v1, %s3243_s23  ;;  %v1491_v44 = vrot.slane %v1284_v17, 2  ;;  %v1496_v47 = vrot.slane %v4179_v61, 2  ;;  %v1494_v26 = vrot.slane %v1286_v2, 2  ;;  %v1415_v45 = vpack.c.bf16 %v1376_v42, %v1373_v29 }
 0x2be   :  { %1597 = vrot.lane.b32.xlu0 %v1577_v40, %s3243_s23  ;;  %1312 = vst.msk [vmem:[#allocation5 + $0x50] sm:$0xff] %vm101_vm11, %v1304_v63  ;;  %v1489_v10 = vsel %vm613_vm9, %v1487_v22, %v1488_v48  ;;  %v1497_v32 = vrot.slane %v1288_v55, 2  ;;  %v4195_v41 = vsel %vm499_vm14, %v1383_v30, %v1384_v21  ;;  %v1377_v24 = vrot.slane %v1283_v36, 1 }
 0x2bf   :  { %v1492_v57 = vsel %vm613_vm9, %v1490_v20, %v1491_v44  ;;  %v1495_v16 = vsel %vm613_vm9, %v1493_v31, %v1494_v26  ;;  %v1378_v15 = vrot.slane %v1284_v17, 1  ;;  %v1528_v33 = vpack.c.bf16 %v1489_v10, %v1486_v13 }
 0x2c0   :  { %v1529_v3 = vpack.c.bf16 %v1495_v16, %v1492_v57  ;;  %v1382_v56 = vsel %vm499_vm14, %v1380_v50, %v1381_v51  ;;  %v4202_v18 = vsel %vm613_vm9, %v1496_v47, %v1497_v32  ;;  %v1695_v31 = vpack.c.bf16 %v1492_v57, %v1489_v10 }
 0x2c1   :  { %1758 = vrot.lane.b32.xlu1 %v1304_v63, %s3244_s25  ;;  %v1639_v1 = vpack.c.bf16 %v4195_v41, %v1382_v56  ;;  %v1379_v36 = vsel %vm499_vm14, %v1377_v24, %v1378_v15  ;;  %v1696_v48 = vpack.c.bf16 %v4202_v18, %v1495_v16 }
 0x2c2   :  { %1435 = vrot.lane.b32.xlu0 %v1415_v45, %s3237_s18  ;;  %1846 = vst.msk [vmem:[#allocation5 + $0x48] sm:$0xff] %vm101_vm11, %v1529_v3  ;;  %v1638_v47 = vpack.c.bf16 %v1379_v36, %v1376_v42  ;;  %v4237_v42 = vld [vmem:[#allocation3 + $0x130] sm:$0xff] }
 0x2c3   :  { %v1835_v10 = vrot.slane %v4237_v42, 2 }
 0x2c5   :  { %v3134_v55 = vpop.f32.mrb[12].mxu1  ;;  %1548 = vrot.lane.b32.xlu1 %v1528_v33, %s3241_s2 }
 0x2c6   :  { %v1186_v40 = vadd.f32 %v3134_v55, %v3971_v0  ;;  %v1177_v63 = vpop.f32.mrb[13].mxu1  ;;  %1660 = vrot.lane.b32.xlu0 %v1639_v1, %s3245_s29 }
 0x2c7   :  { %v1178_v17 = vadd.f32 %v3971_v0, %v1177_v63  ;;  %v3135_v22 = vpop.f32.mrb[14].mxu1 }
 0x2c8   :  { %vm1206_vm4 = vcmp.ge.f32.partialorder %v1186_v40, 0.0  ;;  %v1223_v2 = vmul.f32 %v3978_v34, %v1186_v40  ;;  %v1189_v29 = vadd.f32 %v3135_v22, %v3971_v0  ;;  %v1180_v20 = vpop.f32.mrb[15].mxu1 }
 0x2c9   :  { %vm1204_vm5 = vcmp.ge.f32.partialorder %v1178_v17, 0.0  ;;  %v1221_v13 = vmul.f32 %v3978_v34, %v1178_v17  ;;  %v1181_v44 = vadd.f32 %v3971_v0, %v1180_v20  ;;  %1717 = vrot.lane.b32.xlu1 %v1696_v48, %s3246_s12  ;;  %v1416_v0 = vpack.c.bf16 %v1382_v56, %v1379_v36 }
 0x2ca   :  { %v4216_v30 = vsel %vm1206_vm4, %v1186_v40, %v1223_v2  ;;  %vm1207_vm6 = vcmp.ge.f32.partialorder %v1189_v29, 0.0  ;;  %v1224_v21 = vmul.f32 %v3978_v34, %v1189_v29  ;;  %1715 = vrot.lane.b32.xlu0 %v1695_v31, %s3246_s12  ;;  %vm1451_vm4 = vcmask 261248  }
 0x2cb   :  { %1256 = vst.msk [vmem:[#allocation3 + $0x111] sm:$0xff] %vm101_vm11, %v4216_v30  ;;  %v4222_v50 = vsel %vm1204_vm5, %v1178_v17, %v1221_v13  ;;  %vm1205_vm7 = vcmp.ge.f32.partialorder %v1181_v44, 0.0  ;;  %v1222_v51 = vmul.f32 %v3978_v34, %v1181_v44  ;;  %v4239_v34 = vld [vmem:[#allocation3 + $0x138] sm:$0x3]  ;;  %vm1564_vm5 = vcmask 392448  }
 0x2cc   :  { %1254 = vst.msk [vmem:[#allocation3 + $0xf1] sm:$0xff] %vm101_vm11, %v4222_v50  ;;  %v4227_v26 = vsel %vm1207_vm6, %v1189_v29, %v1224_v21  ;;  %v1836_v57 = vrot.slane %v4239_v34, 2  ;;  %vm1613_vm6 = vcmask 523648  }
 0x2cd   :  { %1257 = vst.msk [vmem:[#allocation3 + $0x121] sm:$0xff] %vm101_vm11, %v4227_v26  ;;  %v4231_v45 = vsel %vm1205_vm7, %v1181_v44, %v1222_v51  ;;  %1658 = vrot.lane.b32.xlu1 %v1638_v47, %s3245_s29  ;;  %vm1674_vm7 = vcmask 654848  }
 0x2ce   :  { %1255 = vst.msk [vmem:[#allocation3 + $0x101] sm:$0xff] %vm101_vm11, %v4231_v45  ;;  %1807 = vrot.lane.b32.xlu0 %v1416_v0, %s3247_s6  ;;  %v1837_v17 = vsel %vm613_vm9, %v1835_v10, %v1836_v57 }
 0x2d1   :  { %1437 = vrot.lane.b32.xlu1 %v1416_v0, %s3237_s18 }
 0x2d2   :  { %1550 = vrot.lane.b32.xlu0 %v1529_v3, %s3241_s2  ;;  %v1293_v56 = vld [vmem:[#allocation3 + $0x110] sm:$0xff]  ;;  %v1294_v22 = vld [vmem:[#allocation3 + $0x118] sm:$0x3] }
 0x2d3   :  { %v1289_v32 = vld [vmem:[#allocation3 + $0xf0] sm:$0xff]  ;;  %v1290_v16 = vld [vmem:[#allocation3 + $0xf8] sm:$0x3]  ;;  %v1505_v13 = vrot.slane %v1293_v56, 2  ;;  %v1506_v51 = vrot.slane %v1294_v22, 2 }
 0x2d4   :  { %v1386_v24 = vrot.slane %v1289_v32, 1  ;;  %v1387_v15 = vrot.slane %v1290_v16, 1  ;;  %v1305_v33 = vpack.c.bf16 %v1289_v32, %v4179_v61  ;;  %v4246_v1 = vld [vmem:[#allocation3 + $0x120] sm:$0xff]  ;;  %v1296_v55 = vld [vmem:[#allocation3 + $0x128] sm:$0x3]  ;;  %v1499_v48 = vrot.slane %v1289_v32, 2 }
 0x2d5   :  { %v1291_v40 = vld [vmem:[#allocation3 + $0x100] sm:$0xff]  ;;  %v1686_v63 = vrot.slane %v4246_v1, 2  ;;  %v1687_v36 = vrot.slane %v1296_v55, 2  ;;  %v1292_v31 = vld [vmem:[#allocation3 + $0x108] sm:$0x3]  ;;  %v1580_v61 = vpack.c.bf16 %v4246_v1, %v1293_v56  ;;  %v1500_v20 = vrot.slane %v1290_v16, 2 }
 0x2d6   :  { %1760 = vrot.lane.b32.xlu0 %v1305_v33, %s3244_s25  ;;  %1313 = vst.msk [vmem:[#allocation5 + $0x60] sm:$0xff] %vm101_vm11, %v1305_v33  ;;  %v1579_v3 = vpack.c.bf16 %v1291_v40, %v1289_v32  ;;  %v1306_v2 = vpack.c.bf16 %v1293_v56, %v1291_v40  ;;  %v1388_v44 = vsel %vm499_vm14, %v1386_v24, %v1387_v15  ;;  %v1629_v47 = vrot.slane %v4246_v1, 1 }
 0x2d7   :  { %v1688_v29 = vsel %vm613_vm9, %v1686_v63, %v1687_v36  ;;  %v1630_v0 = vrot.slane %v1296_v55, 1  ;;  %v1501_v10 = vsel %vm613_vm9, %v1499_v48, %v1500_v20  ;;  %v1502_v57 = vrot.slane %v1291_v40, 2 }
 0x2d8   :  { %1601 = vrot.lane.b32.xlu1 %v1579_v3, %s3243_s23  ;;  %v1841_v21 = vpack.c.bf16 %v1837_v17, %v1688_v29  ;;  %1314 = vst.msk [vmem:[#allocation5 + $0x70] sm:$0xff] %vm101_vm11, %v1306_v2  ;;  %v1503_v32 = vrot.slane %v1292_v31, 2  ;;  %v1530_v16 = vpack.c.bf16 %v1501_v10, %v4202_v18  ;;  %v1392_v24 = vrot.slane %v1293_v56, 1 }
 0x2d9   :  { %v1393_v15 = vrot.slane %v1294_v22, 1  ;;  %v1507_v33 = vsel %vm613_vm9, %v1505_v13, %v1506_v51  ;;  %v1417_v36 = vpack.c.bf16 %v1388_v44, %v4195_v41  ;;  %v1631_v17 = vsel %vm499_vm14, %v1629_v47, %v1630_v0 }
 0x2da   :  { %1849 = vst.msk [vmem:[#allocation5 + $0x78] sm:$0xff] %vm101_vm11, %v1841_v21  ;;  %1603 = vrot.lane.b32.xlu0 %v1580_v61, %s3243_s23  ;;  %v1504_v63 = vsel %vm613_vm9, %v1502_v57, %v1503_v32  ;;  %1847 = vst.msk [vmem:[#allocation5 + $0x58] sm:$0xff] %vm101_vm11, %v1530_v16  ;;  %v1389_v56 = vrot.slane %v1291_v40, 1  ;;  %v1390_v22 = vrot.slane %v1292_v31, 1  ;;  %v1790_v20 = vrot.slane %v4237_v42, 1 }
 0x2db   :  { %v1531_v55 = vpack.c.bf16 %v1507_v33, %v1504_v63  ;;  %v1394_v18 = vsel %vm499_vm14, %v1392_v24, %v1393_v15  ;;  %v1697_v31 = vpack.c.bf16 %v1504_v63, %v1501_v10  ;;  %v1791_v13 = vrot.slane %v4239_v34, 1  ;;  %v1853_v63 = vld [vmem:[#allocation5 + $0x18] sm:$0xff] }
 0x2dc   :  { %1762 = vrot.lane.b32.xlu1 %v1306_v2, %s3244_s25  ;;  %v1641_v48 = vpack.c.bf16 %v1631_v17, %v1394_v18  ;;  %v1391_v41 = vsel %vm499_vm14, %v1389_v56, %v1390_v22  ;;  %v1698_v2 = vpack.c.bf16 %v1688_v29, %v1507_v33 }
 0x2dd   :  { %1848 = vst.msk [vmem:[#allocation5 + $0x68] sm:$0xff] %vm101_vm11, %v1531_v55  ;;  %v1640_v61 = vpack.c.bf16 %v1391_v41, %v1388_v44  ;;  %v1418_v40 = vpack.c.bf16 %v1394_v18, %v1391_v41  ;;  %v1792_v29 = vsel %vm499_vm14, %v1790_v20, %v1791_v13  ;;  %v1741_v44 = vpack.c.bf16 %v4237_v42, %v4246_v1 }
 0x2de   :  { %1439 = vrot.lane.b32.xlu0 %v1417_v36, %s3237_s18  ;;  %v1796_v51 = vpack.c.bf16 %v1792_v29, %v1631_v17 }
 0x2e0   :  { %1809 = vrot.lane.b32.xlu1 %v1417_v36, %s3247_s6 }
 0x2e1   :  { %v1865_v3 = vld [vmem:[#allocation5 + $0x78] sm:$0xff] }
 0x2e2   :  { %3051 = vmatprep.mubr.msk.bf16.mxu1 %vm101_vm11, %v1865_v3  ;;  %1664 = vrot.lane.b32.xlu0 %v1641_v48, %s3245_s29 }
 0x2e4   :  { %1552 = vrot.lane.b32.xlu1 %v1530_v16, %s3241_s2 }
 0x2e6   :  { %1721 = vrot.lane.b32.xlu0 %v1698_v2, %s3246_s12 }
 0x2e8   :  { %1662 = vrot.lane.b32.xlu1 %v1640_v61, %s3245_s29 }
 0x2ea   :  { %1441 = vrot.lane.b32.xlu0 %v1418_v40, %s3237_s18 }
 0x2ec   :  { %1719 = vrot.lane.b32.xlu1 %v1697_v31, %s3246_s12 }
 0x2ee   :  { %1554 = vrot.lane.b32.xlu0 %v1531_v55, %s3241_s2 }
 0x2ef   :  { %v1592_v21 = vpop.permute.xlu1 %1591 }
 0x2f0   :  { %v1590_v47 = vpop.permute.xlu0 %1589  ;;  %1811 = vrot.lane.b32.xlu1 %v1418_v40, %s3247_s6  ;;  %v1855_v40 = vld [vmem:[#allocation5 + $0x28] sm:$0xff] }
 0x2f2   :  { %1764 = vrot.lane.b32.xlu0 %v1741_v44, %s3244_s25 }
 0x2f3   :  { %v1751_v0 = vpop.permute.xlu1 %1750 }
 0x2f4   :  { %1813 = vrot.lane.b32.xlu1 %v1796_v51, %s3247_s6  ;;  %v1428_v34 = vpop.permute.xlu0 %1427 }
 0x2f5   :  { %1452 = vst.msk [vmem:[#allocation5] sm:$0xff] %vm1451_vm4, %v1428_v34  ;;  %v1857_v34 = vld [vmem:[#allocation5 + $0x38] sm:$0xff] }
 0x2f7   :  { %v1541_v10 = vpop.permute.xlu1 %1540 }
 0x2f8   :  { %1565 = vst.msk [vmem:[#allocation5] sm:$0xff] %vm1564_vm5, %v1541_v10  ;;  %v1653_v57 = vpop.permute.xlu0 %1652 }
 0x2f9   :  { %1614 = vst.msk [vmem:[#allocation5] sm:$0xff] %vm1613_vm6, %v1590_v47 }
 0x2fb   :  { %v1710_v32 = vpop.permute.xlu1 %1709 }
 0x2fc   :  { %v1708_v42 = vpop.permute.xlu0 %1707 }
 0x2ff   :  { %v1651_v1 = vpop.permute.xlu1 %1650 }
 0x300   :  { %1675 = vst.msk [vmem:[#allocation5] sm:$0xff] %vm1674_vm7, %v1651_v1  ;;  %v1800_v16 = vpop.permute.xlu0 %1799 }
 0x301   :  { %1732 = vst.msk [vmem:[#allocation5] sm:$0xff] %vm1731_vm3, %v1708_v42 }
 0x302   :  { %1775 = vst.msk [vmem:[#allocation5] sm:$0xff] %vm1774_vm1, %v1751_v0 }
 0x303   :  { %1824 = vst.msk [vmem:[#allocation5] sm:$0xff] %vm1823_vm0, %v1800_v16  ;;  %v1430_v24 = vpop.permute.xlu1 %1429  ;;  %v1859_v16 = vld [vmem:[#allocation5 + $0x48] sm:$0xff] }
 0x304   :  { %1453 = vst.msk [vmem:[#allocation5 + $0x10] sm:$0xff] %vm1451_vm4, %v1430_v24  ;;  %v1543_v15 = vpop.permute.xlu0 %1542 }
 0x305   :  { %1566 = vst.msk [vmem:[#allocation5 + $0x10] sm:$0xff] %vm1564_vm5, %v1543_v15 }
 0x306   :  { %1615 = vst.msk [vmem:[#allocation5 + $0x10] sm:$0xff] %vm1613_vm6, %v1592_v21 }
 0x307   :  { %1676 = vst.msk [vmem:[#allocation5 + $0x10] sm:$0xff] %vm1674_vm7, %v1653_v57 }
 0x308   :  { %1733 = vst.msk [vmem:[#allocation5 + $0x10] sm:$0xff] %vm1731_vm3, %v1710_v32 }
 0x30a   :  { %v1850_v33 = vld [vmem:[#allocation5] sm:$0xff] }
 0x30b   :  { %2002 = vmatmul.mubr.bf16.vlgmr.msra.gmra.mrb[16].mxu0 %v1850_v33 }
 0x30c   :  { %3045 = vmatprep.mubr.msk.bf16.mxu0 %vm101_vm11, %v1853_v63 }
 0x30d   :  { %v1753_v36 = vpop.permute.xlu0 %1752 }
 0x30e   :  { %1776 = vst.msk [vmem:[#allocation5 + $0x10] sm:$0xff] %vm1774_vm1, %v1753_v36  ;;  %v1596_v55 = vpop.permute.xlu1 %1595 }
 0x311   :  { %v1757_v17 = vpop.permute.xlu0 %1756 }
 0x312   :  { %v1755_v18 = vpop.permute.xlu1 %1754 }
 0x315   :  { %v1594_v56 = vpop.permute.xlu0 %1593 }
 0x316   :  { %v1802_v22 = vpop.permute.xlu1 %1801 }
 0x317   :  { %1825 = vst.msk [vmem:[#allocation5 + $0x10] sm:$0xff] %vm1823_vm0, %v1802_v22  ;;  %v1861_v22 = vld [vmem:[#allocation5 + $0x58] sm:$0xff] }
 0x319   :  { %v1432_v48 = vpop.permute.xlu0 %1431 }
 0x31a   :  { %1454 = vst.msk [vmem:[#allocation5 + $0x20] sm:$0xff] %vm1451_vm4, %v1432_v48  ;;  %v1545_v3 = vpop.permute.xlu1 %1544 }
 0x31b   :  { %1567 = vst.msk [vmem:[#allocation5 + $0x20] sm:$0xff] %vm1564_vm5, %v1545_v3 }
 0x31c   :  { %1616 = vst.msk [vmem:[#allocation5 + $0x20] sm:$0xff] %vm1613_vm6, %v1594_v56 }
 0x31d   :  { %v1657_v41 = vpop.permute.xlu0 %1656 }
 0x31e   :  { %v1714_v2 = vpop.permute.xlu1 %1713  ;;  %v1852_v61 = vld [vmem:[#allocation5 + $0x10] sm:$0xff] }
 0x31f   :  { %2010 = vmatmul.mubr.bf16.gmra.mrb[20].mxu0 %v1852_v61 }
 0x320   :  { %3046 = vmatprep.mubr.msk.bf16.mxu0 %vm101_vm11, %v1855_v40 }
 0x321   :  { %v1712_v31 = vpop.permute.xlu0 %1711 }
 0x322   :  { %v1806_v20 = vpop.permute.xlu1 %1805 }
 0x325   :  { %v1804_v13 = vpop.permute.xlu0 %1803 }
 0x326   :  { %v1655_v21 = vpop.permute.xlu1 %1654 }
 0x327   :  { %1677 = vst.msk [vmem:[#allocation5 + $0x20] sm:$0xff] %vm1674_vm7, %v1655_v21  ;;  %v1863_v21 = vld [vmem:[#allocation5 + $0x68] sm:$0xff] }
 0x328   :  { %1734 = vst.msk [vmem:[#allocation5 + $0x20] sm:$0xff] %vm1731_vm3, %v1712_v31 }
 0x329   :  { %1777 = vst.msk [vmem:[#allocation5 + $0x20] sm:$0xff] %vm1774_vm1, %v1755_v18  ;;  %v1547_v47 = vpop.permute.xlu0 %1546 }
 0x32a   :  { %1826 = vst.msk [vmem:[#allocation5 + $0x20] sm:$0xff] %vm1823_vm0, %v1804_v13  ;;  %v1434_v29 = vpop.permute.xlu1 %1433 }
 0x32b   :  { %1455 = vst.msk [vmem:[#allocation5 + $0x30] sm:$0xff] %vm1451_vm4, %v1434_v29 }
 0x32c   :  { %1568 = vst.msk [vmem:[#allocation5 + $0x30] sm:$0xff] %vm1564_vm5, %v1547_v47 }
 0x32d   :  { %1617 = vst.msk [vmem:[#allocation5 + $0x30] sm:$0xff] %vm1613_vm6, %v1596_v55 }
 0x32e   :  { %1678 = vst.msk [vmem:[#allocation5 + $0x30] sm:$0xff] %vm1674_vm7, %v1657_v41 }
 0x32f   :  { %1735 = vst.msk [vmem:[#allocation5 + $0x30] sm:$0xff] %vm1731_vm3, %v1714_v2  ;;  %v1600_v44 = vpop.permute.xlu1 %1599 }
 0x330   :  { %1778 = vst.msk [vmem:[#allocation5 + $0x30] sm:$0xff] %vm1774_vm1, %v1757_v17  ;;  %v1598_v51 = vpop.permute.xlu0 %1597 }
 0x331   :  { %1827 = vst.msk [vmem:[#allocation5 + $0x30] sm:$0xff] %vm1823_vm0, %v1806_v20  ;;  %v1854_v0 = vld [vmem:[#allocation5 + $0x20] sm:$0xff] }
 0x332   :  { %2018 = vmatmul.mubr.bf16.gmra.mrb[24].mxu0 %v1854_v0 }
 0x333   :  { %3047 = vmatprep.mubr.msk.bf16.mxu0 %vm101_vm11, %v1857_v34  ;;  %v1759_v10 = vpop.permute.xlu1 %1758 }
 0x334   :  { %v1436_v57 = vpop.permute.xlu0 %1435 }
 0x335   :  { %1456 = vst.msk [vmem:[#allocation5 + $0x40] sm:$0xff] %vm1451_vm4, %v1436_v57 }
 0x337   :  { %v1549_v32 = vpop.permute.xlu1 %1548 }
 0x338   :  { %v1856_v42 = vld [vmem:[#allocation5 + $0x30] sm:$0xff]  ;;  %1569 = vst.msk [vmem:[#allocation5 + $0x40] sm:$0xff] %vm1564_vm5, %v1549_v32  ;;  %v1661_v1 = vpop.permute.xlu0 %1660  ;;  %v4354_v32 = vld [vmem:[%s4874_s7] ss:$0 sm:$0xff] }
 0x339   :  { %1618 = vst.msk [vmem:[#allocation5 + $0x40] sm:$0xff] %vm1613_vm6, %v1598_v51 }
 0x33a   :  { %2026 = vmatmul.mubr.bf16.gmra.mrb[28].mxu0 %v1856_v42 }
 0x33b   :  { %3048 = vmatprep.mubr.msk.bf16.mxu0 %vm101_vm11, %v1859_v16  ;;  %v1718_v24 = vpop.permute.xlu1 %1717 }
 0x33c   :  { %v1716_v15 = vpop.permute.xlu0 %1715 }
 0x33f   :  { %v1659_v33 = vpop.permute.xlu1 %1658 }
 0x340   :  { %1679 = vst.msk [vmem:[#allocation5 + $0x40] sm:$0xff] %vm1674_vm7, %v1659_v33  ;;  %v1808_v63 = vpop.permute.xlu0 %1807 }
 0x341   :  { %1736 = vst.msk [vmem:[#allocation5 + $0x40] sm:$0xff] %vm1731_vm3, %v1716_v15 }
 0x342   :  { %1779 = vst.msk [vmem:[#allocation5 + $0x40] sm:$0xff] %vm1774_vm1, %v1759_v10 }
 0x343   :  { %1828 = vst.msk [vmem:[#allocation5 + $0x40] sm:$0xff] %vm1823_vm0, %v1808_v63  ;;  %v1438_v36 = vpop.permute.xlu1 %1437 }
 0x344   :  { %1457 = vst.msk [vmem:[#allocation5 + $0x50] sm:$0xff] %vm1451_vm4, %v1438_v36  ;;  %v1551_v55 = vpop.permute.xlu0 %1550 }
 0x345   :  { %1570 = vst.msk [vmem:[#allocation5 + $0x50] sm:$0xff] %vm1564_vm5, %v1551_v55 }
 0x346   :  { %1619 = vst.msk [vmem:[#allocation5 + $0x50] sm:$0xff] %vm1613_vm6, %v1600_v44 }
 0x347   :  { %1680 = vst.msk [vmem:[#allocation5 + $0x50] sm:$0xff] %vm1674_vm7, %v1661_v1  ;;  %v4356_v1 = vstv %s3033_s5 }
 0x348   :  { %1737 = vst.msk [vmem:[#allocation5 + $0x50] sm:$0xff] %vm1731_vm3, %v1718_v24  ;;  %v1761_v17 = vpop.permute.xlu0 %1760 }
 0x349   :  { %1780 = vst.msk [vmem:[#allocation5 + $0x50] sm:$0xff] %vm1774_vm1, %v1761_v17 }
 0x34a   :  { %v1602_v18 = vpop.permute.xlu1 %1601  ;;  %v1858_v56 = vld [vmem:[#allocation5 + $0x40] sm:$0xff] }
 0x34b   :  { %2034 = vmatmul.mubr.bf16.gmra.mrb[32].mxu0 %v1858_v56 }
 0x34c   :  { %v1604_v48 = vpop.permute.xlu0 %1603  ;;  %3049 = vmatprep.mubr.msk.bf16.mxu0 %vm101_vm11, %v1861_v22 }
 0x34e   :  { %v1763_v3 = vpop.permute.xlu1 %1762 }
 0x350   :  { %v1440_v41 = vpop.permute.xlu0 %1439 }
 0x351   :  { %1458 = vst.msk [vmem:[#allocation5 + $0x60] sm:$0xff] %vm1451_vm4, %v1440_v41 }
 0x352   :  { %v1810_v2 = vpop.permute.xlu1 %1809 }
 0x353   :  { %1829 = vst.msk [vmem:[#allocation5 + $0x50] sm:$0xff] %vm1823_vm0, %v1810_v2 }
 0x354   :  { %v1665_v61 = vpop.permute.xlu0 %1664 }
 0x356   :  { %v1553_v40 = vpop.permute.xlu1 %1552 }
 0x357   :  { %1571 = vst.msk [vmem:[#allocation5 + $0x60] sm:$0xff] %vm1564_vm5, %v1553_v40 }
 0x358   :  { %1620 = vst.msk [vmem:[#allocation5 + $0x60] sm:$0xff] %vm1613_vm6, %v1602_v18  ;;  %v1722_v31 = vpop.permute.xlu0 %1721 }
 0x35a   :  { %v1663_v20 = vpop.permute.xlu1 %1662  ;;  %v1860_v13 = vld [vmem:[#allocation5 + $0x50] sm:$0xff] }
 0x35b   :  { %1681 = vst.msk [vmem:[#allocation5 + $0x60] sm:$0xff] %vm1674_vm7, %v1663_v20  ;;  %2042 = vmatmul.mubr.bf16.gmra.mrb[36].mxu0 %v1860_v13 }
 0x35c   :  { %v1442_v29 = vpop.permute.xlu0 %1441  ;;  %3050 = vmatprep.mubr.msk.bf16.mxu0 %vm101_vm11, %v1863_v21 }
 0x35d   :  { %1459 = vst.msk [vmem:[#allocation5 + $0x70] sm:$0xff] %vm1451_vm4, %v1442_v29 }
 0x35e   :  { %v1720_v47 = vpop.permute.xlu1 %1719 }
 0x35f   :  { %1738 = vst.msk [vmem:[#allocation5 + $0x60] sm:$0xff] %vm1731_vm3, %v1720_v47 }
 0x360   :  { %1781 = vst.msk [vmem:[#allocation5 + $0x60] sm:$0xff] %vm1774_vm1, %v1763_v3  ;;  %v1555_v44 = vpop.permute.xlu0 %1554  ;;  %v2149_v3 = vld [vmem:[#allocation2 + $0x8] sm:$0x3] }
 0x361   :  { %1572 = vst.msk [vmem:[#allocation5 + $0x70] sm:$0xff] %vm1564_vm5, %v1555_v44  ;;  %v2237_v40 = vrot.slane %v2149_v3, 1 }
 0x362   :  { %1621 = vst.msk [vmem:[#allocation5 + $0x70] sm:$0xff] %vm1613_vm6, %v1604_v48  ;;  %v1812_v51 = vpop.permute.xlu1 %1811  ;;  %v2148_v48 = vld [vmem:[#allocation2] sm:$0xff] }
 0x363   :  { %1682 = vst.msk [vmem:[#allocation5 + $0x70] sm:$0xff] %vm1674_vm7, %v1665_v61  ;;  %v2236_v61 = vrot.slane %v2148_v48, 1  ;;  %v2348_v47 = vrot.slane %v2148_v48, 2 }
 0x364   :  { %1830 = vst.msk [vmem:[#allocation5 + $0x60] sm:$0xff] %vm1823_vm0, %v1812_v51  ;;  %v1765_v0 = vpop.permute.xlu0 %1764 }
 0x365   :  { %1739 = vst.msk [vmem:[#allocation5 + $0x70] sm:$0xff] %vm1731_vm3, %v1722_v31  ;;  %v2238_v51 = vsel %vm499_vm14, %v2236_v61, %v2237_v40 }
 0x366   :  { %1782 = vst.msk [vmem:[#allocation5 + $0x70] sm:$0xff] %vm1774_vm1, %v1765_v0  ;;  %v1814_v34 = vpop.permute.xlu1 %1813 }
 0x367   :  { %1831 = vst.msk [vmem:[#allocation5 + $0x70] sm:$0xff] %vm1823_vm0, %v1814_v34 }
 0x36b   :  { %v1862_v10 = vld [vmem:[#allocation5 + $0x60] sm:$0xff] }
 0x36c   :  { %2050 = vmatmul.mubr.bf16.gmra.mrb[40].mxu0 %v1862_v10 }
 0x36e   :  { %v1864_v57 = vld [vmem:[#allocation5 + $0x70] sm:$0xff] }
 0x36f   :  { %2058 = vmatmul.mubr.bf16.vlgmr.msra.gmra.mrb[16].mxu1 %v1864_v57 }
 0x3de   :  { %v2003_v42 = vpop.f32.mrb[16].mxu0 }
 0x3df   :  { %v2004_v16 = vadd.f32 %v4354_v32, %v2003_v42  ;;  %v2005_v24 = vpop.f32.mrb[17].mxu0 }
 0x3e0   :  { %v2006_v15 = vpop.f32.mrb[18].mxu0 }
 0x3e1   :  { %vm2066_vm1 = vcmp.ge.f32.partialorder %v2004_v16, 0.0  ;;  %v2083_v33 = vmul.f32 %v4356_v1, %v2004_v16  ;;  %v2007_v63 = vadd.f32 %v4354_v32, %v2006_v15  ;;  %v2008_v36 = vpop.f32.mrb[19].mxu0 }
 0x3e3   :  { %v2099_v55 = vsel %vm2066_vm1, %v2004_v16, %v2083_v33  ;;  %vm2067_vm0 = vcmp.ge.f32.partialorder %v2007_v63, 0.0  ;;  %v2084_v17 = vmul.f32 %v4356_v1, %v2007_v63 }
 0x3e4   :  { %v2115_v18 = vsub.f32 %v2099_v55, %v3455_v25  ;;  %v2349_v25 = vrot.slane %v2149_v3, 2 }
 0x3e5   :  { %v2100_v56 = vsel %vm2067_vm0, %v2007_v63, %v2084_v17 }
 0x3e6   :  { %2131 = vst.msk [vmem:[#allocation2 + $0x11] sm:$0xff] %vm49_vm2, %v2115_v18  ;;  %v2116_v22 = vsub.f32 %v2100_v56, %v3464_v28  ;;  %v2350_v36 = vsel %vm613_vm9, %v2348_v47, %v2349_v25 }
 0x3e8   :  { %2132 = vst.msk [vmem:[#allocation2 + $0x21] sm:$0xff] %vm49_vm2, %v2116_v22 }
 0x3ed   :  { %v2150_v41 = vld [vmem:[#allocation2 + $0x10] sm:$0xff]  ;;  %v2151_v2 = vld [vmem:[#allocation2 + $0x18] sm:$0x3] }
 0x3ee   :  { %v2239_v31 = vrot.slane %v2150_v41, 1  ;;  %v2240_v20 = vrot.slane %v2151_v2, 1  ;;  %v2188_v21 = vpack.c.bf16 %v2150_v41, %v2148_v48  ;;  %v2351_v0 = vrot.slane %v2150_v41, 2 }
 0x3ef   :  { %v2152_v13 = vld [vmem:[#allocation2 + $0x20] sm:$0xff]  ;;  %v2352_v34 = vrot.slane %v2151_v2, 2  ;;  %v2153_v42 = vld [vmem:[#allocation2 + $0x28] sm:$0x3] }
 0x3f0   :  { %v2460_v29 = vpack.c.bf16 %v2152_v13, %v2150_v41  ;;  %v2241_v28 = vsel %vm499_vm14, %v2239_v31, %v2240_v20  ;;  %2196 = vst.msk [vmem:[#allocation4] sm:$0xff] %vm49_vm2, %v2188_v21  ;;  %v2242_v17 = vrot.slane %v2152_v13, 1  ;;  %v2243_v18 = vrot.slane %v2153_v42, 1 }
 0x3f1   :  { %v2300_v63 = vpack.c.bf16 %v2241_v28, %v2238_v51  ;;  %v2353_v55 = vsel %vm613_vm9, %v2351_v0, %v2352_v34  ;;  %v2354_v40 = vrot.slane %v2152_v13, 2  ;;  %v2355_v31 = vrot.slane %v2153_v42, 2 }
 0x3f2   :  { %v2011_v44 = vpop.f32.mrb[20].mxu0  ;;  %2476 = vrot.lane.b32.xlu0 %v2460_v29, %s3234_s3  ;;  %v2412_v41 = vpack.c.bf16 %v2353_v55, %v2350_v36  ;;  %v2244_v61 = vsel %vm499_vm14, %v2242_v17, %v2243_v18 }
 0x3f3   :  { %v2012_v10 = vadd.f32 %v4354_v32, %v2011_v44  ;;  %v2013_v57 = vpop.f32.mrb[21].mxu0  ;;  %v2520_v20 = vpack.c.bf16 %v2244_v61, %v2241_v28  ;;  %v2356_v21 = vsel %vm613_vm9, %v2354_v40, %v2355_v31 }
 0x3f4   :  { %v2014_v16 = vpop.f32.mrb[22].mxu0 }
 0x3f5   :  { %vm2068_vm3 = vcmp.ge.f32.partialorder %v2012_v10, 0.0  ;;  %v2085_v24 = vmul.f32 %v4356_v1, %v2012_v10  ;;  %v2015_v15 = vadd.f32 %v4354_v32, %v2014_v16  ;;  %v2016_v33 = vpop.f32.mrb[23].mxu0 }
 0x3f6   :  { %2316 = vrot.lane.b32.xlu0 %v2300_v63, %s3238_s19 }
 0x3f7   :  { %v2101_v56 = vsel %vm2068_vm3, %v2012_v10, %v2085_v24  ;;  %vm2069_vm4 = vcmp.ge.f32.partialorder %v2015_v15, 0.0  ;;  %v2086_v22 = vmul.f32 %v4356_v1, %v2015_v15 }
 0x3f8   :  { %v2117_v48 = vsub.f32 %v2101_v56, %v3450_v23  ;;  %v2576_v23 = vpack.c.bf16 %v2356_v21, %v2353_v55 }
 0x3f9   :  { %v2102_v3 = vsel %vm2069_vm4, %v2015_v15, %v2086_v22 }
 0x3fa   :  { %2133 = vst.msk [vmem:[#allocation2 + $0x31] sm:$0xff] %vm49_vm2, %v2117_v48  ;;  %v2118_v2 = vsub.f32 %v2102_v3, %v3460_v27  ;;  %2428 = vrot.lane.b32.xlu0 %v2412_v41, %s3235_s16 }
 0x3fc   :  { %2134 = vst.msk [vmem:[#allocation2 + $0x41] sm:$0xff] %vm49_vm2, %v2118_v2 }
 0x3fe   :  { %2536 = vrot.lane.b32.xlu0 %v2520_v20, %s3237_s18 }
 0x401   :  { %v2154_v29 = vld [vmem:[#allocation2 + $0x30] sm:$0xff]  ;;  %v2155_v47 = vld [vmem:[#allocation2 + $0x38] sm:$0x3] }
 0x402   :  { %v2189_v25 = vpack.c.bf16 %v2154_v29, %v2152_v13  ;;  %v2245_v44 = vrot.slane %v2154_v29, 1  ;;  %v2246_v51 = vrot.slane %v2155_v47, 1  ;;  %2592 = vrot.lane.b32.xlu0 %v2576_v23, %s3239_s20  ;;  %v2357_v10 = vrot.slane %v2154_v29, 2  ;;  %v3215_v23 = vld [vmem:[%s4875_s8] sm:$0xff]  }
 0x403   :  { %v4386_v27 = vld [vmem:[#allocation2 + $0x40] sm:$0xff]  ;;  %v2358_v57 = vrot.slane %v2155_v47, 2  ;;  %v2157_v13 = vld [vmem:[#allocation2 + $0x48] sm:$0x3]  ;;  %3136 = vmatprep.subr.bf16.mxu1 %v3215_v23 }
 0x404   :  { %v2461_v0 = vpack.c.bf16 %v4386_v27, %v2154_v29  ;;  %2197 = vst.msk [vmem:[#allocation4 + $0x8] sm:$0xff] %vm49_vm2, %v2189_v25  ;;  %v2247_v28 = vsel %vm499_vm14, %v2245_v44, %v2246_v51  ;;  %v2248_v17 = vrot.slane %v4386_v27, 1  ;;  %v2249_v18 = vrot.slane %v2157_v13, 1  ;;  %3137 = vmatpush3.bf16.msra.mxu1 %v3215_v23 }
 0x405   :  { %v2019_v34 = vpop.f32.mrb[24].mxu0  ;;  %v2301_v36 = vpack.c.bf16 %v2247_v28, %v2244_v61  ;;  %v2359_v55 = vsel %vm613_vm9, %v2357_v10, %v2358_v57  ;;  %v2360_v31 = vrot.slane %v4386_v27, 2  ;;  %v2361_v20 = vrot.slane %v2157_v13, 2  ;;  %v3216_v10 = vld [vmem:[%s4875_s8 + $0x8] sm:$0xff]  }
 0x406   :  { %v2020_v42 = vadd.f32 %v4354_v32, %v2019_v34  ;;  %v2021_v16 = vpop.f32.mrb[25].mxu0  ;;  %2478 = vrot.lane.b32.xlu1 %v2461_v0, %s3234_s3  ;;  %2634 = vrot.lane.b32.xlu0 %v2189_v25, %s3236_s17  ;;  %v2413_v41 = vpack.c.bf16 %v2359_v55, %v2356_v21  ;;  %v2250_v40 = vsel %vm499_vm14, %v2248_v17, %v2249_v18 }
 0x407   :  { %v2022_v24 = vpop.f32.mrb[26].mxu0  ;;  %v2521_v44 = vpack.c.bf16 %v2250_v40, %v2247_v28  ;;  %v2362_v51 = vsel %vm613_vm9, %v2360_v31, %v2361_v20  ;;  %3138 = vmatprep.subr.bf16.mxu1 %v3216_v10 }
 0x408   :  { %vm2070_vm5 = vcmp.ge.f32.partialorder %v2020_v42, 0.0  ;;  %v2087_v15 = vmul.f32 %v4356_v1, %v2020_v42  ;;  %v2023_v33 = vadd.f32 %v4354_v32, %v2022_v24  ;;  %v2024_v63 = vpop.f32.mrb[27].mxu0  ;;  %v2577_v16 = vpack.c.bf16 %v2362_v51, %v2359_v55  ;;  %3139 = vmatpush3.bf16.msra.mxu1 %v3216_v10  ;;  %v3217_v55 = vld [vmem:[%s4875_s8 + $0x10] ss:$0 sps:$4 sm:$0x33]   ;;  %s3052_s8 = sld [smem:[#allocation6 + $0x3]] }
 0x409   :  { %3178 = vmatprep.subr.msk.bf16.mxu1 %vm1091_vm8, %v3217_v55 }
 0x40a   :  { %v2103_v56 = vsel %vm2070_vm5, %v2020_v42, %v2087_v15  ;;  %vm2071_vm6 = vcmp.ge.f32.partialorder %v2023_v33, 0.0  ;;  %v2088_v22 = vmul.f32 %v4356_v1, %v2023_v33  ;;  %2318 = vrot.lane.b32.xlu1 %v2301_v36, %s3238_s19  ;;  %2682 = vrot.lane.b32.xlu0 %v2301_v36, %s3240_s24 }
 0x40b   :  { %v2119_v48 = vsub.f32 %v2103_v56, %v3483_v46 }
 0x40c   :  { %v2104_v3 = vsel %vm2071_vm6, %v2023_v33, %v2088_v22  ;;  %v2818_v22 = vsel %vm1091_vm8, %v3217_v55, 0 }
 0x40d   :  { %2135 = vst.msk [vmem:[#allocation2 + $0x51] sm:$0xff] %vm49_vm2, %v2119_v48  ;;  %v2120_v2 = vsub.f32 %v2104_v3, %v3500_v59  ;;  %v2027_v61 = vpop.f32.mrb[28].mxu0  ;;  %3141 = vmatpush3.bf16.msra.mxu1 %v2818_v22 }
 0x40e   :  { %v2028_v46 = vadd.f32 %v4354_v32, %v2027_v61  ;;  %v2029_v29 = vpop.f32.mrb[29].mxu0  ;;  %2430 = vrot.lane.b32.xlu1 %v2413_v41, %s3235_s16  ;;  %2726 = vrot.lane.b32.xlu0 %v2413_v41, %s3241_s2 }
 0x40f   :  { %2136 = vst.msk [vmem:[#allocation2 + $0x61] sm:$0xff] %vm49_vm2, %v2120_v2  ;;  %v2030_v21 = vpop.f32.mrb[30].mxu0 }
 0x410   :  { %vm2072_vm7 = vcmp.ge.f32.partialorder %v2028_v46, 0.0  ;;  %v2089_v59 = vmul.f32 %v4356_v1, %v2028_v46  ;;  %v2031_v47 = vadd.f32 %v4354_v32, %v2030_v21  ;;  %v2032_v25 = vpop.f32.mrb[31].mxu0 }
 0x412   :  { %v2105_v0 = vsel %vm2072_vm7, %v2028_v46, %v2089_v59  ;;  %vm2073_vm1 = vcmp.ge.f32.partialorder %v2031_v47, 0.0  ;;  %v2090_v34 = vmul.f32 %v4356_v1, %v2031_v47  ;;  %2538 = vrot.lane.b32.xlu1 %v2521_v44, %s3237_s18 }
 0x413   :  { %v2121_v57 = vsub.f32 %v2105_v0, %v3477_v43 }
 0x414   :  { %v2106_v42 = vsel %vm2073_vm1, %v2031_v47, %v2090_v34  ;;  %v2158_v13 = vld [vmem:[#allocation2 + $0x50] sm:$0xff]  ;;  %v2159_v24 = vld [vmem:[#allocation2 + $0x58] sm:$0x3] }
 0x415   :  { %2137 = vst.msk [vmem:[#allocation2 + $0x71] sm:$0xff] %vm49_vm2, %v2121_v57  ;;  %v2122_v28 = vsub.f32 %v2106_v42, %v3492_v53  ;;  %v2190_v15 = vpack.c.bf16 %v2158_v13, %v4386_v27  ;;  %v2363_v33 = vrot.slane %v2158_v13, 2  ;;  %v2364_v63 = vrot.slane %v2159_v24, 2 }
 0x416   :  { %2594 = vrot.lane.b32.xlu1 %v2577_v16, %s3239_s20  ;;  %v2160_v36 = vld [vmem:[#allocation2 + $0x60] sm:$0xff]  ;;  %v2251_v17 = vrot.slane %v2158_v13, 1  ;;  %v2252_v18 = vrot.slane %v2159_v24, 1  ;;  %v2161_v56 = vld [vmem:[#allocation2 + $0x68] sm:$0x3]  ;;  %v4453_v24 = vld [vmem:[#allocation2 + $0x90] sm:$0xff] }
 0x417   :  { %2138 = vst.msk [vmem:[#allocation2 + $0x81] sm:$0xff] %vm49_vm2, %v2122_v28  ;;  %v2462_v43 = vpack.c.bf16 %v2160_v36, %v2158_v13  ;;  %2198 = vst.msk [vmem:[#allocation4 + $0x10] sm:$0xff] %vm49_vm2, %v2190_v15  ;;  %v2365_v53 = vsel %vm613_vm9, %v2363_v33, %v2364_v63  ;;  %v2254_v41 = vrot.slane %v2160_v36, 1  ;;  %v2255_v2 = vrot.slane %v2161_v56, 1 }
 0x418   :  { %v2253_v27 = vsel %vm499_vm14, %v2251_v17, %v2252_v18  ;;  %v2414_v48 = vpack.c.bf16 %v2365_v53, %v2362_v51  ;;  %v2366_v23 = vrot.slane %v2160_v36, 2  ;;  %v2367_v46 = vrot.slane %v2161_v56, 2  ;;  %v4475_v56 = vld [vmem:[#allocation2 + $0xa0] sm:$0xff] }
 0x419   :  { %2480 = vrot.lane.b32.xlu0 %v2462_v43, %s3234_s3  ;;  %v2302_v3 = vpack.c.bf16 %v2253_v27, %v2250_v40  ;;  %v2256_v59 = vsel %vm499_vm14, %v2254_v41, %v2255_v2 }
 0x41a   :  { %2636 = vrot.lane.b32.xlu1 %v2190_v15, %s3236_s17  ;;  %v2522_v34 = vpack.c.bf16 %v2256_v59, %v2253_v27  ;;  %v2368_v10 = vsel %vm613_vm9, %v2366_v23, %v2367_v46  ;;  %v4467_v27 = vld [vmem:[#allocation2 + $0x98] sm:$0x3] }
 0x41b   :  { %v2715_v2 = vrot.slane %v4467_v27, 2 }
 0x41c   :  { %v2162_v61 = vld [vmem:[#allocation2 + $0x70] sm:$0xff]  ;;  %v2163_v0 = vld [vmem:[#allocation2 + $0x78] sm:$0x3] }
 0x41d   :  { %2728 = vrot.lane.b32.xlu0 %v2414_v48, %s3241_s2  ;;  %v2191_v31 = vpack.c.bf16 %v2162_v61, %v2160_v36  ;;  %v2257_v28 = vrot.slane %v2162_v61, 1  ;;  %v2258_v15 = vrot.slane %v2163_v0, 1  ;;  %v2578_v36 = vpack.c.bf16 %v2368_v10, %v2365_v53 }
 0x41e   :  { %2684 = vrot.lane.b32.xlu1 %v2302_v3, %s3240_s24  ;;  %v2035_v20 = vpop.f32.mrb[32].mxu0  ;;  %v4443_v40 = vld [vmem:[#allocation2 + $0x80] sm:$0xff]  ;;  %v2369_v18 = vrot.slane %v2162_v61, 2  ;;  %v2370_v43 = vrot.slane %v2163_v0, 2  ;;  %v4473_v53 = vld [vmem:[#allocation2 + $0x88] sm:$0x3] }
 0x41f   :  { %2199 = vst.msk [vmem:[#allocation4 + $0x18] sm:$0xff] %vm49_vm2, %v2191_v31  ;;  %v2036_v29 = vadd.f32 %v4354_v32, %v2035_v20  ;;  %v2037_v21 = vpop.f32.mrb[33].mxu0  ;;  %v2463_v16 = vpack.c.bf16 %v4443_v40, %v2162_v61  ;;  %v2624_v17 = vpack.c.bf16 %v4453_v24, %v4443_v40  ;;  %v2568_v41 = vrot.slane %v4443_v40, 2 }
 0x420   :  { %v2038_v47 = vpop.f32.mrb[34].mxu0  ;;  %v2569_v23 = vrot.slane %v4473_v53, 2 }
 0x421   :  { %2432 = vrot.lane.b32.xlu0 %v2414_v48, %s3235_s16  ;;  %vm2074_vm8 = vcmp.ge.f32.partialorder %v2036_v29, 0.0  ;;  %v2091_v25 = vmul.f32 %v4356_v1, %v2036_v29  ;;  %v2039_v44 = vadd.f32 %v4354_v32, %v2038_v47  ;;  %v2040_v51 = vpop.f32.mrb[35].mxu0  ;;  %v2714_v48 = vrot.slane %v4453_v24, 2 }
 0x422   :  { %2320 = vrot.lane.b32.xlu1 %v2302_v3, %s3238_s19  ;;  %v4496_v0 = vsel %vm613_vm9, %v2568_v41, %v2569_v23 }
 0x423   :  { %v2107_v57 = vsel %vm2074_vm8, %v2036_v29, %v2091_v25  ;;  %vm2075_vm0 = vcmp.ge.f32.partialorder %v2039_v44, 0.0  ;;  %v2092_v42 = vmul.f32 %v4356_v1, %v2039_v44  ;;  %v2716_v25 = vsel %vm613_vm9, %v2714_v48, %v2715_v2 }
 0x424   :  { %v2123_v13 = vsub.f32 %v2107_v57, %v3559_v60  ;;  %v4463_v60 = vsel %vm499_vm14, %v2257_v28, %v2258_v15  ;;  %v2372_v15 = vrot.slane %v4475_v56, 2  ;;  %vm4884_vm8 = vcmask 228544  }
 0x425   :  { %2540 = vrot.lane.b32.xlu0 %v2522_v34, %s3237_s18  ;;  %v2108_v33 = vsel %vm2075_vm0, %v2039_v44, %v2092_v42  ;;  %v2303_v55 = vpack.c.bf16 %v4463_v60, %v2256_v59  ;;  %vm4885_vm0 = vcmask 261344  }
 0x426   :  { %2482 = vrot.lane.b32.xlu1 %v2463_v16, %s3234_s3  ;;  %2139 = vst.msk [vmem:[#allocation2 + $0xb1] sm:$0xff] %vm49_vm2, %v2123_v13  ;;  %v2124_v63 = vsub.f32 %v2108_v33, %v3581_v9  ;;  %v4471_v9 = vsel %vm613_vm9, %v2369_v18, %v2370_v43  ;;  %v2722_v13 = vpack.c.bf16 %v2716_v25, %v4496_v0 }
 0x427   :  { %v2415_v20 = vpack.c.bf16 %v4471_v9, %v2368_v10  ;;  %v4500_v10 = vld [vmem:[#allocation2 + $0xa8] sm:$0x3] }
 0x428   :  { %2140 = vst.msk [vmem:[#allocation2 + $0xc1] sm:$0xff] %vm49_vm2, %v2124_v63  ;;  %v2373_v33 = vrot.slane %v4500_v10, 2 }
 0x429   :  { %2596 = vrot.lane.b32.xlu0 %v2578_v36, %s3239_s20 }
 0x42a   :  { %2640 = vrot.lane.b32.xlu1 %v2624_v17, %s3236_s17  ;;  %v2374_v18 = vsel %vm613_vm9, %v2372_v15, %v2373_v33 }
 0x42d   :  { %2638 = vrot.lane.b32.xlu0 %v2191_v31, %s3236_s17  ;;  %v4478_v22 = vld [vmem:[#allocation2 + $0xb0] sm:$0xff]  ;;  %v2171_v57 = vld [vmem:[#allocation2 + $0xb8] sm:$0x3] }
 0x42e   :  { %2322 = vrot.lane.b32.xlu1 %v2303_v55, %s3238_s19  ;;  %v2043_v3 = vpop.f32.mrb[36].mxu0  ;;  %v2192_v46 = vpack.c.bf16 %v4478_v22, %v4475_v56  ;;  %v2375_v63 = vrot.slane %v4478_v22, 2  ;;  %v2263_v48 = vrot.slane %v4478_v22, 1 }
 0x42f   :  { %v2044_v61 = vadd.f32 %v4354_v32, %v2043_v3  ;;  %v2045_v31 = vpop.f32.mrb[37].mxu0  ;;  %v2172_v28 = vld [vmem:[#allocation2 + $0xc0] sm:$0xff]  ;;  %v2173_v36 = vld [vmem:[#allocation2 + $0xc8] sm:$0x3]  ;;  %v2264_v3 = vrot.slane %v2171_v57, 1 }
 0x430   :  { %v2046_v29 = vpop.f32.mrb[38].mxu0  ;;  %2200 = vst.msk [vmem:[#allocation4 + $0x20] sm:$0xff] %vm49_vm2, %v2192_v46  ;;  %v2464_v17 = vpack.c.bf16 %v2172_v28, %v4478_v22  ;;  %v2266_v43 = vrot.slane %v2172_v28, 1  ;;  %v2378_v31 = vrot.slane %v2172_v28, 2 }
 0x431   :  { %2686 = vrot.lane.b32.xlu0 %v2303_v55, %s3240_s24  ;;  %vm2076_vm3 = vcmp.ge.f32.partialorder %v2044_v61, 0.0  ;;  %v2093_v21 = vmul.f32 %v4356_v1, %v2044_v61  ;;  %v2047_v59 = vadd.f32 %v4354_v32, %v2046_v29  ;;  %v2048_v47 = vpop.f32.mrb[39].mxu0  ;;  %v2267_v55 = vrot.slane %v2173_v36, 1 }
 0x432   :  { %2434 = vrot.lane.b32.xlu1 %v2415_v20, %s3235_s16 }
 0x433   :  { %v2109_v44 = vsel %vm2076_vm3, %v2044_v61, %v2093_v21  ;;  %vm2077_vm4 = vcmp.ge.f32.partialorder %v2047_v59, 0.0  ;;  %v2094_v51 = vmul.f32 %v4356_v1, %v2047_v59  ;;  %v2268_v21 = vsel %vm499_vm14, %v2266_v43, %v2267_v55 }
 0x434   :  { %v2125_v34 = vsub.f32 %v2109_v44, %v3557_v58  ;;  %v2376_v58 = vrot.slane %v2171_v57, 2  ;;  %v4525_v44 = vsel %vm499_vm14, %v2263_v48, %v2264_v3  ;;  %vm4886_vm3 = vcmask 294144  }
 0x435   :  { %2730 = vrot.lane.b32.xlu0 %v2415_v20, %s3241_s2  ;;  %v2110_v42 = vsel %vm2077_vm4, %v2047_v59, %v2094_v51  ;;  %v2379_v20 = vrot.slane %v2173_v36, 2 }
 0x436   :  { %2141 = vst.msk [vmem:[#allocation2 + $0xd1] sm:$0xff] %vm49_vm2, %v2125_v34  ;;  %v2126_v16 = vsub.f32 %v2110_v42, %v3575_v7  ;;  %v2377_v7 = vsel %vm613_vm9, %v2375_v63, %v2376_v58  ;;  %v2524_v34 = vpack.c.bf16 %v2268_v21, %v4525_v44 }
 0x437   :  { %v2416_v61 = vpack.c.bf16 %v2377_v7, %v2374_v18  ;;  %v2380_v57 = vsel %vm613_vm9, %v2378_v31, %v2379_v20 }
 0x438   :  { %2142 = vst.msk [vmem:[#allocation2 + $0xe1] sm:$0xff] %vm49_vm2, %v2126_v16  ;;  %v2580_v55 = vpack.c.bf16 %v2380_v57, %v2377_v7 }
 0x439   :  { %2732 = vrot.lane.b32.xlu0 %v2722_v13, %s3241_s2 }
 0x43d   :  { %2484 = vrot.lane.b32.xlu0 %v2464_v17, %s3234_s3  ;;  %v4515_v41 = vld [vmem:[#allocation2 + $0xd0] sm:$0xff]  ;;  %v2175_v63 = vld [vmem:[#allocation2 + $0xd8] sm:$0x3] }
 0x43e   :  { %v2193_v23 = vpack.c.bf16 %v4515_v41, %v2172_v28  ;;  %v2269_v48 = vrot.slane %v4515_v41, 1  ;;  %v2381_v7 = vrot.slane %v4515_v41, 2  ;;  %v2382_v20 = vrot.slane %v2175_v63, 2 }
 0x43f   :  { %v2051_v2 = vpop.f32.mrb[40].mxu0 }
 0x440   :  { %v2052_v46 = vadd.f32 %v4354_v32, %v2051_v2  ;;  %v2053_v29 = vpop.f32.mrb[41].mxu0  ;;  %2201 = vst.msk [vmem:[#allocation4 + $0x28] sm:$0xff] %vm49_vm2, %v2193_v23  ;;  %v2270_v2 = vrot.slane %v2175_v63, 1 }
 0x441   :  { %v2054_v59 = vpop.f32.mrb[42].mxu0  ;;  %2436 = vrot.lane.b32.xlu0 %v2416_v61, %s3235_s16  ;;  %v4556_v29 = vsel %vm613_vm9, %v2381_v7, %v2382_v20 }
 0x442   :  { %vm2078_vm5 = vcmp.ge.f32.partialorder %v2052_v46, 0.0  ;;  %v2095_v22 = vmul.f32 %v4356_v1, %v2052_v46  ;;  %v2055_v47 = vadd.f32 %v4354_v32, %v2054_v59  ;;  %v2056_v25 = vpop.f32.mrb[43].mxu0  ;;  %v2059_v51 = vpop.f32.mrb[16].mxu1 }
 0x443   :  { %v2060_v13 = vadd.f32 %v4354_v32, %v2059_v51  ;;  %v2061_v28 = vpop.f32.mrb[17].mxu1 }
 0x444   :  { %v2111_v42 = vsel %vm2078_vm5, %v2052_v46, %v2095_v22  ;;  %vm2079_vm6 = vcmp.ge.f32.partialorder %v2055_v47, 0.0  ;;  %v2096_v16 = vmul.f32 %v4356_v1, %v2055_v47  ;;  %v2062_v33 = vpop.f32.mrb[18].mxu1  ;;  %v4553_v46 = vld [vmem:[#allocation2 + $0xe0] sm:$0xff]  ;;  %vm4888_vm5 = vcmask 293888  }
 0x445   :  { %v2127_v15 = vsub.f32 %v2111_v42, %v3589_v14  ;;  %2544 = vrot.lane.b32.xlu0 %v2524_v34, %s3237_s18  ;;  %vm2080_vm7 = vcmp.ge.f32.partialorder %v2060_v13, 0.0  ;;  %v2097_v36 = vmul.f32 %v4356_v1, %v2060_v13  ;;  %v2063_v17 = vadd.f32 %v4354_v32, %v2062_v33  ;;  %v2064_v18 = vpop.f32.mrb[19].mxu1  ;;  %v4578_v34 = vld [vmem:[#allocation2 + $0x130] sm:$0xff] }
 0x446   :  { %v2112_v58 = vsel %vm2079_vm6, %v2055_v47, %v2096_v16  ;;  %v2512_v42 = vrot.slane %v4443_v40, 1  ;;  %v2671_v18 = vrot.slane %v4467_v27, 1  ;;  %vm4889_vm6 = vmmov %vm4884_vm8 }
 0x447   :  { %2143 = vst.msk [vmem:[#allocation2 + $0xf1] sm:$0xff] %vm49_vm2, %v2127_v15  ;;  %v2128_v43 = vsub.f32 %v2112_v58, %v3623_v38  ;;  %v2113_v3 = vsel %vm2080_vm7, %v2060_v13, %v2097_v36  ;;  %vm2081_vm1 = vcmp.ge.f32.partialorder %v2063_v17, 0.0  ;;  %v2098_v14 = vmul.f32 %v4356_v1, %v2063_v17  ;;  %v4583_v13 = vld [vmem:[#allocation2 + $0xe8] sm:$0x3]  ;;  %vm4890_vm7 = vmmov %vm4885_vm0 }
 0x448   :  { %v2129_v61 = vsub.f32 %v2113_v3, %v3583_v12  ;;  %v4545_v38 = vsel %vm499_vm14, %v2269_v48, %v2270_v2  ;;  %v2384_v58 = vrot.slane %v4553_v46, 2  ;;  %v2385_v40 = vrot.slane %v4583_v13, 2 }
 0x449   :  { %2144 = vst.msk [vmem:[#allocation2 + $0x101] sm:$0xff] %vm49_vm2, %v2128_v43  ;;  %2600 = vrot.lane.b32.xlu0 %v2580_v55, %s3239_s20  ;;  %v2114_v32 = vsel %vm2081_vm1, %v2063_v17, %v2098_v14  ;;  %v4551_v12 = vpack.c.bf16 %v4545_v38, %v2268_v21  ;;  %v2670_v36 = vrot.slane %v4453_v24, 1  ;;  %v2579_v24 = vpack.c.bf16 %v4496_v0, %v4471_v9  ;;  %vm4891_vm1 = vmmov %vm4886_vm3 }
 0x44a   :  { %2145 = vst.msk [vmem:[#allocation2 + $0x111] sm:$0xff] %vm49_vm2, %v2129_v61  ;;  %v2130_v31 = vsub.f32 %v2114_v32, %v3616_v35  ;;  %v4598_v55 = vsel %vm613_vm9, %v2384_v58, %v2385_v40 }
 0x44c   :  { %2146 = vst.msk [vmem:[#allocation2 + $0x121] sm:$0xff] %vm49_vm2, %v2130_v31 }
 0x44d   :  { %2642 = vrot.lane.b32.xlu0 %v2193_v23, %s3236_s17  ;;  %v4568_v23 = vpack.c.bf16 %v4556_v29, %v2380_v57  ;;  %v2513_v57 = vrot.slane %v4473_v53, 1 }
 0x44e   :  { %v2178_v1 = vld [vmem:[#allocation2 + $0xf0] sm:$0xff]  ;;  %v2179_v51 = vld [vmem:[#allocation2 + $0xf8] sm:$0x3] }
 0x44f   :  { %v4559_v35 = vpack.c.bf16 %v2178_v1, %v4553_v46  ;;  %v2387_v28 = vrot.slane %v2178_v1, 2  ;;  %v2388_v15 = vrot.slane %v2179_v51, 2  ;;  %v2514_v63 = vsel %vm499_vm14, %v2512_v42, %v2513_v57 }
 0x450   :  { %v2180_v22 = vld [vmem:[#allocation2 + $0x100] sm:$0xff]  ;;  %v2523_v17 = vpack.c.bf16 %v2514_v63, %v4463_v60  ;;  %v2181_v43 = vld [vmem:[#allocation2 + $0x108] sm:$0x3]  ;;  %v2672_v60 = vsel %vm499_vm14, %v2670_v36, %v2671_v18  ;;  %v2275_v27 = vrot.slane %v2178_v1, 1  ;;  %v2276_v32 = vrot.slane %v2179_v51, 1 }
 0x451   :  { %2690 = vrot.lane.b32.xlu0 %v4551_v12, %s3240_s24  ;;  %v4563_v59 = vld [vmem:[#allocation2 + $0x110] sm:$0xff]  ;;  %2202 = vst.msk [vmem:[#allocation4 + $0x30] sm:$0xff] %vm49_vm2, %v4559_v35  ;;  %v2466_v16 = vpack.c.bf16 %v2180_v22, %v2178_v1  ;;  %v2389_v53 = vsel %vm613_vm9, %v2387_v28, %v2388_v15  ;;  %v2278_v14 = vrot.slane %v2180_v22, 1  ;;  %v2279_v2 = vrot.slane %v2181_v43, 1  ;;  %v2183_v61 = vld [vmem:[#allocation2 + $0x118] sm:$0x3] }
 0x452   :  { %v2195_v21 = vpack.c.bf16 %v4563_v59, %v2180_v22  ;;  %v2418_v48 = vpack.c.bf16 %v2389_v53, %v4598_v55  ;;  %v2390_v20 = vrot.slane %v2180_v22, 2  ;;  %v2282_v42 = vrot.slane %v2183_v61, 1 }
 0x453   :  { %v4571_v47 = vld [vmem:[#allocation2 + $0x120] sm:$0xff]  ;;  %v2185_v3 = vld [vmem:[#allocation2 + $0x128] sm:$0x3]  ;;  %v2391_v57 = vrot.slane %v2181_v43, 2  ;;  %v2678_v9 = vpack.c.bf16 %v2672_v60, %v2514_v63  ;;  %v4612_v0 = vsel %vm499_vm14, %v2275_v27, %v2276_v32  ;;  %v2393_v58 = vrot.slane %v4563_v59, 2 }
 0x454   :  { %v2467_v25 = vpack.c.bf16 %v4571_v47, %v4563_v59  ;;  %2203 = vst.msk [vmem:[#allocation4 + $0x38] sm:$0xff] %vm49_vm2, %v2195_v21  ;;  %v2625_v33 = vpack.c.bf16 %v4578_v34, %v4571_v47  ;;  %v2515_v31 = vrot.slane %v4571_v47, 1  ;;  %v2516_v7 = vrot.slane %v2185_v3, 1 }
 0x455   :  { %2734 = vrot.lane.b32.xlu0 %v4568_v23, %s3241_s2  ;;  %v2571_v51 = vrot.slane %v4571_v47, 2  ;;  %v2572_v28 = vrot.slane %v2185_v3, 2  ;;  %v2394_v63 = vrot.slane %v2183_v61, 2  ;;  %v2261_v18 = vrot.slane %v4500_v10, 1 }
 0x456   :  { %2490 = vrot.lane.b32.xlu1 %v2467_v25, %s3234_s3  ;;  %v2281_v25 = vrot.slane %v4563_v59, 1  ;;  %v4615_v1 = vsel %vm499_vm14, %v2515_v31, %v2516_v7  ;;  %v2465_v60 = vpack.c.bf16 %v4553_v46, %v4515_v41  ;;  %vm4883_vm2 = vcmask 195744  }
 0x457   :  { %v4627_v47 = vsel %vm613_vm9, %v2571_v51, %v2572_v28  ;;  %v2395_v59 = vsel %vm613_vm9, %v2393_v58, %v2394_v63  ;;  %v2273_v32 = vrot.slane %v4583_v13, 1  ;;  %vm4887_vm4 = vmmov %vm4883_vm2 }
 0x458   :  { %v2283_v15 = vsel %vm499_vm14, %v2281_v25, %v2282_v42  ;;  %v2583_v3 = vpack.c.bf16 %v4627_v47, %v2395_v59 }
 0x459   :  { %2488 = vrot.lane.b32.xlu0 %v2466_v16, %s3234_s3  ;;  %v2527_v36 = vpack.c.bf16 %v4615_v1, %v2283_v15 }
 0x45a   :  { %2648 = vrot.lane.b32.xlu1 %v2625_v33, %s3236_s17  ;;  %v2392_v33 = vsel %vm613_vm9, %v2390_v20, %v2391_v57 }
 0x45b   :  { %v2582_v43 = vpack.c.bf16 %v2392_v33, %v2389_v53 }
 0x45d   :  { %2646 = vrot.lane.b32.xlu0 %v2195_v21, %s3236_s17  ;;  %v2280_v21 = vsel %vm499_vm14, %v2278_v14, %v2279_v2  ;;  %v2419_v2 = vpack.c.bf16 %v2395_v59, %v2392_v33  ;;  %v2717_v33 = vrot.slane %v4578_v34, 2 }
 0x45e   :  { %2542 = vrot.lane.b32.xlu1 %v2523_v17, %s3237_s18  ;;  %v2526_v22 = vpack.c.bf16 %v2280_v21, %v4612_v0  ;;  %v2260_v17 = vrot.slane %v4475_v56, 1  ;;  %v2307_v56 = vpack.c.bf16 %v2283_v15, %v2280_v21  ;;  %v2581_v21 = vpack.c.bf16 %v4598_v55, %v4556_v29 }
 0x460   :  { %v2262_v14 = vsel %vm499_vm14, %v2260_v17, %v2261_v18 }
 0x461   :  { %2736 = vrot.lane.b32.xlu0 %v2418_v48, %s3241_s2  ;;  %v2304_v53 = vpack.c.bf16 %v4525_v44, %v2262_v14  ;;  %v2272_v44 = vrot.slane %v4553_v46, 1 }
 0x462   :  { %2598 = vrot.lane.b32.xlu1 %v2579_v24, %s3239_s20 }
 0x463   :  { %v2274_v41 = vsel %vm499_vm14, %v2272_v44, %v2273_v32 }
 0x464   :  { %v2477_v16 = vpop.permute.xlu0 %2476  ;;  %v2525_v13 = vpack.c.bf16 %v2274_v41, %v4545_v38  ;;  %v2306_v57 = vpack.c.bf16 %v4612_v0, %v2274_v41 }
 0x465   :  { %2440 = vrot.lane.b32.xlu0 %v2418_v48, %s3235_s16 }
 0x466   :  { %2688 = vrot.lane.b32.xlu1 %v2678_v9, %s3240_s24  ;;  %v2187_v9 = vld [vmem:[#allocation2 + $0x138] sm:$0x3] }
 0x467   :  { %v2674_v0 = vrot.slane %v2187_v9, 1  ;;  %v2718_v63 = vrot.slane %v2187_v9, 2 }
 0x468   :  { %v2317_v40 = vpop.permute.xlu0 %2316 }
 0x469   :  { %2548 = vrot.lane.b32.xlu0 %v2526_v22, %s3237_s18  ;;  %2340 = vst.msk [vmem:[#allocation4] sm:$0xff] %vm604_vm10, %v2317_v40  ;;  %v2719_v18 = vsel %vm613_vm9, %v2717_v33, %v2718_v63  ;;  %vm4896_vm9 = vmmov %vm4891_vm1 }
 0x46a   :  { %2550 = vrot.lane.b32.xlu1 %v2527_v36, %s3237_s18  ;;  %v2723_v59 = vpack.c.bf16 %v2719_v18, %v4627_v47 }
 0x46c   :  { %v2429_v48 = vpop.permute.xlu0 %2428 }
 0x46d   :  { %2604 = vrot.lane.b32.xlu0 %v2582_v43, %s3239_s20  ;;  %2452 = vst.msk [vmem:[#allocation4] sm:$0xff] %vm718_vm12, %v2429_v48 }
 0x46e   :  { %2500 = vst.msk [vmem:[#allocation4] sm:$0xff] %vm767_vm13, %v2477_v16  ;;  %2606 = vrot.lane.b32.xlu1 %v2583_v3, %s3239_s20 }
 0x470   :  { %v2537_v10 = vpop.permute.xlu0 %2536 }
 0x471   :  { %2694 = vrot.lane.b32.xlu0 %v2307_v56, %s3240_s24  ;;  %2560 = vst.msk [vmem:[#allocation4] sm:$0xff] %vm828_vm15, %v2537_v10 }
 0x472   :  { %2324 = vrot.lane.b32.xlu1 %v2304_v53, %s3238_s19 }
 0x474   :  { %v2593_v24 = vpop.permute.xlu0 %2592 }
 0x475   :  { %2738 = vrot.lane.b32.xlu0 %v2419_v2, %s3241_s2  ;;  %2616 = vst.msk [vmem:[#allocation4] sm:$0xff] %vm4883_vm2, %v2593_v24  ;;  %vm4892_vm2 = vmmov %vm4888_vm5 }
 0x476   :  { %2486 = vrot.lane.b32.xlu1 %v2465_v60, %s3234_s3 }
 0x478   :  { %v2479_v61 = vpop.permute.xlu1 %2478  ;;  %v2635_v27 = vpop.permute.xlu0 %2634 }
 0x479   :  { %2658 = vst.msk [vmem:[#allocation4] sm:$0xff] %vm4884_vm8, %v2635_v27  ;;  %vm4893_vm8 = vmmov %vm4887_vm4 }
 0x47a   :  { %2326 = vrot.lane.b32.xlu1 %v4551_v12, %s3238_s19 }
 0x47c   :  { %v2319_v31 = vpop.permute.xlu1 %2318  ;;  %v2683_v7 = vpop.permute.xlu0 %2682 }
 0x47d   :  { %2341 = vst.msk [vmem:[#allocation4 + $0x8] sm:$0xff] %vm604_vm10, %v2319_v31 }
 0x47e   :  { %2706 = vst.msk [vmem:[#allocation4] sm:$0xff] %vm4885_vm0, %v2683_v7  ;;  %2438 = vrot.lane.b32.xlu1 %v4568_v23, %s3235_s16  ;;  %vm4894_vm0 = vmmov %vm4889_vm6 }
 0x480   :  { %v2431_v20 = vpop.permute.xlu1 %2430  ;;  %v2727_v46 = vpop.permute.xlu0 %2726 }
 0x481   :  { %2453 = vst.msk [vmem:[#allocation4 + $0x8] sm:$0xff] %vm718_vm12, %v2431_v20 }
 0x482   :  { %2501 = vst.msk [vmem:[#allocation4 + $0x8] sm:$0xff] %vm767_vm13, %v2479_v61  ;;  %2546 = vrot.lane.b32.xlu1 %v2525_v13, %s3237_s18 }
 0x483   :  { %2750 = vst.msk [vmem:[#allocation4] sm:$0xff] %vm4886_vm3, %v2727_v46  ;;  %vm4897_vm3 = vmmov %vm4892_vm2 }
 0x484   :  { %v2539_v12 = vpop.permute.xlu1 %2538 }
 0x485   :  { %2561 = vst.msk [vmem:[#allocation4 + $0x8] sm:$0xff] %vm828_vm15, %v2539_v12 }
 0x486   :  { %2602 = vrot.lane.b32.xlu1 %v2581_v21, %s3239_s20 }
 0x488   :  { %v2595_v23 = vpop.permute.xlu1 %2594 }
 0x489   :  { %2617 = vst.msk [vmem:[#allocation4 + $0x8] sm:$0xff] %vm4887_vm4, %v2595_v23 }
 0x48a   :  { %v2758_v25 = vld [vmem:[#allocation4] sm:$0xff]  ;;  %2644 = vrot.lane.b32.xlu1 %v4559_v35, %s3236_s17  ;;  %v2673_v35 = vrot.slane %v4578_v34, 1 }
 0x48b   :  { %3142 = vmatprep.mubr.msk.bf16.mxu1 %vm4888_vm5, %v2758_v25  ;;  %v2481_v38 = vpop.permute.xlu0 %2480  ;;  %vm4898_vm5 = vmmov %vm4894_vm0 }
 0x48c   :  { %v2637_v42 = vpop.permute.xlu1 %2636  ;;  %v2675_v58 = vsel %vm499_vm14, %v2673_v35, %v2674_v0  ;;  %vm4895_vm14 = vmmov %vm4890_vm7 }
 0x48d   :  { %2659 = vst.msk [vmem:[#allocation4 + $0x8] sm:$0xff] %vm4889_vm6, %v2637_v42  ;;  %v2679_v17 = vpack.c.bf16 %v2675_v58, %v4615_v1  ;;  %vm4899_vm6 = vmmov %vm4890_vm7 }
 0x48e   :  { %2692 = vrot.lane.b32.xlu1 %v2306_v57, %s3240_s24 }
 0x48f   :  { %v2729_v29 = vpop.permute.xlu0 %2728 }
 0x490   :  { %v2685_v55 = vpop.permute.xlu1 %2684 }
 0x491   :  { %2707 = vst.msk [vmem:[#allocation4 + $0x8] sm:$0xff] %vm4890_vm7, %v2685_v55  ;;  %vm4900_vm7 = vmmov %vm4891_vm1 }
 0x492   :  { %2751 = vst.msk [vmem:[#allocation4 + $0x8] sm:$0xff] %vm4891_vm1, %v2729_v29  ;;  %2328 = vrot.lane.b32.xlu1 %v2306_v57, %s3238_s19  ;;  %vm4901_vm1 = vmmov %vm4892_vm2 }
 0x493   :  { %v2433_v16 = vpop.permute.xlu0 %2432 }
 0x494   :  { %v2321_v51 = vpop.permute.xlu1 %2320 }
 0x495   :  { %2342 = vst.msk [vmem:[#allocation4 + $0x10] sm:$0xff] %vm604_vm10, %v2321_v51 }
 0x496   :  { %2454 = vst.msk [vmem:[#allocation4 + $0x10] sm:$0xff] %vm718_vm12, %v2433_v16  ;;  %2330 = vrot.lane.b32.xlu1 %v2307_v56, %s3238_s19 }
 0x497   :  { %2502 = vst.msk [vmem:[#allocation4 + $0x10] sm:$0xff] %vm767_vm13, %v2481_v38  ;;  %v2541_v28 = vpop.permute.xlu0 %2540 }
 0x498   :  { %2562 = vst.msk [vmem:[#allocation4 + $0x10] sm:$0xff] %vm828_vm15, %v2541_v28  ;;  %v2483_v22 = vpop.permute.xlu1 %2482 }
 0x499   :  { %v2759_v15 = vld [vmem:[#allocation4 + $0x8] sm:$0xff] }
 0x49a   :  { %3143 = vmatmul.mubr.msk.bf16.vlgmr.msra.gmra.mrb[20].mxu1 %vm4892_vm2, %v2759_v15  ;;  %2442 = vrot.lane.b32.xlu1 %v2419_v2, %s3235_s16  ;;  %vm4902_vm2 = vmmov %vm4887_vm4 }
 0x49b   :  { %v2597_v40 = vpop.permute.xlu0 %2596 }
 0x49c   :  { %2618 = vst.msk [vmem:[#allocation4 + $0x10] sm:$0xff] %vm4893_vm8, %v2597_v40  ;;  %v2641_v36 = vpop.permute.xlu1 %2640  ;;  %vm4903_vm8 = vmmov %vm4894_vm0 }
 0x49e   :  { %2696 = vrot.lane.b32.xlu1 %v2679_v17, %s3240_s24 }
 0x49f   :  { %v2639_v43 = vpop.permute.xlu0 %2638 }
 0x4a0   :  { %2660 = vst.msk [vmem:[#allocation4 + $0x10] sm:$0xff] %vm4894_vm0, %v2639_v43  ;;  %v2323_v34 = vpop.permute.xlu1 %2322  ;;  %vm4904_vm0 = vmmov %vm4899_vm6  ;;  %v4751_v43 = vld [vmem:[%s4876_s9] ss:$0 sm:$0xff] }
 0x4a1   :  { %2343 = vst.msk [vmem:[#allocation4 + $0x18] sm:$0xff] %vm604_vm10, %v2323_v34 }
 0x4a2   :  { %2740 = vrot.lane.b32.xlu1 %v2723_v59, %s3241_s2  ;;  %v4753_v59 = vstv %s3052_s8 }
 0x4a3   :  { %v2687_v48 = vpop.permute.xlu0 %2686 }
 0x4a4   :  { %2708 = vst.msk [vmem:[#allocation4 + $0x10] sm:$0xff] %vm4895_vm14, %v2687_v48  ;;  %v2435_v3 = vpop.permute.xlu1 %2434  ;;  %vm4905_vm14 = vmmov %vm4900_vm7 }
 0x4a5   :  { %2455 = vst.msk [vmem:[#allocation4 + $0x18] sm:$0xff] %vm718_vm12, %v2435_v3 }
 0x4a6   :  { %2503 = vst.msk [vmem:[#allocation4 + $0x18] sm:$0xff] %vm767_vm13, %v2483_v22 }
 0x4a7   :  { %v2731_v1 = vpop.permute.xlu0 %2730 }
 0x4a8   :  { %2752 = vst.msk [vmem:[#allocation4 + $0x10] sm:$0xff] %vm4896_vm9, %v2731_v1  ;;  %vm4906_vm9 = vmmov %vm4901_vm1 }
 0x4ab   :  { %v2733_v56 = vpop.permute.xlu0 %2732 }
 0x4af   :  { %v2760_v14 = vld [vmem:[#allocation4 + $0x10] sm:$0xff]  ;;  %v2485_v10 = vpop.permute.xlu0 %2484 }
 0x4b0   :  { %3146 = vmatprep.mubr.msk.bf16.mxu1 %vm4897_vm3, %v2760_v14  ;;  %vm4907_vm3 = vmmov %vm4902_vm2 }
 0x4b3   :  { %v2437_v53 = vpop.permute.xlu0 %2436 }
 0x4b7   :  { %v2545_v47 = vpop.permute.xlu0 %2544 }
 0x4bb   :  { %v2601_v24 = vpop.permute.xlu0 %2600 }
 0x4bf   :  { %v2643_v61 = vpop.permute.xlu0 %2642 }
 0x4c3   :  { %v2691_v32 = vpop.permute.xlu0 %2690 }
 0x4c7   :  { %v2735_v7 = vpop.permute.xlu0 %2734 }
 0x4c8   :  { %v4700_v2 = vpop.permute.xlu1 %2490 }
 0x4cb   :  { %v2489_v46 = vpop.permute.xlu0 %2488 }
 0x4cc   :  { %v4702_v60 = vpop.permute.xlu1 %2648 }
 0x4cf   :  { %v2647_v21 = vpop.permute.xlu0 %2646 }
 0x4d0   :  { %v2543_v27 = vpop.permute.xlu1 %2542 }
 0x4d1   :  { %2563 = vst.msk [vmem:[#allocation4 + $0x18] sm:$0xff] %vm828_vm15, %v2543_v27 }
 0x4d3   :  { %v2737_v38 = vpop.permute.xlu0 %2736 }
 0x4d4   :  { %v2599_v44 = vpop.permute.xlu1 %2598 }
 0x4d5   :  { %2619 = vst.msk [vmem:[#allocation4 + $0x18] sm:$0xff] %vm4887_vm4, %v2599_v44  ;;  %vm4908_vm4 = vmmov %vm4898_vm5 }
 0x4d6   :  { %2661 = vst.msk [vmem:[#allocation4 + $0x18] sm:$0xff] %vm4898_vm5, %v2641_v36  ;;  %vm4909_vm5 = vmmov %vm4904_vm0 }
 0x4d7   :  { %v2441_v57 = vpop.permute.xlu0 %2440 }
 0x4d8   :  { %v2689_v31 = vpop.permute.xlu1 %2688 }
 0x4d9   :  { %2709 = vst.msk [vmem:[#allocation4 + $0x18] sm:$0xff] %vm4899_vm6, %v2689_v31  ;;  %vm4910_vm6 = vmmov %vm4900_vm7 }
 0x4da   :  { %2753 = vst.msk [vmem:[#allocation4 + $0x18] sm:$0xff] %vm4900_vm7, %v2733_v56  ;;  %vm4911_vm7 = vmmov %vm4902_vm2 }
 0x4db   :  { %v2549_v9 = vpop.permute.xlu0 %2548 }
 0x4dc   :  { %v2551_v41 = vpop.permute.xlu1 %2550 }
 0x4df   :  { %v2605_v35 = vpop.permute.xlu0 %2604 }
 0x4e0   :  { %v2607_v20 = vpop.permute.xlu1 %2606 }
 0x4e1   :  { %v2761_v13 = vld [vmem:[#allocation4 + $0x18] sm:$0xff] }
 0x4e2   :  { %3147 = vmatmul.mubr.msk.bf16.gmra.mrb[24].mxu1 %vm4901_vm1, %v2761_v13  ;;  %vm4912_vm1 = vmmov %vm4908_vm4 }
 0x4e3   :  { %v2695_v22 = vpop.permute.xlu0 %2694 }
 0x4e4   :  { %v2325_v12 = vpop.permute.xlu1 %2324 }
 0x4e5   :  { %2344 = vst.msk [vmem:[#allocation4 + $0x20] sm:$0xff] %vm604_vm10, %v2325_v12 }
 0x4e6   :  { %2456 = vst.msk [vmem:[#allocation4 + $0x20] sm:$0xff] %vm718_vm12, %v2437_v53 }
 0x4e7   :  { %2504 = vst.msk [vmem:[#allocation4 + $0x20] sm:$0xff] %vm767_vm13, %v2485_v10  ;;  %v2739_v58 = vpop.permute.xlu0 %2738 }
 0x4e8   :  { %2564 = vst.msk [vmem:[#allocation4 + $0x20] sm:$0xff] %vm828_vm15, %v2545_v47  ;;  %v2487_v23 = vpop.permute.xlu1 %2486 }
 0x4e9   :  { %2620 = vst.msk [vmem:[#allocation4 + $0x20] sm:$0xff] %vm4902_vm2, %v2601_v24  ;;  %vm4913_vm2 = vmmov %vm4906_vm9 }
 0x4ea   :  { %2662 = vst.msk [vmem:[#allocation4 + $0x20] sm:$0xff] %vm4903_vm8, %v2643_v61  ;;  %vm4914_vm8 = vmmov %vm4904_vm0 }
 0x4eb   :  { %2710 = vst.msk [vmem:[#allocation4 + $0x20] sm:$0xff] %vm4904_vm0, %v2691_v32  ;;  %vm4915_vm0 = vmmov %vm4910_vm6 }
 0x4ec   :  { %2754 = vst.msk [vmem:[#allocation4 + $0x20] sm:$0xff] %vm4905_vm14, %v2735_v7  ;;  %v2327_v25 = vpop.permute.xlu1 %2326  ;;  %vm4916_vm14 = vmmov %vm4907_vm3 }
 0x4ed   :  { %2345 = vst.msk [vmem:[#allocation4 + $0x28] sm:$0xff] %vm604_vm10, %v2327_v25 }
 0x4f0   :  { %v2439_v42 = vpop.permute.xlu1 %2438 }
 0x4f1   :  { %2457 = vst.msk [vmem:[#allocation4 + $0x28] sm:$0xff] %vm718_vm12, %v2439_v42 }
 0x4f2   :  { %2505 = vst.msk [vmem:[#allocation4 + $0x28] sm:$0xff] %vm767_vm13, %v2487_v23 }
 0x4f3   :  { %v2762_v29 = vld [vmem:[#allocation4 + $0x20] sm:$0xff] }
 0x4f4   :  { %v2547_v55 = vpop.permute.xlu1 %2546  ;;  %3150 = vmatprep.mubr.msk.bf16.mxu1 %vm4906_vm9, %v2762_v29  ;;  %vm4918_vm9 = vmmov %vm4909_vm5 }
 0x4f5   :  { %2565 = vst.msk [vmem:[#allocation4 + $0x28] sm:$0xff] %vm828_vm15, %v2547_v55 }
 0x4f8   :  { %v2603_v16 = vpop.permute.xlu1 %2602 }
 0x4f9   :  { %2621 = vst.msk [vmem:[#allocation4 + $0x28] sm:$0xff] %vm4907_vm3, %v2603_v16  ;;  %vm4919_vm3 = vmmov %vm4913_vm2 }
 0x4fc   :  { %v2645_v51 = vpop.permute.xlu1 %2644 }
 0x4fd   :  { %2663 = vst.msk [vmem:[#allocation4 + $0x28] sm:$0xff] %vm4908_vm4, %v2645_v51  ;;  %vm4920_vm4 = vmmov %vm4915_vm0 }
 0x500   :  { %v2693_v0 = vpop.permute.xlu1 %2692 }
 0x501   :  { %2711 = vst.msk [vmem:[#allocation4 + $0x28] sm:$0xff] %vm4909_vm5, %v2693_v0 }
 0x502   :  { %2755 = vst.msk [vmem:[#allocation4 + $0x28] sm:$0xff] %vm4910_vm6, %v2737_v38 }
 0x504   :  { %v2329_v28 = vpop.permute.xlu1 %2328 }
 0x505   :  { %2346 = vst.msk [vmem:[#allocation4 + $0x30] sm:$0xff] %vm604_vm10, %v2329_v28 }
 0x506   :  { %2458 = vst.msk [vmem:[#allocation4 + $0x30] sm:$0xff] %vm718_vm12, %v2441_v57 }
 0x507   :  { %2506 = vst.msk [vmem:[#allocation4 + $0x30] sm:$0xff] %vm767_vm13, %v2489_v46 }
 0x508   :  { %2566 = vst.msk [vmem:[#allocation4 + $0x30] sm:$0xff] %vm828_vm15, %v2549_v9  ;;  %v2331_v15 = vpop.permute.xlu1 %2330 }
 0x509   :  { %2622 = vst.msk [vmem:[#allocation4 + $0x30] sm:$0xff] %vm4911_vm7, %v2605_v35  ;;  %v2763_v33 = vld [vmem:[#allocation4 + $0x28] sm:$0xff] }
 0x50a   :  { %2347 = vst.msk [vmem:[#allocation4 + $0x38] sm:$0xff] %vm604_vm10, %v2331_v15  ;;  %3151 = vmatmul.mubr.msk.bf16.gmra.mrb[28].mxu1 %vm4913_vm2, %v2763_v33  ;;  %vm4917_vm10 = vmmov %vm4912_vm1 }
 0x50b   :  { %2664 = vst.msk [vmem:[#allocation4 + $0x30] sm:$0xff] %vm4912_vm1, %v2647_v21 }
 0x50c   :  { %2712 = vst.msk [vmem:[#allocation4 + $0x30] sm:$0xff] %vm4914_vm8, %v2695_v22  ;;  %v2443_v63 = vpop.permute.xlu1 %2442 }
 0x50d   :  { %2756 = vst.msk [vmem:[#allocation4 + $0x30] sm:$0xff] %vm4915_vm0, %v2739_v58 }
 0x50e   :  { %2459 = vst.msk [vmem:[#allocation4 + $0x38] sm:$0xff] %vm718_vm12, %v2443_v63  ;;  %vm4921_vm12 = vmmov %vm4913_vm2 }
 0x50f   :  { %2507 = vst.msk [vmem:[#allocation4 + $0x38] sm:$0xff] %vm767_vm13, %v4700_v2 }
 0x510   :  { %2567 = vst.msk [vmem:[#allocation4 + $0x38] sm:$0xff] %vm828_vm15, %v2551_v41  ;;  %v2697_v40 = vpop.permute.xlu1 %2696 }
 0x511   :  { %2623 = vst.msk [vmem:[#allocation4 + $0x38] sm:$0xff] %vm4916_vm14, %v2607_v20 }
 0x512   :  { %2665 = vst.msk [vmem:[#allocation4 + $0x38] sm:$0xff] %vm4917_vm10, %v4702_v60 }
 0x513   :  { %2713 = vst.msk [vmem:[#allocation4 + $0x38] sm:$0xff] %vm4918_vm9, %v2697_v40 }
 0x514   :  { %v2764_v36 = vld [vmem:[#allocation4 + $0x30] sm:$0xff]  ;;  %v2741_v17 = vpop.permute.xlu1 %2740 }
 0x515   :  { %3154 = vmatprep.mubr.msk.bf16.mxu1 %vm4919_vm3, %v2764_v36  ;;  %2757 = vst.msk [vmem:[#allocation4 + $0x38] sm:$0xff] %vm4920_vm4, %v2741_v17 }
 0x51c   :  { %v2765_v18 = vld [vmem:[#allocation4 + $0x38] sm:$0xff] }
 0x51d   :  { %3155 = vmatmul.mubr.msk.bf16.gmra.mrb[32].mxu1 %vm4921_vm12, %v2765_v18 }
 0x56d   :  { %v3144_v34 = vpop.f32.mrb[20].mxu1 }
 0x56e   :  { %v2863_v48 = vadd.f32 %v3144_v34, %v4751_v43  ;;  %v2854_v3 = vpop.f32.mrb[21].mxu1 }
 0x56f   :  { %v2855_v1 = vadd.f32 %v4751_v43, %v2854_v3  ;;  %v3145_v14 = vpop.f32.mrb[22].mxu1 }
 0x570   :  { %vm2919_vm13 = vcmp.ge.f32.partialorder %v2863_v48, 0.0  ;;  %v2936_v56 = vmul.f32 %v4753_v59, %v2863_v48  ;;  %v2866_v10 = vadd.f32 %v3145_v14, %v4751_v43  ;;  %v2857_v53 = vpop.f32.mrb[23].mxu1 }
 0x571   :  { %vm2917_vm15 = vcmp.ge.f32.partialorder %v2855_v1, 0.0  ;;  %v2934_v47 = vmul.f32 %v4753_v59, %v2855_v1  ;;  %v2858_v2 = vadd.f32 %v4751_v43, %v2857_v53 }
 0x572   :  { %v2952_v24 = vsel %vm2919_vm13, %v2863_v48, %v2936_v56  ;;  %vm2920_vm5 = vcmp.ge.f32.partialorder %v2866_v10, 0.0  ;;  %v2937_v60 = vmul.f32 %v4753_v59, %v2866_v10 }
 0x573   :  { %v2968_v61 = vadd.f32 %v2952_v24, %v3991_v39  ;;  %v2950_v27 = vsel %vm2917_vm15, %v2855_v1, %v2934_v47  ;;  %vm2918_vm6 = vcmp.ge.f32.partialorder %v2858_v2, 0.0  ;;  %v2935_v44 = vmul.f32 %v4753_v59, %v2858_v2 }
 0x574   :  { %v2966_v32 = vadd.f32 %v2950_v27, %v3996_v5  ;;  %v2953_v31 = vsel %vm2920_vm5, %v2866_v10, %v2937_v60 }
 0x575   :  { %2984 = vst.msk [vmem:[%s4877_s10 + $0x10] sm:$0xff] %vm101_vm11, %v2968_v61  ;;  %v2969_v7 = vadd.f32 %v2953_v31, %v4001_v6  ;;  %v2951_v41 = vsel %vm2918_vm6, %v2858_v2, %v2935_v44 }
 0x576   :  { %2982 = vst.msk [vmem:[%s4877_s10] sm:$0xff] %vm101_vm11, %v2966_v32  ;;  %v2967_v39 = vadd.f32 %v2951_v41, %v4007_v8 }
 0x577   :  { %2985 = vst.msk [vmem:[%s4877_s10 + $0x18] sm:$0xff] %vm101_vm11, %v2969_v7 }
 0x578   :  { %2983 = vst.msk [vmem:[%s4877_s10 + $0x8] sm:$0xff] %vm101_vm11, %v2967_v39 }
 0x5b5   :  { %v3148_v5 = vpop.f32.mrb[24].mxu1 }
 0x5b6   :  { %v2879_v6 = vadd.f32 %v3148_v5, %v4751_v43  ;;  %v2870_v20 = vpop.f32.mrb[25].mxu1 }
 0x5b7   :  { %v2871_v46 = vadd.f32 %v4751_v43, %v2870_v20  ;;  %v3149_v13 = vpop.f32.mrb[26].mxu1 }
 0x5b8   :  { %vm2923_vm7 = vcmp.ge.f32.partialorder %v2879_v6, 0.0  ;;  %v2940_v8 = vmul.f32 %v4753_v59, %v2879_v6  ;;  %v2882_v12 = vadd.f32 %v3149_v13, %v4751_v43  ;;  %v2873_v21 = vpop.f32.mrb[27].mxu1 }
 0x5b9   :  { %vm2921_vm1 = vcmp.ge.f32.partialorder %v2871_v46, 0.0  ;;  %v2938_v23 = vmul.f32 %v4753_v59, %v2871_v46  ;;  %v2874_v25 = vadd.f32 %v4751_v43, %v2873_v21 }
 0x5ba   :  { %v2956_v38 = vsel %vm2923_vm7, %v2879_v6, %v2940_v8  ;;  %vm2924_vm2 = vcmp.ge.f32.partialorder %v2882_v12, 0.0  ;;  %v2941_v42 = vmul.f32 %v4753_v59, %v2882_v12 }
 0x5bb   :  { %v2972_v57 = vadd.f32 %v2956_v38, %v4086_v54  ;;  %v2954_v29 = vsel %vm2921_vm1, %v2871_v46, %v2938_v23  ;;  %vm2922_vm8 = vcmp.ge.f32.partialorder %v2874_v25, 0.0  ;;  %v2939_v55 = vmul.f32 %v4753_v59, %v2874_v25 }
 0x5bc   :  { %v2970_v16 = vadd.f32 %v2954_v29, %v4092_v37  ;;  %v2957_v9 = vsel %vm2924_vm2, %v2882_v12, %v2941_v42 }
 0x5bd   :  { %2988 = vst.msk [vmem:[%s4877_s10 + $0x30] sm:$0xff] %vm101_vm11, %v2972_v57  ;;  %v2973_v51 = vadd.f32 %v2957_v9, %v4097_v4  ;;  %v2955_v35 = vsel %vm2922_vm8, %v2874_v25, %v2939_v55 }
 0x5be   :  { %2986 = vst.msk [vmem:[%s4877_s10 + $0x20] sm:$0xff] %vm101_vm11, %v2970_v16  ;;  %v2971_v54 = vadd.f32 %v2955_v35, %v4101_v62 }
 0x5bf   :  { %2989 = vst.msk [vmem:[%s4877_s10 + $0x38] sm:$0xff] %vm101_vm11, %v2973_v51 }
 0x5c0   :  { %2987 = vst.msk [vmem:[%s4877_s10 + $0x28] sm:$0xff] %vm101_vm11, %v2971_v54 }
 0x5dd   :  { %v3152_v37 = vpop.f32.mrb[28].mxu1 }
 0x5de   :  { %v2895_v4 = vadd.f32 %v3152_v37, %v4751_v43  ;;  %v2886_v0 = vpop.f32.mrb[29].mxu1 }
 0x5df   :  { %v2887_v28 = vadd.f32 %v4751_v43, %v2886_v0  ;;  %v3153_v22 = vpop.f32.mrb[30].mxu1 }
 0x5e0   :  { %vm2927_vm0 = vcmp.ge.f32.partialorder %v2895_v4, 0.0  ;;  %v2944_v62 = vmul.f32 %v4753_v59, %v2895_v4  ;;  %v2898_v15 = vadd.f32 %v3153_v22, %v4751_v43  ;;  %v2889_v33 = vpop.f32.mrb[31].mxu1 }
 0x5e1   :  { %vm2925_vm14 = vcmp.ge.f32.partialorder %v2887_v28, 0.0  ;;  %v2942_v58 = vmul.f32 %v4753_v59, %v2887_v28  ;;  %v2890_v63 = vadd.f32 %v4751_v43, %v2889_v33 }
 0x5e2   :  { %v2960_v40 = vsel %vm2927_vm0, %v2895_v4, %v2944_v62  ;;  %vm2928_vm10 = vcmp.ge.f32.partialorder %v2898_v15, 0.0  ;;  %v2945_v36 = vmul.f32 %v4753_v59, %v2898_v15 }
 0x5e3   :  { %v2976_v17 = vadd.f32 %v2960_v40, %v4156_v11  ;;  %v2958_v18 = vsel %vm2925_vm14, %v2887_v28, %v2942_v58  ;;  %vm2926_vm9 = vcmp.ge.f32.partialorder %v2890_v63, 0.0  ;;  %v2943_v34 = vmul.f32 %v4753_v59, %v2890_v63 }
 0x5e4   :  { %v2974_v48 = vadd.f32 %v2958_v18, %v4161_v49  ;;  %v2961_v3 = vsel %vm2928_vm10, %v2898_v15, %v2945_v36 }
 0x5e5   :  { %2992 = vst.msk [vmem:[%s4877_s10 + $0x50] sm:$0xff] %vm101_vm11, %v2976_v17  ;;  %v2977_v1 = vadd.f32 %v2961_v3, %v4167_v52  ;;  %v2959_v14 = vsel %vm2926_vm9, %v2890_v63, %v2943_v34 }
 0x5e6   :  { %2990 = vst.msk [vmem:[%s4877_s10 + $0x40] sm:$0xff] %vm101_vm11, %v2974_v48  ;;  %v2975_v11 = vadd.f32 %v2959_v14, %v4172_v19 }
 0x5e7   :  { %2993 = vst.msk [vmem:[%s4877_s10 + $0x58] sm:$0xff] %vm101_vm11, %v2977_v1 }
 0x5e8   :  { %2991 = vst.msk [vmem:[%s4877_s10 + $0x48] sm:$0xff] %vm101_vm11, %v2975_v11 }
 0x5f0   :  { %v3156_v49 = vpop.f32.mrb[32].mxu1 }
 0x5f1   :  { %v2911_v52 = vadd.f32 %v3156_v49, %v4751_v43  ;;  %v2902_v56 = vpop.f32.mrb[33].mxu1 }
 0x5f2   :  { %v2903_v10 = vadd.f32 %v4751_v43, %v2902_v56  ;;  %v3157_v53 = vpop.f32.mrb[34].mxu1 }
 0x5f3   :  { %vm2931_vm3 = vcmp.ge.f32.partialorder %v2911_v52, 0.0  ;;  %v2948_v19 = vmul.f32 %v4753_v59, %v2911_v52  ;;  %v2914_v47 = vadd.f32 %v3157_v53, %v4751_v43  ;;  %v2905_v2 = vpop.f32.mrb[35].mxu1 }
 0x5f4   :  { %vm2929_vm4 = vcmp.ge.f32.partialorder %v2903_v10, 0.0  ;;  %v2946_v24 = vmul.f32 %v4753_v59, %v2903_v10  ;;  %v2906_v60 = vadd.f32 %v4751_v43, %v2905_v2 }
 0x5f5   :  { %v2964_v61 = vsel %vm2931_vm3, %v2911_v52, %v2948_v19  ;;  %vm2932_vm12 = vcmp.ge.f32.partialorder %v2914_v47, 0.0  ;;  %v2949_v27 = vmul.f32 %v4753_v59, %v2914_v47 }
 0x5f6   :  { %v2980_v44 = vadd.f32 %v2964_v61, %v4216_v30  ;;  %v2962_v32 = vsel %vm2929_vm4, %v2903_v10, %v2946_v24  ;;  %vm2930_vm13 = vcmp.ge.f32.partialorder %v2906_v60, 0.0  ;;  %v2947_v31 = vmul.f32 %v4753_v59, %v2906_v60 }
 0x5f7   :  { %v2978_v7 = vadd.f32 %v2962_v32, %v4222_v50  ;;  %v2965_v41 = vsel %vm2932_vm12, %v2914_v47, %v2949_v27 }
 0x5f8   :  { %2996 = vst.msk [vmem:[%s4877_s10 + $0x70] sm:$0xff] %vm101_vm11, %v2980_v44  ;;  %v2981_v43 = vadd.f32 %v2965_v41, %v4227_v26  ;;  %v2963_v39 = vsel %vm2930_vm13, %v2906_v60, %v2947_v31 }
 0x5f9   :  { %2994 = vst.msk [vmem:[%s4877_s10 + $0x60] sm:$0xff] %vm101_vm11, %v2978_v7  ;;  %v2979_v30 = vadd.f32 %v2963_v39, %v4231_v45 }
 0x5fa   :  { %2997 = vst.msk [vmem:[%s4877_s10 + $0x78] sm:$0xff] %vm101_vm11, %v2981_v43 }
 0x5fb   :  { %2995 = vst.msk [vmem:[%s4877_s10 + $0x68] sm:$0xff] %vm101_vm11, %v2979_v30 }
 0x5fc   :  { %3002 = vsyncpa [#allocation7], 1 }

</bundles_post_ra>
